<compile_context>
chip_gen: v7x
topology: tpu7x:2x2x1
jax: 0.10.0
libtpu: 0.0.40
codegen_flags: <defaults>
</compile_context>

<pallas_src>
import jax
import jax.numpy as jnp
import numpy as np
from jax.experimental import pallas as pl
from jax.experimental.pallas import tpu as pltpu

# --- model hyperparameters (from the reference module) ---
N_EMBED = 32
BLOCK_SIZE = 8
N_HEAD = 4
N_LAYER = 4
VOCAB_SIZE = 65  # synthetic: len(sorted(set(text))) for a Shakespeare-like corpus
HEAD_SIZE = N_EMBED // N_HEAD
LN_EPS = 1e-5

VOCAB_PAD = 128                       # lane-dense logits / embedding rows
ATTN_SCALE = float(N_EMBED) ** -0.5   # matches `C ** (-0.5)` in torch Head.forward
INV_C = 1.0 / float(N_EMBED)
INV_SQRT2 = 0.7071067811865476
NEG_BIG = -1e30                       # finite mask fill (avoids inf arithmetic)


def _layernorm(v, g, b):
    mu = jnp.sum(v, axis=-1, keepdims=True) * INV_C
    c = v - mu
    var = jnp.sum(c * c, axis=-1, keepdims=True) * INV_C
    return c * jax.lax.rsqrt(var + LN_EPS) * g + b


def gpt_forward_kernel(
    idx_ref,              # (T, 1)  int32 token ids for this batch row
    tok_emb_ref,          # (VOCAB_PAD, C)
    pos_emb_ref,          # (T, C)
    ln1_g_ref, ln1_b_ref,         # (L, C)
    wqkv_ref,                     # (L, C, 3C)  fused q|k|v
    wproj_ref, bproj_ref,         # (L, C, C), (L, C)
    ln2_g_ref, ln2_b_ref,         # (L, C)
    w1_ref, b1_ref,               # (L, C, 4C), (L, 4C)
    w2_ref, b2_ref,               # (L, 4C, C), (L, C)
    wlm_ref, blm_ref,             # (C, VOCAB_PAD), (1, VOCAB_PAD)
    out_ref,                      # (T, VOCAB_PAD)
):
    T = pos_emb_ref.shape[0]
    C = N_EMBED
    H, D = N_HEAD, HEAD_SIZE
    VP = tok_emb_ref.shape[0]

    # ---- fused token-embedding gather: one-hot @ tok_emb on the MXU ----
    vocab_iota = jax.lax.broadcasted_iota(jnp.int32, (T, VP), 1)
    onehot = (vocab_iota == idx_ref[...]).astype(jnp.float32)               # (T, VP)
    x = jnp.dot(onehot, tok_emb_ref[...], preferred_element_type=jnp.float32)  # (T, C)
    x = x + pos_emb_ref[...]

    # causal (tril) mask, built once with 2-D iota
    row = jax.lax.broadcasted_iota(jnp.int32, (T, T), 0)
    col = jax.lax.broadcasted_iota(jnp.int32, (T, T), 1)
    causal = col <= row                                                     # (T, T)

    for l in range(N_LAYER):  # static 4-layer unroll
        # ---- multi-head self attention (pre-LN), fused QKV projection ----
        xn = _layernorm(x, ln1_g_ref[l], ln1_b_ref[l])
        qkv = jnp.dot(xn, wqkv_ref[l], preferred_element_type=jnp.float32)  # (T, 3C)

        def split_heads(base):
            # static lane slices stacked along a leading (untiled) head axis
            return jnp.concatenate(
                [qkv[None, :, base + h * D: base + (h + 1) * D] for h in range(H)],
                axis=0)                                                     # (H, T, D)

        q3 = split_heads(0) * ATTN_SCALE    # fold C**-0.5 into q once
        k3 = split_heads(C)
        v3 = split_heads(2 * C)

        # single batched einsum over all heads (2 dot_generals per layer)
        wei = jnp.einsum("htd,hsd->hts", q3, k3,
                         preferred_element_type=jnp.float32)                # (H, T, T)
        wei = jnp.where(causal[None], wei, NEG_BIG)
        wei = wei - jnp.max(wei, axis=-1, keepdims=True)
        p = jnp.exp(wei)
        p = p * pl.reciprocal(jnp.sum(p, axis=-1, keepdims=True))
        att3 = jnp.einsum("hts,hsd->htd", p, v3,
                          preferred_element_type=jnp.float32)               # (H, T, D)
        att = jnp.concatenate([att3[h] for h in range(H)], axis=-1)         # (T, C)

        sa = jnp.dot(att, wproj_ref[l], preferred_element_type=jnp.float32) + bproj_ref[l]
        x = x + sa   # residual (dropout == identity)

        # ---- feed forward (pre-LN) ----
        xn2 = _layernorm(x, ln2_g_ref[l], ln2_b_ref[l])
        h1 = jnp.dot(xn2, w1_ref[l], preferred_element_type=jnp.float32) + b1_ref[l]
        h1 = 0.5 * h1 * (1.0 + jax.lax.erf(h1 * INV_SQRT2))
        ff = jnp.dot(h1, w2_ref[l], preferred_element_type=jnp.float32) + b2_ref[l]
        x = x + ff   # residual (dropout == identity)

    # lm_head (NOTE: lnf is never applied in the reference forward).
    # 128-lane-wide logits -> unmasked, lane-dense store.
    out_ref[...] = jnp.dot(x, wlm_ref[...], preferred_element_type=jnp.float32) + blm_ref[...]


def init_params(key):
    def nrm(k, shape, scale=0.02):
        return scale * jax.random.normal(k, shape, jnp.float32)

    ks = jax.random.split(key, 9)
    L, C, V = N_LAYER, N_EMBED, VOCAB_SIZE
    return dict(
        tok_emb=nrm(ks[0], (V, C)),
        pos_emb=nrm(ks[1], (BLOCK_SIZE, C)),
        ln1_g=jnp.ones((L, C), jnp.float32),
        ln1_b=jnp.zeros((L, C), jnp.float32),
        wq=nrm(ks[2], (L, C, C)),
        wk=nrm(ks[3], (L, C, C)),
        wv=nrm(ks[4], (L, C, C)),
        wproj=nrm(ks[5], (L, C, C)),
        bproj=jnp.zeros((L, C), jnp.float32),
        ln2_g=jnp.ones((L, C), jnp.float32),
        ln2_b=jnp.zeros((L, C), jnp.float32),
        w1=nrm(ks[6], (L, C, 4 * C)),
        b1=jnp.zeros((L, 4 * C), jnp.float32),
        w2=nrm(ks[7], (L, 4 * C, C)),
        b2=jnp.zeros((L, C), jnp.float32),
        wlm=nrm(ks[8], (C, V)),
        blm=jnp.zeros((1, V), jnp.float32),
    )


@jax.jit
def bigram_lm_forward(idx, params):
    """idx: (B, T) int32 token ids -> logits (B, T, vocab_size) float32."""
    B, T = idx.shape
    C = N_EMBED

    # --- tiny one-time weight prep: fuse QKV, pad vocab axis to 128 lanes ---
    tok_emb_p = jnp.zeros((VOCAB_PAD, C), jnp.float32).at[:VOCAB_SIZE].set(params["tok_emb"])
    pos_emb_t = params["pos_emb"][:T].astype(jnp.float32)                       # (T, C)
    wqkv = jnp.concatenate([params["wq"], params["wk"], params["wv"]], axis=-1)  # (L, C, 3C)
    wlm_p = jnp.zeros((C, VOCAB_PAD), jnp.float32).at[:, :VOCAB_SIZE].set(params["wlm"])
    blm_p = jnp.zeros((1, VOCAB_PAD), jnp.float32).at[:, :VOCAB_SIZE].set(params["blm"])

    idx3 = idx.astype(jnp.int32)[:, :, None]                                    # (B, T, 1)

    weights = (
        tok_emb_p, pos_emb_t,
        params["ln1_g"], params["ln1_b"], wqkv,
        params["wproj"], params["bproj"],
        params["ln2_g"], params["ln2_b"],
        params["w1"], params["b1"], params["w2"], params["b2"],
        wlm_p, blm_p,
    )

    def _full_spec(arr):  # full-array VMEM block, constant across the batch grid
        zeros = (0,) * arr.ndim
        return pl.BlockSpec(arr.shape, lambda b, _z=zeros: _z)

    in_specs = [pl.BlockSpec((None, T, 1), lambda b: (b, 0, 0))] \
        + [_full_spec(w) for w in weights]

    logits_p = pl.pallas_call(
        gpt_forward_kernel,
        grid=(B,),                                    # one batch row per program
        out_shape=jax.ShapeDtypeStruct((B, T, VOCAB_PAD), jnp.float32),
        in_specs=in_specs,
        out_specs=pl.BlockSpec((None, T, VOCAB_PAD), lambda b: (b, 0, 0)),
        compiler_params=pltpu.CompilerParams(dimension_semantics=("parallel",)),
    )(idx3, *weights)
    return logits_p[:, :, :VOCAB_SIZE]


def bigram_lm_reference(idx, params):
    """Pure-JAX reference for correctness checking (mirrors the PyTorch module)."""
    B, T = idx.shape
    x = (params["tok_emb"][idx] + params["pos_emb"][:T][None]).astype(jnp.float32)
    C = N_EMBED
    scale = 1.0 / np.sqrt(C)
    causal = np.tril(np.ones((T, T), dtype=bool))

    def ln(v, g, b):
        mu = jnp.mean(v, -1, keepdims=True)
        var = jnp.mean((v - mu) ** 2, -1, keepdims=True)
        return (v - mu) * jax.lax.rsqrt(var + LN_EPS) * g + b

    for l in range(N_LAYER):
        xn = ln(x, params["ln1_g"][l], params["ln1_b"][l])
        q = xn @ params["wq"][l]
        k = xn @ params["wk"][l]
        v = xn @ params["wv"][l]
        outs = []
        for h in range(N_HEAD):
            lo, hi = h * HEAD_SIZE, (h + 1) * HEAD_SIZE
            wei = jnp.einsum("btd,bsd->bts", q[..., lo:hi], k[..., lo:hi]) * scale
            wei = jnp.where(causal[None], wei, -jnp.inf)
            p = jax.nn.softmax(wei, axis=-1)
            outs.append(jnp.einsum("bts,bsd->btd", p, v[..., lo:hi]))
        sa = jnp.concatenate(outs, -1) @ params["wproj"][l] + params["bproj"][l]
        x = x + sa
        xn2 = ln(x, params["ln2_g"][l], params["ln2_b"][l])
        h1 = xn2 @ params["w1"][l] + params["b1"][l]
        h1 = 0.5 * h1 * (1.0 + jax.lax.erf(h1 / np.sqrt(2.0)))
        x = x + (h1 @ params["w2"][l] + params["b2"][l])
    return x @ params["wlm"] + params["blm"]


if __name__ == "__main__":
    key = jax.random.PRNGKey(0)
    pkey, dkey = jax.random.split(key)
    params = init_params(pkey)

    B, T = 2, BLOCK_SIZE
    idx = jax.random.randint(dkey, (B, T), 0, VOCAB_SIZE, dtype=jnp.int32)

    logits = bigram_lm_forward(idx, params)
    logits = jax.block_until_ready(logits)

    ref = bigram_lm_reference(idx, params)
    assert logits.shape == (B, T, VOCAB_SIZE)
    np.testing.assert_allclose(np.asarray(logits), np.asarray(ref), rtol=1e-3, atol=1e-3)

    # TODO(synk): the reference forward() returns None when targets is None (a bug in
    # the original module) and computes cross-entropy otherwise; loss/generate stay as glue.
    print("KERNEL_OK")
</pallas_src>

<mosaic_0001>
module attributes {stable_mosaic.version = 11 : i64} {
  func.func @gpt_forward_kernel(%arg0: i32, %arg1: memref<1x8x1xi32, #tpu.memory_space<vmem>>, %arg2: memref<128x32xf32, #tpu.memory_space<vmem>>, %arg3: memref<8x32xf32, #tpu.memory_space<vmem>>, %arg4: memref<4x32xf32, #tpu.memory_space<vmem>>, %arg5: memref<4x32xf32, #tpu.memory_space<vmem>>, %arg6: memref<4x32x96xf32, #tpu.memory_space<vmem>>, %arg7: memref<4x32x32xf32, #tpu.memory_space<vmem>>, %arg8: memref<4x32xf32, #tpu.memory_space<vmem>>, %arg9: memref<4x32xf32, #tpu.memory_space<vmem>>, %arg10: memref<4x32xf32, #tpu.memory_space<vmem>>, %arg11: memref<4x32x128xf32, #tpu.memory_space<vmem>>, %arg12: memref<4x128xf32, #tpu.memory_space<vmem>>, %arg13: memref<4x128x32xf32, #tpu.memory_space<vmem>>, %arg14: memref<4x32xf32, #tpu.memory_space<vmem>>, %arg15: memref<32x128xf32, #tpu.memory_space<vmem>>, %arg16: memref<1x128xf32, #tpu.memory_space<vmem>>, %arg17: memref<1x8x128xf32, #tpu.memory_space<vmem>>) attributes {dimension_semantics = [#tpu.dimension_semantics<parallel>], iteration_bounds = array<i64: 2>, scalar_prefetch = 0 : i64, scratch_operands = 0 : i64, tpu.core_type = #tpu.core_type<tc>, window_params = [{transform_indices = @transform_0, window_bounds = array<i64: 1, 8, 1>}, {pipeline_mode = #tpu.pipeline_mode<synchronous>, transform_indices = @transform_1, window_bounds = array<i64: 128, 32>}, {pipeline_mode = #tpu.pipeline_mode<synchronous>, transform_indices = @transform_2, window_bounds = array<i64: 8, 32>}, {pipeline_mode = #tpu.pipeline_mode<synchronous>, transform_indices = @transform_3, window_bounds = array<i64: 4, 32>}, {pipeline_mode = #tpu.pipeline_mode<synchronous>, transform_indices = @transform_4, window_bounds = array<i64: 4, 32>}, {pipeline_mode = #tpu.pipeline_mode<synchronous>, transform_indices = @transform_5, window_bounds = array<i64: 4, 32, 96>}, {pipeline_mode = #tpu.pipeline_mode<synchronous>, transform_indices = @transform_6, window_bounds = array<i64: 4, 32, 32>}, {pipeline_mode = #tpu.pipeline_mode<synchronous>, transform_indices = @transform_7, window_bounds = array<i64: 4, 32>}, {pipeline_mode = #tpu.pipeline_mode<synchronous>, transform_indices = @transform_8, window_bounds = array<i64: 4, 32>}, {pipeline_mode = #tpu.pipeline_mode<synchronous>, transform_indices = @transform_9, window_bounds = array<i64: 4, 32>}, {pipeline_mode = #tpu.pipeline_mode<synchronous>, transform_indices = @transform_10, window_bounds = array<i64: 4, 32, 128>}, {pipeline_mode = #tpu.pipeline_mode<synchronous>, transform_indices = @transform_11, window_bounds = array<i64: 4, 128>}, {pipeline_mode = #tpu.pipeline_mode<synchronous>, transform_indices = @transform_12, window_bounds = array<i64: 4, 128, 32>}, {pipeline_mode = #tpu.pipeline_mode<synchronous>, transform_indices = @transform_13, window_bounds = array<i64: 4, 32>}, {pipeline_mode = #tpu.pipeline_mode<synchronous>, transform_indices = @transform_14, window_bounds = array<i64: 32, 128>}, {pipeline_mode = #tpu.pipeline_mode<synchronous>, transform_indices = @transform_15, window_bounds = array<i64: 1, 128>}, {transform_indices = @transform_16, window_bounds = array<i64: 1, 8, 128>}]} {
    %0 = tpu.iota {dimensions = array<i32: 1>} : vector<8x128xi32>
    %c0 = arith.constant 0 : index
    %c0_0 = arith.constant 0 : index
    %c0_1 = arith.constant 0 : index
    %1 = vector.load %arg1[%c0, %c0_0, %c0_1] : memref<1x8x1xi32, #tpu.memory_space<vmem>>, vector<1x8x1xi32>
    %2 = vector.shape_cast %1 : vector<1x8x1xi32> to vector<8x1xi32>
    %3 = vector.broadcast %2 : vector<8x1xi32> to vector<8x128xi32>
    %4 = arith.cmpi eq, %0, %3 : vector<8x128xi32>
    %5 = arith.extui %4 : vector<8x128xi1> to vector<8x128xi32>
    %6 = arith.sitofp %5 : vector<8x128xi32> to vector<8x128xf32>
    %c0_2 = arith.constant 0 : index
    %c0_3 = arith.constant 0 : index
    %7 = vector.load %arg2[%c0_2, %c0_3] : memref<128x32xf32, #tpu.memory_space<vmem>>, vector<128x32xf32>
    %cst = arith.constant dense<0.000000e+00> : vector<8x32xf32>
    %8 = tpu.matmul %6, %7, %cst {dimension_numbers = #tpu.dot_dimension_numbers<[1], [0], [0], [1], [0, 0, 1, 1], [], []>} : vector<8x128xf32>, vector<128x32xf32>, vector<8x32xf32> -> vector<8x32xf32>
    %c0_4 = arith.constant 0 : index
    %c0_5 = arith.constant 0 : index
    %9 = vector.load %arg3[%c0_4, %c0_5] : memref<8x32xf32, #tpu.memory_space<vmem>>, vector<8x32xf32>
    %10 = arith.addf %8, %9 : vector<8x32xf32>
    %11 = tpu.iota {dimensions = array<i32: 0>} : vector<8x8xi32>
    %12 = tpu.iota {dimensions = array<i32: 1>} : vector<8x8xi32>
    %13 = arith.cmpi sle, %12, %11 : vector<8x8xi32>
    %c0_6 = arith.constant 0 : index
    %c0_7 = arith.constant 0 : index
    %14 = vector.load %arg4[%c0_6, %c0_7] : memref<4x32xf32, #tpu.memory_space<vmem>>, vector<1x32xf32>
    %15 = vector.shape_cast %14 : vector<1x32xf32> to vector<32xf32>
    %c0_8 = arith.constant 0 : index
    %c0_9 = arith.constant 0 : index
    %16 = vector.load %arg5[%c0_8, %c0_9] : memref<4x32xf32, #tpu.memory_space<vmem>>, vector<1x32xf32>
    %17 = vector.shape_cast %16 : vector<1x32xf32> to vector<32xf32>
    %cst_10 = arith.constant dense<0.000000e+00> : vector<8xf32>
    %18 = vector.multi_reduction <add>, %10, %cst_10 [1] : vector<8x32xf32> to vector<8xf32>
    %19 = vector.shape_cast %18 : vector<8xf32> to vector<8x1xf32>
    %cst_11 = arith.constant 3.125000e-02 : f32
    %20 = vector.broadcast %cst_11 : f32 to vector<8x1xf32>
    %21 = arith.mulf %19, %20 : vector<8x1xf32>
    %22 = vector.broadcast %21 : vector<8x1xf32> to vector<8x32xf32>
    %23 = arith.subf %10, %22 : vector<8x32xf32>
    %24 = arith.mulf %23, %23 : vector<8x32xf32>
    %cst_12 = arith.constant dense<0.000000e+00> : vector<8xf32>
    %25 = vector.multi_reduction <add>, %24, %cst_12 [1] : vector<8x32xf32> to vector<8xf32>
    %26 = vector.shape_cast %25 : vector<8xf32> to vector<8x1xf32>
    %cst_13 = arith.constant 3.125000e-02 : f32
    %27 = vector.broadcast %cst_13 : f32 to vector<8x1xf32>
    %28 = arith.mulf %26, %27 : vector<8x1xf32>
    %cst_14 = arith.constant 9.99999974E-6 : f32
    %29 = vector.broadcast %cst_14 : f32 to vector<8x1xf32>
    %30 = arith.addf %28, %29 : vector<8x1xf32>
    %31 = math.rsqrt %30 : vector<8x1xf32>
    %32 = vector.broadcast %31 : vector<8x1xf32> to vector<8x32xf32>
    %33 = arith.mulf %23, %32 : vector<8x32xf32>
    %34 = vector.shape_cast %15 : vector<32xf32> to vector<1x32xf32>
    %35 = vector.broadcast %34 : vector<1x32xf32> to vector<8x32xf32>
    %36 = arith.mulf %33, %35 : vector<8x32xf32>
    %37 = vector.shape_cast %17 : vector<32xf32> to vector<1x32xf32>
    %38 = vector.broadcast %37 : vector<1x32xf32> to vector<8x32xf32>
    %39 = arith.addf %36, %38 : vector<8x32xf32>
    %c0_15 = arith.constant 0 : index
    %c0_16 = arith.constant 0 : index
    %c0_17 = arith.constant 0 : index
    %40 = vector.load %arg6[%c0_15, %c0_16, %c0_17] : memref<4x32x96xf32, #tpu.memory_space<vmem>>, vector<1x32x96xf32>
    %41 = vector.shape_cast %40 : vector<1x32x96xf32> to vector<32x96xf32>
    %cst_18 = arith.constant dense<0.000000e+00> : vector<8x96xf32>
    %42 = tpu.matmul %39, %41, %cst_18 {dimension_numbers = #tpu.dot_dimension_numbers<[1], [0], [0], [1], [0, 0, 1, 1], [], []>} : vector<8x32xf32>, vector<32x96xf32>, vector<8x96xf32> -> vector<8x96xf32>
    %43 = vector.extract_strided_slice %42 {offsets = [0, 0], sizes = [8, 8], strides = [1, 1]} : vector<8x96xf32> to vector<8x8xf32>
    %44 = vector.shape_cast %43 : vector<8x8xf32> to vector<1x8x8xf32>
    %45 = vector.extract_strided_slice %42 {offsets = [0, 8], sizes = [8, 8], strides = [1, 1]} : vector<8x96xf32> to vector<8x8xf32>
    %46 = vector.shape_cast %45 : vector<8x8xf32> to vector<1x8x8xf32>
    %47 = vector.extract_strided_slice %42 {offsets = [0, 16], sizes = [8, 8], strides = [1, 1]} : vector<8x96xf32> to vector<8x8xf32>
    %48 = vector.shape_cast %47 : vector<8x8xf32> to vector<1x8x8xf32>
    %49 = vector.extract_strided_slice %42 {offsets = [0, 24], sizes = [8, 8], strides = [1, 1]} : vector<8x96xf32> to vector<8x8xf32>
    %50 = vector.shape_cast %49 : vector<8x8xf32> to vector<1x8x8xf32>
    %51 = tpu.concatenate %44, %46, %48, %50 in 0 : vector<1x8x8xf32>, vector<1x8x8xf32>, vector<1x8x8xf32>, vector<1x8x8xf32> -> vector<4x8x8xf32>
    %cst_19 = arith.constant 0.176776692 : f32
    %52 = vector.broadcast %cst_19 : f32 to vector<4x8x8xf32>
    %53 = arith.mulf %51, %52 : vector<4x8x8xf32>
    %54 = vector.extract_strided_slice %42 {offsets = [0, 32], sizes = [8, 8], strides = [1, 1]} : vector<8x96xf32> to vector<8x8xf32>
    %55 = vector.shape_cast %54 : vector<8x8xf32> to vector<1x8x8xf32>
    %56 = vector.extract_strided_slice %42 {offsets = [0, 40], sizes = [8, 8], strides = [1, 1]} : vector<8x96xf32> to vector<8x8xf32>
    %57 = vector.shape_cast %56 : vector<8x8xf32> to vector<1x8x8xf32>
    %58 = vector.extract_strided_slice %42 {offsets = [0, 48], sizes = [8, 8], strides = [1, 1]} : vector<8x96xf32> to vector<8x8xf32>
    %59 = vector.shape_cast %58 : vector<8x8xf32> to vector<1x8x8xf32>
    %60 = vector.extract_strided_slice %42 {offsets = [0, 56], sizes = [8, 8], strides = [1, 1]} : vector<8x96xf32> to vector<8x8xf32>
    %61 = vector.shape_cast %60 : vector<8x8xf32> to vector<1x8x8xf32>
    %62 = tpu.concatenate %55, %57, %59, %61 in 0 : vector<1x8x8xf32>, vector<1x8x8xf32>, vector<1x8x8xf32>, vector<1x8x8xf32> -> vector<4x8x8xf32>
    %63 = vector.extract_strided_slice %42 {offsets = [0, 64], sizes = [8, 8], strides = [1, 1]} : vector<8x96xf32> to vector<8x8xf32>
    %64 = vector.shape_cast %63 : vector<8x8xf32> to vector<1x8x8xf32>
    %65 = vector.extract_strided_slice %42 {offsets = [0, 72], sizes = [8, 8], strides = [1, 1]} : vector<8x96xf32> to vector<8x8xf32>
    %66 = vector.shape_cast %65 : vector<8x8xf32> to vector<1x8x8xf32>
    %67 = vector.extract_strided_slice %42 {offsets = [0, 80], sizes = [8, 8], strides = [1, 1]} : vector<8x96xf32> to vector<8x8xf32>
    %68 = vector.shape_cast %67 : vector<8x8xf32> to vector<1x8x8xf32>
    %69 = vector.extract_strided_slice %42 {offsets = [0, 88], sizes = [8, 8], strides = [1, 1]} : vector<8x96xf32> to vector<8x8xf32>
    %70 = vector.shape_cast %69 : vector<8x8xf32> to vector<1x8x8xf32>
    %71 = tpu.concatenate %64, %66, %68, %70 in 0 : vector<1x8x8xf32>, vector<1x8x8xf32>, vector<1x8x8xf32>, vector<1x8x8xf32> -> vector<4x8x8xf32>
    "tpu.trace_start"() <{level = 10 : i32, message = "htd,hsd->hts"}> : () -> ()
    %cst_20 = arith.constant dense<0.000000e+00> : vector<4x8x8xf32>
    %72 = tpu.matmul %53, %62, %cst_20 {dimension_numbers = #tpu.dot_dimension_numbers<[2], [2], [1], [1], [0, 0, 0, 1, 1, 1], [0], [0]>} : vector<4x8x8xf32>, vector<4x8x8xf32>, vector<4x8x8xf32> -> vector<4x8x8xf32>
    "tpu.trace_stop"() : () -> ()
    %73 = vector.shape_cast %13 : vector<8x8xi1> to vector<1x8x8xi1>
    %cst_21 = arith.constant -1.000000e+30 : f32
    %74 = vector.shape_cast %73 : vector<1x8x8xi1> to vector<1x8x8xi1>
    %75 = vector.broadcast %74 : vector<1x8x8xi1> to vector<4x8x8xi1>
    %76 = vector.broadcast %cst_21 : f32 to vector<4x8x8xf32>
    %77 = arith.select %75, %72, %76 : vector<4x8x8xi1>, vector<4x8x8xf32>
    %cst_22 = arith.constant dense<0xFF800000> : vector<4x8xf32>
    %78 = vector.multi_reduction <maximumf>, %77, %cst_22 [2] : vector<4x8x8xf32> to vector<4x8xf32>
    %79 = vector.shape_cast %78 : vector<4x8xf32> to vector<4x8x1xf32>
    %80 = vector.broadcast %79 : vector<4x8x1xf32> to vector<4x8x8xf32>
    %81 = arith.subf %77, %80 : vector<4x8x8xf32>
    %82 = math.exp %81 : vector<4x8x8xf32>
    %cst_23 = arith.constant dense<0.000000e+00> : vector<4x8xf32>
    %83 = vector.multi_reduction <add>, %82, %cst_23 [2] : vector<4x8x8xf32> to vector<4x8xf32>
    %84 = vector.shape_cast %83 : vector<4x8xf32> to vector<4x8x1xf32>
    %85 = tpu.reciprocal %84 : vector<4x8x1xf32> -> vector<4x8x1xf32>
    %86 = vector.broadcast %85 : vector<4x8x1xf32> to vector<4x8x8xf32>
    %87 = arith.mulf %82, %86 : vector<4x8x8xf32>
    "tpu.trace_start"() <{level = 10 : i32, message = "hts,hsd->htd"}> : () -> ()
    %cst_24 = arith.constant dense<0.000000e+00> : vector<4x8x8xf32>
    %88 = tpu.matmul %87, %71, %cst_24 {dimension_numbers = #tpu.dot_dimension_numbers<[2], [1], [1], [2], [0, 0, 0, 1, 1, 2], [0], [0]>} : vector<4x8x8xf32>, vector<4x8x8xf32>, vector<4x8x8xf32> -> vector<4x8x8xf32>
    "tpu.trace_stop"() : () -> ()
    %89 = vector.extract_strided_slice %88 {offsets = [0, 0, 0], sizes = [1, 8, 8], strides = [1, 1, 1]} : vector<4x8x8xf32> to vector<1x8x8xf32>
    %90 = vector.shape_cast %89 : vector<1x8x8xf32> to vector<8x8xf32>
    %91 = vector.extract_strided_slice %88 {offsets = [1, 0, 0], sizes = [1, 8, 8], strides = [1, 1, 1]} : vector<4x8x8xf32> to vector<1x8x8xf32>
    %92 = vector.shape_cast %91 : vector<1x8x8xf32> to vector<8x8xf32>
    %93 = vector.extract_strided_slice %88 {offsets = [2, 0, 0], sizes = [1, 8, 8], strides = [1, 1, 1]} : vector<4x8x8xf32> to vector<1x8x8xf32>
    %94 = vector.shape_cast %93 : vector<1x8x8xf32> to vector<8x8xf32>
    %95 = vector.extract_strided_slice %88 {offsets = [3, 0, 0], sizes = [1, 8, 8], strides = [1, 1, 1]} : vector<4x8x8xf32> to vector<1x8x8xf32>
    %96 = vector.shape_cast %95 : vector<1x8x8xf32> to vector<8x8xf32>
    %97 = tpu.concatenate %90, %92, %94, %96 in 1 : vector<8x8xf32>, vector<8x8xf32>, vector<8x8xf32>, vector<8x8xf32> -> vector<8x32xf32>
    %c0_25 = arith.constant 0 : index
    %c0_26 = arith.constant 0 : index
    %c0_27 = arith.constant 0 : index
    %98 = vector.load %arg7[%c0_25, %c0_26, %c0_27] : memref<4x32x32xf32, #tpu.memory_space<vmem>>, vector<1x32x32xf32>
    %99 = vector.shape_cast %98 : vector<1x32x32xf32> to vector<32x32xf32>
    %cst_28 = arith.constant dense<0.000000e+00> : vector<8x32xf32>
    %100 = tpu.matmul %97, %99, %cst_28 {dimension_numbers = #tpu.dot_dimension_numbers<[1], [0], [0], [1], [0, 0, 1, 1], [], []>} : vector<8x32xf32>, vector<32x32xf32>, vector<8x32xf32> -> vector<8x32xf32>
    %c0_29 = arith.constant 0 : index
    %c0_30 = arith.constant 0 : index
    %101 = vector.load %arg8[%c0_29, %c0_30] : memref<4x32xf32, #tpu.memory_space<vmem>>, vector<1x32xf32>
    %102 = vector.shape_cast %101 : vector<1x32xf32> to vector<32xf32>
    %103 = vector.shape_cast %102 : vector<32xf32> to vector<1x32xf32>
    %104 = vector.broadcast %103 : vector<1x32xf32> to vector<8x32xf32>
    %105 = arith.addf %100, %104 : vector<8x32xf32>
    %106 = arith.addf %10, %105 : vector<8x32xf32>
    %c0_31 = arith.constant 0 : index
    %c0_32 = arith.constant 0 : index
    %107 = vector.load %arg9[%c0_31, %c0_32] : memref<4x32xf32, #tpu.memory_space<vmem>>, vector<1x32xf32>
    %108 = vector.shape_cast %107 : vector<1x32xf32> to vector<32xf32>
    %c0_33 = arith.constant 0 : index
    %c0_34 = arith.constant 0 : index
    %109 = vector.load %arg10[%c0_33, %c0_34] : memref<4x32xf32, #tpu.memory_space<vmem>>, vector<1x32xf32>
    %110 = vector.shape_cast %109 : vector<1x32xf32> to vector<32xf32>
    %cst_35 = arith.constant dense<0.000000e+00> : vector<8xf32>
    %111 = vector.multi_reduction <add>, %106, %cst_35 [1] : vector<8x32xf32> to vector<8xf32>
    %112 = vector.shape_cast %111 : vector<8xf32> to vector<8x1xf32>
    %cst_36 = arith.constant 3.125000e-02 : f32
    %113 = vector.broadcast %cst_36 : f32 to vector<8x1xf32>
    %114 = arith.mulf %112, %113 : vector<8x1xf32>
    %115 = vector.broadcast %114 : vector<8x1xf32> to vector<8x32xf32>
    %116 = arith.subf %106, %115 : vector<8x32xf32>
    %117 = arith.mulf %116, %116 : vector<8x32xf32>
    %cst_37 = arith.constant dense<0.000000e+00> : vector<8xf32>
    %118 = vector.multi_reduction <add>, %117, %cst_37 [1] : vector<8x32xf32> to vector<8xf32>
    %119 = vector.shape_cast %118 : vector<8xf32> to vector<8x1xf32>
    %cst_38 = arith.constant 3.125000e-02 : f32
    %120 = vector.broadcast %cst_38 : f32 to vector<8x1xf32>
    %121 = arith.mulf %119, %120 : vector<8x1xf32>
    %cst_39 = arith.constant 9.99999974E-6 : f32
    %122 = vector.broadcast %cst_39 : f32 to vector<8x1xf32>
    %123 = arith.addf %121, %122 : vector<8x1xf32>
    %124 = math.rsqrt %123 : vector<8x1xf32>
    %125 = vector.broadcast %124 : vector<8x1xf32> to vector<8x32xf32>
    %126 = arith.mulf %116, %125 : vector<8x32xf32>
    %127 = vector.shape_cast %108 : vector<32xf32> to vector<1x32xf32>
    %128 = vector.broadcast %127 : vector<1x32xf32> to vector<8x32xf32>
    %129 = arith.mulf %126, %128 : vector<8x32xf32>
    %130 = vector.shape_cast %110 : vector<32xf32> to vector<1x32xf32>
    %131 = vector.broadcast %130 : vector<1x32xf32> to vector<8x32xf32>
    %132 = arith.addf %129, %131 : vector<8x32xf32>
    %c0_40 = arith.constant 0 : index
    %c0_41 = arith.constant 0 : index
    %c0_42 = arith.constant 0 : index
    %133 = vector.load %arg11[%c0_40, %c0_41, %c0_42] : memref<4x32x128xf32, #tpu.memory_space<vmem>>, vector<1x32x128xf32>
    %134 = vector.shape_cast %133 : vector<1x32x128xf32> to vector<32x128xf32>
    %cst_43 = arith.constant dense<0.000000e+00> : vector<8x128xf32>
    %135 = tpu.matmul %132, %134, %cst_43 {dimension_numbers = #tpu.dot_dimension_numbers<[1], [0], [0], [1], [0, 0, 1, 1], [], []>} : vector<8x32xf32>, vector<32x128xf32>, vector<8x128xf32> -> vector<8x128xf32>
    %c0_44 = arith.constant 0 : index
    %c0_45 = arith.constant 0 : index
    %136 = vector.load %arg12[%c0_44, %c0_45] : memref<4x128xf32, #tpu.memory_space<vmem>>, vector<1x128xf32>
    %137 = vector.shape_cast %136 : vector<1x128xf32> to vector<128xf32>
    %138 = vector.shape_cast %137 : vector<128xf32> to vector<1x128xf32>
    %139 = vector.broadcast %138 : vector<1x128xf32> to vector<8x128xf32>
    %140 = arith.addf %135, %139 : vector<8x128xf32>
    %cst_46 = arith.constant 5.000000e-01 : f32
    %141 = vector.broadcast %cst_46 : f32 to vector<8x128xf32>
    %142 = arith.mulf %141, %140 : vector<8x128xf32>
    %cst_47 = arith.constant 0.707106769 : f32
    %143 = vector.broadcast %cst_47 : f32 to vector<8x128xf32>
    %144 = arith.mulf %140, %143 : vector<8x128xf32>
    %145 = math.erf %144 : vector<8x128xf32>
    %cst_48 = arith.constant 1.000000e+00 : f32
    %146 = vector.broadcast %cst_48 : f32 to vector<8x128xf32>
    %147 = arith.addf %146, %145 : vector<8x128xf32>
    %148 = arith.mulf %142, %147 : vector<8x128xf32>
    %c0_49 = arith.constant 0 : index
    %c0_50 = arith.constant 0 : index
    %c0_51 = arith.constant 0 : index
    %149 = vector.load %arg13[%c0_49, %c0_50, %c0_51] : memref<4x128x32xf32, #tpu.memory_space<vmem>>, vector<1x128x32xf32>
    %150 = vector.shape_cast %149 : vector<1x128x32xf32> to vector<128x32xf32>
    %cst_52 = arith.constant dense<0.000000e+00> : vector<8x32xf32>
    %151 = tpu.matmul %148, %150, %cst_52 {dimension_numbers = #tpu.dot_dimension_numbers<[1], [0], [0], [1], [0, 0, 1, 1], [], []>} : vector<8x128xf32>, vector<128x32xf32>, vector<8x32xf32> -> vector<8x32xf32>
    %c0_53 = arith.constant 0 : index
    %c0_54 = arith.constant 0 : index
    %152 = vector.load %arg14[%c0_53, %c0_54] : memref<4x32xf32, #tpu.memory_space<vmem>>, vector<1x32xf32>
    %153 = vector.shape_cast %152 : vector<1x32xf32> to vector<32xf32>
    %154 = vector.shape_cast %153 : vector<32xf32> to vector<1x32xf32>
    %155 = vector.broadcast %154 : vector<1x32xf32> to vector<8x32xf32>
    %156 = arith.addf %151, %155 : vector<8x32xf32>
    %157 = arith.addf %106, %156 : vector<8x32xf32>
    %c1 = arith.constant 1 : index
    %c0_55 = arith.constant 0 : index
    %158 = vector.load %arg4[%c1, %c0_55] : memref<4x32xf32, #tpu.memory_space<vmem>>, vector<1x32xf32>
    %159 = vector.shape_cast %158 : vector<1x32xf32> to vector<32xf32>
    %c1_56 = arith.constant 1 : index
    %c0_57 = arith.constant 0 : index
    %160 = vector.load %arg5[%c1_56, %c0_57] : memref<4x32xf32, #tpu.memory_space<vmem>>, vector<1x32xf32>
    %161 = vector.shape_cast %160 : vector<1x32xf32> to vector<32xf32>
    %cst_58 = arith.constant dense<0.000000e+00> : vector<8xf32>
    %162 = vector.multi_reduction <add>, %157, %cst_58 [1] : vector<8x32xf32> to vector<8xf32>
    %163 = vector.shape_cast %162 : vector<8xf32> to vector<8x1xf32>
    %cst_59 = arith.constant 3.125000e-02 : f32
    %164 = vector.broadcast %cst_59 : f32 to vector<8x1xf32>
    %165 = arith.mulf %163, %164 : vector<8x1xf32>
    %166 = vector.broadcast %165 : vector<8x1xf32> to vector<8x32xf32>
    %167 = arith.subf %157, %166 : vector<8x32xf32>
    %168 = arith.mulf %167, %167 : vector<8x32xf32>
    %cst_60 = arith.constant dense<0.000000e+00> : vector<8xf32>
    %169 = vector.multi_reduction <add>, %168, %cst_60 [1] : vector<8x32xf32> to vector<8xf32>
    %170 = vector.shape_cast %169 : vector<8xf32> to vector<8x1xf32>
    %cst_61 = arith.constant 3.125000e-02 : f32
    %171 = vector.broadcast %cst_61 : f32 to vector<8x1xf32>
    %172 = arith.mulf %170, %171 : vector<8x1xf32>
    %cst_62 = arith.constant 9.99999974E-6 : f32
    %173 = vector.broadcast %cst_62 : f32 to vector<8x1xf32>
    %174 = arith.addf %172, %173 : vector<8x1xf32>
    %175 = math.rsqrt %174 : vector<8x1xf32>
    %176 = vector.broadcast %175 : vector<8x1xf32> to vector<8x32xf32>
    %177 = arith.mulf %167, %176 : vector<8x32xf32>
    %178 = vector.shape_cast %159 : vector<32xf32> to vector<1x32xf32>
    %179 = vector.broadcast %178 : vector<1x32xf32> to vector<8x32xf32>
    %180 = arith.mulf %177, %179 : vector<8x32xf32>
    %181 = vector.shape_cast %161 : vector<32xf32> to vector<1x32xf32>
    %182 = vector.broadcast %181 : vector<1x32xf32> to vector<8x32xf32>
    %183 = arith.addf %180, %182 : vector<8x32xf32>
    %c1_63 = arith.constant 1 : index
    %c0_64 = arith.constant 0 : index
    %c0_65 = arith.constant 0 : index
    %184 = vector.load %arg6[%c1_63, %c0_64, %c0_65] : memref<4x32x96xf32, #tpu.memory_space<vmem>>, vector<1x32x96xf32>
    %185 = vector.shape_cast %184 : vector<1x32x96xf32> to vector<32x96xf32>
    %cst_66 = arith.constant dense<0.000000e+00> : vector<8x96xf32>
    %186 = tpu.matmul %183, %185, %cst_66 {dimension_numbers = #tpu.dot_dimension_numbers<[1], [0], [0], [1], [0, 0, 1, 1], [], []>} : vector<8x32xf32>, vector<32x96xf32>, vector<8x96xf32> -> vector<8x96xf32>
    %187 = vector.extract_strided_slice %186 {offsets = [0, 0], sizes = [8, 8], strides = [1, 1]} : vector<8x96xf32> to vector<8x8xf32>
    %188 = vector.shape_cast %187 : vector<8x8xf32> to vector<1x8x8xf32>
    %189 = vector.extract_strided_slice %186 {offsets = [0, 8], sizes = [8, 8], strides = [1, 1]} : vector<8x96xf32> to vector<8x8xf32>
    %190 = vector.shape_cast %189 : vector<8x8xf32> to vector<1x8x8xf32>
    %191 = vector.extract_strided_slice %186 {offsets = [0, 16], sizes = [8, 8], strides = [1, 1]} : vector<8x96xf32> to vector<8x8xf32>
    %192 = vector.shape_cast %191 : vector<8x8xf32> to vector<1x8x8xf32>
    %193 = vector.extract_strided_slice %186 {offsets = [0, 24], sizes = [8, 8], strides = [1, 1]} : vector<8x96xf32> to vector<8x8xf32>
    %194 = vector.shape_cast %193 : vector<8x8xf32> to vector<1x8x8xf32>
    %195 = tpu.concatenate %188, %190, %192, %194 in 0 : vector<1x8x8xf32>, vector<1x8x8xf32>, vector<1x8x8xf32>, vector<1x8x8xf32> -> vector<4x8x8xf32>
    %cst_67 = arith.constant 0.176776692 : f32
    %196 = vector.broadcast %cst_67 : f32 to vector<4x8x8xf32>
    %197 = arith.mulf %195, %196 : vector<4x8x8xf32>
    %198 = vector.extract_strided_slice %186 {offsets = [0, 32], sizes = [8, 8], strides = [1, 1]} : vector<8x96xf32> to vector<8x8xf32>
    %199 = vector.shape_cast %198 : vector<8x8xf32> to vector<1x8x8xf32>
    %200 = vector.extract_strided_slice %186 {offsets = [0, 40], sizes = [8, 8], strides = [1, 1]} : vector<8x96xf32> to vector<8x8xf32>
    %201 = vector.shape_cast %200 : vector<8x8xf32> to vector<1x8x8xf32>
    %202 = vector.extract_strided_slice %186 {offsets = [0, 48], sizes = [8, 8], strides = [1, 1]} : vector<8x96xf32> to vector<8x8xf32>
    %203 = vector.shape_cast %202 : vector<8x8xf32> to vector<1x8x8xf32>
    %204 = vector.extract_strided_slice %186 {offsets = [0, 56], sizes = [8, 8], strides = [1, 1]} : vector<8x96xf32> to vector<8x8xf32>
    %205 = vector.shape_cast %204 : vector<8x8xf32> to vector<1x8x8xf32>
    %206 = tpu.concatenate %199, %201, %203, %205 in 0 : vector<1x8x8xf32>, vector<1x8x8xf32>, vector<1x8x8xf32>, vector<1x8x8xf32> -> vector<4x8x8xf32>
    %207 = vector.extract_strided_slice %186 {offsets = [0, 64], sizes = [8, 8], strides = [1, 1]} : vector<8x96xf32> to vector<8x8xf32>
    %208 = vector.shape_cast %207 : vector<8x8xf32> to vector<1x8x8xf32>
    %209 = vector.extract_strided_slice %186 {offsets = [0, 72], sizes = [8, 8], strides = [1, 1]} : vector<8x96xf32> to vector<8x8xf32>
    %210 = vector.shape_cast %209 : vector<8x8xf32> to vector<1x8x8xf32>
    %211 = vector.extract_strided_slice %186 {offsets = [0, 80], sizes = [8, 8], strides = [1, 1]} : vector<8x96xf32> to vector<8x8xf32>
    %212 = vector.shape_cast %211 : vector<8x8xf32> to vector<1x8x8xf32>
    %213 = vector.extract_strided_slice %186 {offsets = [0, 88], sizes = [8, 8], strides = [1, 1]} : vector<8x96xf32> to vector<8x8xf32>
    %214 = vector.shape_cast %213 : vector<8x8xf32> to vector<1x8x8xf32>
    %215 = tpu.concatenate %208, %210, %212, %214 in 0 : vector<1x8x8xf32>, vector<1x8x8xf32>, vector<1x8x8xf32>, vector<1x8x8xf32> -> vector<4x8x8xf32>
    "tpu.trace_start"() <{level = 10 : i32, message = "htd,hsd->hts"}> : () -> ()
    %cst_68 = arith.constant dense<0.000000e+00> : vector<4x8x8xf32>
    %216 = tpu.matmul %197, %206, %cst_68 {dimension_numbers = #tpu.dot_dimension_numbers<[2], [2], [1], [1], [0, 0, 0, 1, 1, 1], [0], [0]>} : vector<4x8x8xf32>, vector<4x8x8xf32>, vector<4x8x8xf32> -> vector<4x8x8xf32>
    "tpu.trace_stop"() : () -> ()
    %217 = vector.shape_cast %13 : vector<8x8xi1> to vector<1x8x8xi1>
    %cst_69 = arith.constant -1.000000e+30 : f32
    %218 = vector.shape_cast %217 : vector<1x8x8xi1> to vector<1x8x8xi1>
    %219 = vector.broadcast %218 : vector<1x8x8xi1> to vector<4x8x8xi1>
    %220 = vector.broadcast %cst_69 : f32 to vector<4x8x8xf32>
    %221 = arith.select %219, %216, %220 : vector<4x8x8xi1>, vector<4x8x8xf32>
    %cst_70 = arith.constant dense<0xFF800000> : vector<4x8xf32>
    %222 = vector.multi_reduction <maximumf>, %221, %cst_70 [2] : vector<4x8x8xf32> to vector<4x8xf32>
    %223 = vector.shape_cast %222 : vector<4x8xf32> to vector<4x8x1xf32>
    %224 = vector.broadcast %223 : vector<4x8x1xf32> to vector<4x8x8xf32>
    %225 = arith.subf %221, %224 : vector<4x8x8xf32>
    %226 = math.exp %225 : vector<4x8x8xf32>
    %cst_71 = arith.constant dense<0.000000e+00> : vector<4x8xf32>
    %227 = vector.multi_reduction <add>, %226, %cst_71 [2] : vector<4x8x8xf32> to vector<4x8xf32>
    %228 = vector.shape_cast %227 : vector<4x8xf32> to vector<4x8x1xf32>
    %229 = tpu.reciprocal %228 : vector<4x8x1xf32> -> vector<4x8x1xf32>
    %230 = vector.broadcast %229 : vector<4x8x1xf32> to vector<4x8x8xf32>
    %231 = arith.mulf %226, %230 : vector<4x8x8xf32>
    "tpu.trace_start"() <{level = 10 : i32, message = "hts,hsd->htd"}> : () -> ()
    %cst_72 = arith.constant dense<0.000000e+00> : vector<4x8x8xf32>
    %232 = tpu.matmul %231, %215, %cst_72 {dimension_numbers = #tpu.dot_dimension_numbers<[2], [1], [1], [2], [0, 0, 0, 1, 1, 2], [0], [0]>} : vector<4x8x8xf32>, vector<4x8x8xf32>, vector<4x8x8xf32> -> vector<4x8x8xf32>
    "tpu.trace_stop"() : () -> ()
    %233 = vector.extract_strided_slice %232 {offsets = [0, 0, 0], sizes = [1, 8, 8], strides = [1, 1, 1]} : vector<4x8x8xf32> to vector<1x8x8xf32>
    %234 = vector.shape_cast %233 : vector<1x8x8xf32> to vector<8x8xf32>
    %235 = vector.extract_strided_slice %232 {offsets = [1, 0, 0], sizes = [1, 8, 8], strides = [1, 1, 1]} : vector<4x8x8xf32> to vector<1x8x8xf32>
    %236 = vector.shape_cast %235 : vector<1x8x8xf32> to vector<8x8xf32>
    %237 = vector.extract_strided_slice %232 {offsets = [2, 0, 0], sizes = [1, 8, 8], strides = [1, 1, 1]} : vector<4x8x8xf32> to vector<1x8x8xf32>
    %238 = vector.shape_cast %237 : vector<1x8x8xf32> to vector<8x8xf32>
    %239 = vector.extract_strided_slice %232 {offsets = [3, 0, 0], sizes = [1, 8, 8], strides = [1, 1, 1]} : vector<4x8x8xf32> to vector<1x8x8xf32>
    %240 = vector.shape_cast %239 : vector<1x8x8xf32> to vector<8x8xf32>
    %241 = tpu.concatenate %234, %236, %238, %240 in 1 : vector<8x8xf32>, vector<8x8xf32>, vector<8x8xf32>, vector<8x8xf32> -> vector<8x32xf32>
    %c1_73 = arith.constant 1 : index
    %c0_74 = arith.constant 0 : index
    %c0_75 = arith.constant 0 : index
    %242 = vector.load %arg7[%c1_73, %c0_74, %c0_75] : memref<4x32x32xf32, #tpu.memory_space<vmem>>, vector<1x32x32xf32>
    %243 = vector.shape_cast %242 : vector<1x32x32xf32> to vector<32x32xf32>
    %cst_76 = arith.constant dense<0.000000e+00> : vector<8x32xf32>
    %244 = tpu.matmul %241, %243, %cst_76 {dimension_numbers = #tpu.dot_dimension_numbers<[1], [0], [0], [1], [0, 0, 1, 1], [], []>} : vector<8x32xf32>, vector<32x32xf32>, vector<8x32xf32> -> vector<8x32xf32>
    %c1_77 = arith.constant 1 : index
    %c0_78 = arith.constant 0 : index
    %245 = vector.load %arg8[%c1_77, %c0_78] : memref<4x32xf32, #tpu.memory_space<vmem>>, vector<1x32xf32>
    %246 = vector.shape_cast %245 : vector<1x32xf32> to vector<32xf32>
    %247 = vector.shape_cast %246 : vector<32xf32> to vector<1x32xf32>
    %248 = vector.broadcast %247 : vector<1x32xf32> to vector<8x32xf32>
    %249 = arith.addf %244, %248 : vector<8x32xf32>
    %250 = arith.addf %157, %249 : vector<8x32xf32>
    %c1_79 = arith.constant 1 : index
    %c0_80 = arith.constant 0 : index
    %251 = vector.load %arg9[%c1_79, %c0_80] : memref<4x32xf32, #tpu.memory_space<vmem>>, vector<1x32xf32>
    %252 = vector.shape_cast %251 : vector<1x32xf32> to vector<32xf32>
    %c1_81 = arith.constant 1 : index
    %c0_82 = arith.constant 0 : index
    %253 = vector.load %arg10[%c1_81, %c0_82] : memref<4x32xf32, #tpu.memory_space<vmem>>, vector<1x32xf32>
    %254 = vector.shape_cast %253 : vector<1x32xf32> to vector<32xf32>
    %cst_83 = arith.constant dense<0.000000e+00> : vector<8xf32>
    %255 = vector.multi_reduction <add>, %250, %cst_83 [1] : vector<8x32xf32> to vector<8xf32>
    %256 = vector.shape_cast %255 : vector<8xf32> to vector<8x1xf32>
    %cst_84 = arith.constant 3.125000e-02 : f32
    %257 = vector.broadcast %cst_84 : f32 to vector<8x1xf32>
    %258 = arith.mulf %256, %257 : vector<8x1xf32>
    %259 = vector.broadcast %258 : vector<8x1xf32> to vector<8x32xf32>
    %260 = arith.subf %250, %259 : vector<8x32xf32>
    %261 = arith.mulf %260, %260 : vector<8x32xf32>
    %cst_85 = arith.constant dense<0.000000e+00> : vector<8xf32>
    %262 = vector.multi_reduction <add>, %261, %cst_85 [1] : vector<8x32xf32> to vector<8xf32>
    %263 = vector.shape_cast %262 : vector<8xf32> to vector<8x1xf32>
    %cst_86 = arith.constant 3.125000e-02 : f32
    %264 = vector.broadcast %cst_86 : f32 to vector<8x1xf32>
    %265 = arith.mulf %263, %264 : vector<8x1xf32>
    %cst_87 = arith.constant 9.99999974E-6 : f32
    %266 = vector.broadcast %cst_87 : f32 to vector<8x1xf32>
    %267 = arith.addf %265, %266 : vector<8x1xf32>
    %268 = math.rsqrt %267 : vector<8x1xf32>
    %269 = vector.broadcast %268 : vector<8x1xf32> to vector<8x32xf32>
    %270 = arith.mulf %260, %269 : vector<8x32xf32>
    %271 = vector.shape_cast %252 : vector<32xf32> to vector<1x32xf32>
    %272 = vector.broadcast %271 : vector<1x32xf32> to vector<8x32xf32>
    %273 = arith.mulf %270, %272 : vector<8x32xf32>
    %274 = vector.shape_cast %254 : vector<32xf32> to vector<1x32xf32>
    %275 = vector.broadcast %274 : vector<1x32xf32> to vector<8x32xf32>
    %276 = arith.addf %273, %275 : vector<8x32xf32>
    %c1_88 = arith.constant 1 : index
    %c0_89 = arith.constant 0 : index
    %c0_90 = arith.constant 0 : index
    %277 = vector.load %arg11[%c1_88, %c0_89, %c0_90] : memref<4x32x128xf32, #tpu.memory_space<vmem>>, vector<1x32x128xf32>
    %278 = vector.shape_cast %277 : vector<1x32x128xf32> to vector<32x128xf32>
    %cst_91 = arith.constant dense<0.000000e+00> : vector<8x128xf32>
    %279 = tpu.matmul %276, %278, %cst_91 {dimension_numbers = #tpu.dot_dimension_numbers<[1], [0], [0], [1], [0, 0, 1, 1], [], []>} : vector<8x32xf32>, vector<32x128xf32>, vector<8x128xf32> -> vector<8x128xf32>
    %c1_92 = arith.constant 1 : index
    %c0_93 = arith.constant 0 : index
    %280 = vector.load %arg12[%c1_92, %c0_93] : memref<4x128xf32, #tpu.memory_space<vmem>>, vector<1x128xf32>
    %281 = vector.shape_cast %280 : vector<1x128xf32> to vector<128xf32>
    %282 = vector.shape_cast %281 : vector<128xf32> to vector<1x128xf32>
    %283 = vector.broadcast %282 : vector<1x128xf32> to vector<8x128xf32>
    %284 = arith.addf %279, %283 : vector<8x128xf32>
    %cst_94 = arith.constant 5.000000e-01 : f32
    %285 = vector.broadcast %cst_94 : f32 to vector<8x128xf32>
    %286 = arith.mulf %285, %284 : vector<8x128xf32>
    %cst_95 = arith.constant 0.707106769 : f32
    %287 = vector.broadcast %cst_95 : f32 to vector<8x128xf32>
    %288 = arith.mulf %284, %287 : vector<8x128xf32>
    %289 = math.erf %288 : vector<8x128xf32>
    %cst_96 = arith.constant 1.000000e+00 : f32
    %290 = vector.broadcast %cst_96 : f32 to vector<8x128xf32>
    %291 = arith.addf %290, %289 : vector<8x128xf32>
    %292 = arith.mulf %286, %291 : vector<8x128xf32>
    %c1_97 = arith.constant 1 : index
    %c0_98 = arith.constant 0 : index
    %c0_99 = arith.constant 0 : index
    %293 = vector.load %arg13[%c1_97, %c0_98, %c0_99] : memref<4x128x32xf32, #tpu.memory_space<vmem>>, vector<1x128x32xf32>
    %294 = vector.shape_cast %293 : vector<1x128x32xf32> to vector<128x32xf32>
    %cst_100 = arith.constant dense<0.000000e+00> : vector<8x32xf32>
    %295 = tpu.matmul %292, %294, %cst_100 {dimension_numbers = #tpu.dot_dimension_numbers<[1], [0], [0], [1], [0, 0, 1, 1], [], []>} : vector<8x128xf32>, vector<128x32xf32>, vector<8x32xf32> -> vector<8x32xf32>
    %c1_101 = arith.constant 1 : index
    %c0_102 = arith.constant 0 : index
    %296 = vector.load %arg14[%c1_101, %c0_102] : memref<4x32xf32, #tpu.memory_space<vmem>>, vector<1x32xf32>
    %297 = vector.shape_cast %296 : vector<1x32xf32> to vector<32xf32>
    %298 = vector.shape_cast %297 : vector<32xf32> to vector<1x32xf32>
    %299 = vector.broadcast %298 : vector<1x32xf32> to vector<8x32xf32>
    %300 = arith.addf %295, %299 : vector<8x32xf32>
    %301 = arith.addf %250, %300 : vector<8x32xf32>
    %c2 = arith.constant 2 : index
    %c0_103 = arith.constant 0 : index
    %302 = vector.load %arg4[%c2, %c0_103] : memref<4x32xf32, #tpu.memory_space<vmem>>, vector<1x32xf32>
    %303 = vector.shape_cast %302 : vector<1x32xf32> to vector<32xf32>
    %c2_104 = arith.constant 2 : index
    %c0_105 = arith.constant 0 : index
    %304 = vector.load %arg5[%c2_104, %c0_105] : memref<4x32xf32, #tpu.memory_space<vmem>>, vector<1x32xf32>
    %305 = vector.shape_cast %304 : vector<1x32xf32> to vector<32xf32>
    %cst_106 = arith.constant dense<0.000000e+00> : vector<8xf32>
    %306 = vector.multi_reduction <add>, %301, %cst_106 [1] : vector<8x32xf32> to vector<8xf32>
    %307 = vector.shape_cast %306 : vector<8xf32> to vector<8x1xf32>
    %cst_107 = arith.constant 3.125000e-02 : f32
    %308 = vector.broadcast %cst_107 : f32 to vector<8x1xf32>
    %309 = arith.mulf %307, %308 : vector<8x1xf32>
    %310 = vector.broadcast %309 : vector<8x1xf32> to vector<8x32xf32>
    %311 = arith.subf %301, %310 : vector<8x32xf32>
    %312 = arith.mulf %311, %311 : vector<8x32xf32>
    %cst_108 = arith.constant dense<0.000000e+00> : vector<8xf32>
    %313 = vector.multi_reduction <add>, %312, %cst_108 [1] : vector<8x32xf32> to vector<8xf32>
    %314 = vector.shape_cast %313 : vector<8xf32> to vector<8x1xf32>
    %cst_109 = arith.constant 3.125000e-02 : f32
    %315 = vector.broadcast %cst_109 : f32 to vector<8x1xf32>
    %316 = arith.mulf %314, %315 : vector<8x1xf32>
    %cst_110 = arith.constant 9.99999974E-6 : f32
    %317 = vector.broadcast %cst_110 : f32 to vector<8x1xf32>
    %318 = arith.addf %316, %317 : vector<8x1xf32>
    %319 = math.rsqrt %318 : vector<8x1xf32>
    %320 = vector.broadcast %319 : vector<8x1xf32> to vector<8x32xf32>
    %321 = arith.mulf %311, %320 : vector<8x32xf32>
    %322 = vector.shape_cast %303 : vector<32xf32> to vector<1x32xf32>
    %323 = vector.broadcast %322 : vector<1x32xf32> to vector<8x32xf32>
    %324 = arith.mulf %321, %323 : vector<8x32xf32>
    %325 = vector.shape_cast %305 : vector<32xf32> to vector<1x32xf32>
    %326 = vector.broadcast %325 : vector<1x32xf32> to vector<8x32xf32>
    %327 = arith.addf %324, %326 : vector<8x32xf32>
    %c2_111 = arith.constant 2 : index
    %c0_112 = arith.constant 0 : index
    %c0_113 = arith.constant 0 : index
    %328 = vector.load %arg6[%c2_111, %c0_112, %c0_113] : memref<4x32x96xf32, #tpu.memory_space<vmem>>, vector<1x32x96xf32>
    %329 = vector.shape_cast %328 : vector<1x32x96xf32> to vector<32x96xf32>
    %cst_114 = arith.constant dense<0.000000e+00> : vector<8x96xf32>
    %330 = tpu.matmul %327, %329, %cst_114 {dimension_numbers = #tpu.dot_dimension_numbers<[1], [0], [0], [1], [0, 0, 1, 1], [], []>} : vector<8x32xf32>, vector<32x96xf32>, vector<8x96xf32> -> vector<8x96xf32>
    %331 = vector.extract_strided_slice %330 {offsets = [0, 0], sizes = [8, 8], strides = [1, 1]} : vector<8x96xf32> to vector<8x8xf32>
    %332 = vector.shape_cast %331 : vector<8x8xf32> to vector<1x8x8xf32>
    %333 = vector.extract_strided_slice %330 {offsets = [0, 8], sizes = [8, 8], strides = [1, 1]} : vector<8x96xf32> to vector<8x8xf32>
    %334 = vector.shape_cast %333 : vector<8x8xf32> to vector<1x8x8xf32>
    %335 = vector.extract_strided_slice %330 {offsets = [0, 16], sizes = [8, 8], strides = [1, 1]} : vector<8x96xf32> to vector<8x8xf32>
    %336 = vector.shape_cast %335 : vector<8x8xf32> to vector<1x8x8xf32>
    %337 = vector.extract_strided_slice %330 {offsets = [0, 24], sizes = [8, 8], strides = [1, 1]} : vector<8x96xf32> to vector<8x8xf32>
    %338 = vector.shape_cast %337 : vector<8x8xf32> to vector<1x8x8xf32>
    %339 = tpu.concatenate %332, %334, %336, %338 in 0 : vector<1x8x8xf32>, vector<1x8x8xf32>, vector<1x8x8xf32>, vector<1x8x8xf32> -> vector<4x8x8xf32>
    %cst_115 = arith.constant 0.176776692 : f32
    %340 = vector.broadcast %cst_115 : f32 to vector<4x8x8xf32>
    %341 = arith.mulf %339, %340 : vector<4x8x8xf32>
    %342 = vector.extract_strided_slice %330 {offsets = [0, 32], sizes = [8, 8], strides = [1, 1]} : vector<8x96xf32> to vector<8x8xf32>
    %343 = vector.shape_cast %342 : vector<8x8xf32> to vector<1x8x8xf32>
    %344 = vector.extract_strided_slice %330 {offsets = [0, 40], sizes = [8, 8], strides = [1, 1]} : vector<8x96xf32> to vector<8x8xf32>
    %345 = vector.shape_cast %344 : vector<8x8xf32> to vector<1x8x8xf32>
    %346 = vector.extract_strided_slice %330 {offsets = [0, 48], sizes = [8, 8], strides = [1, 1]} : vector<8x96xf32> to vector<8x8xf32>
    %347 = vector.shape_cast %346 : vector<8x8xf32> to vector<1x8x8xf32>
    %348 = vector.extract_strided_slice %330 {offsets = [0, 56], sizes = [8, 8], strides = [1, 1]} : vector<8x96xf32> to vector<8x8xf32>
    %349 = vector.shape_cast %348 : vector<8x8xf32> to vector<1x8x8xf32>
    %350 = tpu.concatenate %343, %345, %347, %349 in 0 : vector<1x8x8xf32>, vector<1x8x8xf32>, vector<1x8x8xf32>, vector<1x8x8xf32> -> vector<4x8x8xf32>
    %351 = vector.extract_strided_slice %330 {offsets = [0, 64], sizes = [8, 8], strides = [1, 1]} : vector<8x96xf32> to vector<8x8xf32>
    %352 = vector.shape_cast %351 : vector<8x8xf32> to vector<1x8x8xf32>
    %353 = vector.extract_strided_slice %330 {offsets = [0, 72], sizes = [8, 8], strides = [1, 1]} : vector<8x96xf32> to vector<8x8xf32>
    %354 = vector.shape_cast %353 : vector<8x8xf32> to vector<1x8x8xf32>
    %355 = vector.extract_strided_slice %330 {offsets = [0, 80], sizes = [8, 8], strides = [1, 1]} : vector<8x96xf32> to vector<8x8xf32>
    %356 = vector.shape_cast %355 : vector<8x8xf32> to vector<1x8x8xf32>
    %357 = vector.extract_strided_slice %330 {offsets = [0, 88], sizes = [8, 8], strides = [1, 1]} : vector<8x96xf32> to vector<8x8xf32>
    %358 = vector.shape_cast %357 : vector<8x8xf32> to vector<1x8x8xf32>
    %359 = tpu.concatenate %352, %354, %356, %358 in 0 : vector<1x8x8xf32>, vector<1x8x8xf32>, vector<1x8x8xf32>, vector<1x8x8xf32> -> vector<4x8x8xf32>
    "tpu.trace_start"() <{level = 10 : i32, message = "htd,hsd->hts"}> : () -> ()
    %cst_116 = arith.constant dense<0.000000e+00> : vector<4x8x8xf32>
    %360 = tpu.matmul %341, %350, %cst_116 {dimension_numbers = #tpu.dot_dimension_numbers<[2], [2], [1], [1], [0, 0, 0, 1, 1, 1], [0], [0]>} : vector<4x8x8xf32>, vector<4x8x8xf32>, vector<4x8x8xf32> -> vector<4x8x8xf32>
    "tpu.trace_stop"() : () -> ()
    %361 = vector.shape_cast %13 : vector<8x8xi1> to vector<1x8x8xi1>
    %cst_117 = arith.constant -1.000000e+30 : f32
    %362 = vector.shape_cast %361 : vector<1x8x8xi1> to vector<1x8x8xi1>
    %363 = vector.broadcast %362 : vector<1x8x8xi1> to vector<4x8x8xi1>
    %364 = vector.broadcast %cst_117 : f32 to vector<4x8x8xf32>
    %365 = arith.select %363, %360, %364 : vector<4x8x8xi1>, vector<4x8x8xf32>
    %cst_118 = arith.constant dense<0xFF800000> : vector<4x8xf32>
    %366 = vector.multi_reduction <maximumf>, %365, %cst_118 [2] : vector<4x8x8xf32> to vector<4x8xf32>
    %367 = vector.shape_cast %366 : vector<4x8xf32> to vector<4x8x1xf32>
    %368 = vector.broadcast %367 : vector<4x8x1xf32> to vector<4x8x8xf32>
    %369 = arith.subf %365, %368 : vector<4x8x8xf32>
    %370 = math.exp %369 : vector<4x8x8xf32>
    %cst_119 = arith.constant dense<0.000000e+00> : vector<4x8xf32>
    %371 = vector.multi_reduction <add>, %370, %cst_119 [2] : vector<4x8x8xf32> to vector<4x8xf32>
    %372 = vector.shape_cast %371 : vector<4x8xf32> to vector<4x8x1xf32>
    %373 = tpu.reciprocal %372 : vector<4x8x1xf32> -> vector<4x8x1xf32>
    %374 = vector.broadcast %373 : vector<4x8x1xf32> to vector<4x8x8xf32>
    %375 = arith.mulf %370, %374 : vector<4x8x8xf32>
    "tpu.trace_start"() <{level = 10 : i32, message = "hts,hsd->htd"}> : () -> ()
    %cst_120 = arith.constant dense<0.000000e+00> : vector<4x8x8xf32>
    %376 = tpu.matmul %375, %359, %cst_120 {dimension_numbers = #tpu.dot_dimension_numbers<[2], [1], [1], [2], [0, 0, 0, 1, 1, 2], [0], [0]>} : vector<4x8x8xf32>, vector<4x8x8xf32>, vector<4x8x8xf32> -> vector<4x8x8xf32>
    "tpu.trace_stop"() : () -> ()
    %377 = vector.extract_strided_slice %376 {offsets = [0, 0, 0], sizes = [1, 8, 8], strides = [1, 1, 1]} : vector<4x8x8xf32> to vector<1x8x8xf32>
    %378 = vector.shape_cast %377 : vector<1x8x8xf32> to vector<8x8xf32>
    %379 = vector.extract_strided_slice %376 {offsets = [1, 0, 0], sizes = [1, 8, 8], strides = [1, 1, 1]} : vector<4x8x8xf32> to vector<1x8x8xf32>
    %380 = vector.shape_cast %379 : vector<1x8x8xf32> to vector<8x8xf32>
    %381 = vector.extract_strided_slice %376 {offsets = [2, 0, 0], sizes = [1, 8, 8], strides = [1, 1, 1]} : vector<4x8x8xf32> to vector<1x8x8xf32>
    %382 = vector.shape_cast %381 : vector<1x8x8xf32> to vector<8x8xf32>
    %383 = vector.extract_strided_slice %376 {offsets = [3, 0, 0], sizes = [1, 8, 8], strides = [1, 1, 1]} : vector<4x8x8xf32> to vector<1x8x8xf32>
    %384 = vector.shape_cast %383 : vector<1x8x8xf32> to vector<8x8xf32>
    %385 = tpu.concatenate %378, %380, %382, %384 in 1 : vector<8x8xf32>, vector<8x8xf32>, vector<8x8xf32>, vector<8x8xf32> -> vector<8x32xf32>
    %c2_121 = arith.constant 2 : index
    %c0_122 = arith.constant 0 : index
    %c0_123 = arith.constant 0 : index
    %386 = vector.load %arg7[%c2_121, %c0_122, %c0_123] : memref<4x32x32xf32, #tpu.memory_space<vmem>>, vector<1x32x32xf32>
    %387 = vector.shape_cast %386 : vector<1x32x32xf32> to vector<32x32xf32>
    %cst_124 = arith.constant dense<0.000000e+00> : vector<8x32xf32>
    %388 = tpu.matmul %385, %387, %cst_124 {dimension_numbers = #tpu.dot_dimension_numbers<[1], [0], [0], [1], [0, 0, 1, 1], [], []>} : vector<8x32xf32>, vector<32x32xf32>, vector<8x32xf32> -> vector<8x32xf32>
    %c2_125 = arith.constant 2 : index
    %c0_126 = arith.constant 0 : index
    %389 = vector.load %arg8[%c2_125, %c0_126] : memref<4x32xf32, #tpu.memory_space<vmem>>, vector<1x32xf32>
    %390 = vector.shape_cast %389 : vector<1x32xf32> to vector<32xf32>
    %391 = vector.shape_cast %390 : vector<32xf32> to vector<1x32xf32>
    %392 = vector.broadcast %391 : vector<1x32xf32> to vector<8x32xf32>
    %393 = arith.addf %388, %392 : vector<8x32xf32>
    %394 = arith.addf %301, %393 : vector<8x32xf32>
    %c2_127 = arith.constant 2 : index
    %c0_128 = arith.constant 0 : index
    %395 = vector.load %arg9[%c2_127, %c0_128] : memref<4x32xf32, #tpu.memory_space<vmem>>, vector<1x32xf32>
    %396 = vector.shape_cast %395 : vector<1x32xf32> to vector<32xf32>
    %c2_129 = arith.constant 2 : index
    %c0_130 = arith.constant 0 : index
    %397 = vector.load %arg10[%c2_129, %c0_130] : memref<4x32xf32, #tpu.memory_space<vmem>>, vector<1x32xf32>
    %398 = vector.shape_cast %397 : vector<1x32xf32> to vector<32xf32>
    %cst_131 = arith.constant dense<0.000000e+00> : vector<8xf32>
    %399 = vector.multi_reduction <add>, %394, %cst_131 [1] : vector<8x32xf32> to vector<8xf32>
    %400 = vector.shape_cast %399 : vector<8xf32> to vector<8x1xf32>
    %cst_132 = arith.constant 3.125000e-02 : f32
    %401 = vector.broadcast %cst_132 : f32 to vector<8x1xf32>
    %402 = arith.mulf %400, %401 : vector<8x1xf32>
    %403 = vector.broadcast %402 : vector<8x1xf32> to vector<8x32xf32>
    %404 = arith.subf %394, %403 : vector<8x32xf32>
    %405 = arith.mulf %404, %404 : vector<8x32xf32>
    %cst_133 = arith.constant dense<0.000000e+00> : vector<8xf32>
    %406 = vector.multi_reduction <add>, %405, %cst_133 [1] : vector<8x32xf32> to vector<8xf32>
    %407 = vector.shape_cast %406 : vector<8xf32> to vector<8x1xf32>
    %cst_134 = arith.constant 3.125000e-02 : f32
    %408 = vector.broadcast %cst_134 : f32 to vector<8x1xf32>
    %409 = arith.mulf %407, %408 : vector<8x1xf32>
    %cst_135 = arith.constant 9.99999974E-6 : f32
    %410 = vector.broadcast %cst_135 : f32 to vector<8x1xf32>
    %411 = arith.addf %409, %410 : vector<8x1xf32>
    %412 = math.rsqrt %411 : vector<8x1xf32>
    %413 = vector.broadcast %412 : vector<8x1xf32> to vector<8x32xf32>
    %414 = arith.mulf %404, %413 : vector<8x32xf32>
    %415 = vector.shape_cast %396 : vector<32xf32> to vector<1x32xf32>
    %416 = vector.broadcast %415 : vector<1x32xf32> to vector<8x32xf32>
    %417 = arith.mulf %414, %416 : vector<8x32xf32>
    %418 = vector.shape_cast %398 : vector<32xf32> to vector<1x32xf32>
    %419 = vector.broadcast %418 : vector<1x32xf32> to vector<8x32xf32>
    %420 = arith.addf %417, %419 : vector<8x32xf32>
    %c2_136 = arith.constant 2 : index
    %c0_137 = arith.constant 0 : index
    %c0_138 = arith.constant 0 : index
    %421 = vector.load %arg11[%c2_136, %c0_137, %c0_138] : memref<4x32x128xf32, #tpu.memory_space<vmem>>, vector<1x32x128xf32>
    %422 = vector.shape_cast %421 : vector<1x32x128xf32> to vector<32x128xf32>
    %cst_139 = arith.constant dense<0.000000e+00> : vector<8x128xf32>
    %423 = tpu.matmul %420, %422, %cst_139 {dimension_numbers = #tpu.dot_dimension_numbers<[1], [0], [0], [1], [0, 0, 1, 1], [], []>} : vector<8x32xf32>, vector<32x128xf32>, vector<8x128xf32> -> vector<8x128xf32>
    %c2_140 = arith.constant 2 : index
    %c0_141 = arith.constant 0 : index
    %424 = vector.load %arg12[%c2_140, %c0_141] : memref<4x128xf32, #tpu.memory_space<vmem>>, vector<1x128xf32>
    %425 = vector.shape_cast %424 : vector<1x128xf32> to vector<128xf32>
    %426 = vector.shape_cast %425 : vector<128xf32> to vector<1x128xf32>
    %427 = vector.broadcast %426 : vector<1x128xf32> to vector<8x128xf32>
    %428 = arith.addf %423, %427 : vector<8x128xf32>
    %cst_142 = arith.constant 5.000000e-01 : f32
    %429 = vector.broadcast %cst_142 : f32 to vector<8x128xf32>
    %430 = arith.mulf %429, %428 : vector<8x128xf32>
    %cst_143 = arith.constant 0.707106769 : f32
    %431 = vector.broadcast %cst_143 : f32 to vector<8x128xf32>
    %432 = arith.mulf %428, %431 : vector<8x128xf32>
    %433 = math.erf %432 : vector<8x128xf32>
    %cst_144 = arith.constant 1.000000e+00 : f32
    %434 = vector.broadcast %cst_144 : f32 to vector<8x128xf32>
    %435 = arith.addf %434, %433 : vector<8x128xf32>
    %436 = arith.mulf %430, %435 : vector<8x128xf32>
    %c2_145 = arith.constant 2 : index
    %c0_146 = arith.constant 0 : index
    %c0_147 = arith.constant 0 : index
    %437 = vector.load %arg13[%c2_145, %c0_146, %c0_147] : memref<4x128x32xf32, #tpu.memory_space<vmem>>, vector<1x128x32xf32>
    %438 = vector.shape_cast %437 : vector<1x128x32xf32> to vector<128x32xf32>
    %cst_148 = arith.constant dense<0.000000e+00> : vector<8x32xf32>
    %439 = tpu.matmul %436, %438, %cst_148 {dimension_numbers = #tpu.dot_dimension_numbers<[1], [0], [0], [1], [0, 0, 1, 1], [], []>} : vector<8x128xf32>, vector<128x32xf32>, vector<8x32xf32> -> vector<8x32xf32>
    %c2_149 = arith.constant 2 : index
    %c0_150 = arith.constant 0 : index
    %440 = vector.load %arg14[%c2_149, %c0_150] : memref<4x32xf32, #tpu.memory_space<vmem>>, vector<1x32xf32>
    %441 = vector.shape_cast %440 : vector<1x32xf32> to vector<32xf32>
    %442 = vector.shape_cast %441 : vector<32xf32> to vector<1x32xf32>
    %443 = vector.broadcast %442 : vector<1x32xf32> to vector<8x32xf32>
    %444 = arith.addf %439, %443 : vector<8x32xf32>
    %445 = arith.addf %394, %444 : vector<8x32xf32>
    %c3 = arith.constant 3 : index
    %c0_151 = arith.constant 0 : index
    %446 = vector.load %arg4[%c3, %c0_151] : memref<4x32xf32, #tpu.memory_space<vmem>>, vector<1x32xf32>
    %447 = vector.shape_cast %446 : vector<1x32xf32> to vector<32xf32>
    %c3_152 = arith.constant 3 : index
    %c0_153 = arith.constant 0 : index
    %448 = vector.load %arg5[%c3_152, %c0_153] : memref<4x32xf32, #tpu.memory_space<vmem>>, vector<1x32xf32>
    %449 = vector.shape_cast %448 : vector<1x32xf32> to vector<32xf32>
    %cst_154 = arith.constant dense<0.000000e+00> : vector<8xf32>
    %450 = vector.multi_reduction <add>, %445, %cst_154 [1] : vector<8x32xf32> to vector<8xf32>
    %451 = vector.shape_cast %450 : vector<8xf32> to vector<8x1xf32>
    %cst_155 = arith.constant 3.125000e-02 : f32
    %452 = vector.broadcast %cst_155 : f32 to vector<8x1xf32>
    %453 = arith.mulf %451, %452 : vector<8x1xf32>
    %454 = vector.broadcast %453 : vector<8x1xf32> to vector<8x32xf32>
    %455 = arith.subf %445, %454 : vector<8x32xf32>
    %456 = arith.mulf %455, %455 : vector<8x32xf32>
    %cst_156 = arith.constant dense<0.000000e+00> : vector<8xf32>
    %457 = vector.multi_reduction <add>, %456, %cst_156 [1] : vector<8x32xf32> to vector<8xf32>
    %458 = vector.shape_cast %457 : vector<8xf32> to vector<8x1xf32>
    %cst_157 = arith.constant 3.125000e-02 : f32
    %459 = vector.broadcast %cst_157 : f32 to vector<8x1xf32>
    %460 = arith.mulf %458, %459 : vector<8x1xf32>
    %cst_158 = arith.constant 9.99999974E-6 : f32
    %461 = vector.broadcast %cst_158 : f32 to vector<8x1xf32>
    %462 = arith.addf %460, %461 : vector<8x1xf32>
    %463 = math.rsqrt %462 : vector<8x1xf32>
    %464 = vector.broadcast %463 : vector<8x1xf32> to vector<8x32xf32>
    %465 = arith.mulf %455, %464 : vector<8x32xf32>
    %466 = vector.shape_cast %447 : vector<32xf32> to vector<1x32xf32>
    %467 = vector.broadcast %466 : vector<1x32xf32> to vector<8x32xf32>
    %468 = arith.mulf %465, %467 : vector<8x32xf32>
    %469 = vector.shape_cast %449 : vector<32xf32> to vector<1x32xf32>
    %470 = vector.broadcast %469 : vector<1x32xf32> to vector<8x32xf32>
    %471 = arith.addf %468, %470 : vector<8x32xf32>
    %c3_159 = arith.constant 3 : index
    %c0_160 = arith.constant 0 : index
    %c0_161 = arith.constant 0 : index
    %472 = vector.load %arg6[%c3_159, %c0_160, %c0_161] : memref<4x32x96xf32, #tpu.memory_space<vmem>>, vector<1x32x96xf32>
    %473 = vector.shape_cast %472 : vector<1x32x96xf32> to vector<32x96xf32>
    %cst_162 = arith.constant dense<0.000000e+00> : vector<8x96xf32>
    %474 = tpu.matmul %471, %473, %cst_162 {dimension_numbers = #tpu.dot_dimension_numbers<[1], [0], [0], [1], [0, 0, 1, 1], [], []>} : vector<8x32xf32>, vector<32x96xf32>, vector<8x96xf32> -> vector<8x96xf32>
    %475 = vector.extract_strided_slice %474 {offsets = [0, 0], sizes = [8, 8], strides = [1, 1]} : vector<8x96xf32> to vector<8x8xf32>
    %476 = vector.shape_cast %475 : vector<8x8xf32> to vector<1x8x8xf32>
    %477 = vector.extract_strided_slice %474 {offsets = [0, 8], sizes = [8, 8], strides = [1, 1]} : vector<8x96xf32> to vector<8x8xf32>
    %478 = vector.shape_cast %477 : vector<8x8xf32> to vector<1x8x8xf32>
    %479 = vector.extract_strided_slice %474 {offsets = [0, 16], sizes = [8, 8], strides = [1, 1]} : vector<8x96xf32> to vector<8x8xf32>
    %480 = vector.shape_cast %479 : vector<8x8xf32> to vector<1x8x8xf32>
    %481 = vector.extract_strided_slice %474 {offsets = [0, 24], sizes = [8, 8], strides = [1, 1]} : vector<8x96xf32> to vector<8x8xf32>
    %482 = vector.shape_cast %481 : vector<8x8xf32> to vector<1x8x8xf32>
    %483 = tpu.concatenate %476, %478, %480, %482 in 0 : vector<1x8x8xf32>, vector<1x8x8xf32>, vector<1x8x8xf32>, vector<1x8x8xf32> -> vector<4x8x8xf32>
    %cst_163 = arith.constant 0.176776692 : f32
    %484 = vector.broadcast %cst_163 : f32 to vector<4x8x8xf32>
    %485 = arith.mulf %483, %484 : vector<4x8x8xf32>
    %486 = vector.extract_strided_slice %474 {offsets = [0, 32], sizes = [8, 8], strides = [1, 1]} : vector<8x96xf32> to vector<8x8xf32>
    %487 = vector.shape_cast %486 : vector<8x8xf32> to vector<1x8x8xf32>
    %488 = vector.extract_strided_slice %474 {offsets = [0, 40], sizes = [8, 8], strides = [1, 1]} : vector<8x96xf32> to vector<8x8xf32>
    %489 = vector.shape_cast %488 : vector<8x8xf32> to vector<1x8x8xf32>
    %490 = vector.extract_strided_slice %474 {offsets = [0, 48], sizes = [8, 8], strides = [1, 1]} : vector<8x96xf32> to vector<8x8xf32>
    %491 = vector.shape_cast %490 : vector<8x8xf32> to vector<1x8x8xf32>
    %492 = vector.extract_strided_slice %474 {offsets = [0, 56], sizes = [8, 8], strides = [1, 1]} : vector<8x96xf32> to vector<8x8xf32>
    %493 = vector.shape_cast %492 : vector<8x8xf32> to vector<1x8x8xf32>
    %494 = tpu.concatenate %487, %489, %491, %493 in 0 : vector<1x8x8xf32>, vector<1x8x8xf32>, vector<1x8x8xf32>, vector<1x8x8xf32> -> vector<4x8x8xf32>
    %495 = vector.extract_strided_slice %474 {offsets = [0, 64], sizes = [8, 8], strides = [1, 1]} : vector<8x96xf32> to vector<8x8xf32>
    %496 = vector.shape_cast %495 : vector<8x8xf32> to vector<1x8x8xf32>
    %497 = vector.extract_strided_slice %474 {offsets = [0, 72], sizes = [8, 8], strides = [1, 1]} : vector<8x96xf32> to vector<8x8xf32>
    %498 = vector.shape_cast %497 : vector<8x8xf32> to vector<1x8x8xf32>
    %499 = vector.extract_strided_slice %474 {offsets = [0, 80], sizes = [8, 8], strides = [1, 1]} : vector<8x96xf32> to vector<8x8xf32>
    %500 = vector.shape_cast %499 : vector<8x8xf32> to vector<1x8x8xf32>
    %501 = vector.extract_strided_slice %474 {offsets = [0, 88], sizes = [8, 8], strides = [1, 1]} : vector<8x96xf32> to vector<8x8xf32>
    %502 = vector.shape_cast %501 : vector<8x8xf32> to vector<1x8x8xf32>
    %503 = tpu.concatenate %496, %498, %500, %502 in 0 : vector<1x8x8xf32>, vector<1x8x8xf32>, vector<1x8x8xf32>, vector<1x8x8xf32> -> vector<4x8x8xf32>
    "tpu.trace_start"() <{level = 10 : i32, message = "htd,hsd->hts"}> : () -> ()
    %cst_164 = arith.constant dense<0.000000e+00> : vector<4x8x8xf32>
    %504 = tpu.matmul %485, %494, %cst_164 {dimension_numbers = #tpu.dot_dimension_numbers<[2], [2], [1], [1], [0, 0, 0, 1, 1, 1], [0], [0]>} : vector<4x8x8xf32>, vector<4x8x8xf32>, vector<4x8x8xf32> -> vector<4x8x8xf32>
    "tpu.trace_stop"() : () -> ()
    %505 = vector.shape_cast %13 : vector<8x8xi1> to vector<1x8x8xi1>
    %cst_165 = arith.constant -1.000000e+30 : f32
    %506 = vector.shape_cast %505 : vector<1x8x8xi1> to vector<1x8x8xi1>
    %507 = vector.broadcast %506 : vector<1x8x8xi1> to vector<4x8x8xi1>
    %508 = vector.broadcast %cst_165 : f32 to vector<4x8x8xf32>
    %509 = arith.select %507, %504, %508 : vector<4x8x8xi1>, vector<4x8x8xf32>
    %cst_166 = arith.constant dense<0xFF800000> : vector<4x8xf32>
    %510 = vector.multi_reduction <maximumf>, %509, %cst_166 [2] : vector<4x8x8xf32> to vector<4x8xf32>
    %511 = vector.shape_cast %510 : vector<4x8xf32> to vector<4x8x1xf32>
    %512 = vector.broadcast %511 : vector<4x8x1xf32> to vector<4x8x8xf32>
    %513 = arith.subf %509, %512 : vector<4x8x8xf32>
    %514 = math.exp %513 : vector<4x8x8xf32>
    %cst_167 = arith.constant dense<0.000000e+00> : vector<4x8xf32>
    %515 = vector.multi_reduction <add>, %514, %cst_167 [2] : vector<4x8x8xf32> to vector<4x8xf32>
    %516 = vector.shape_cast %515 : vector<4x8xf32> to vector<4x8x1xf32>
    %517 = tpu.reciprocal %516 : vector<4x8x1xf32> -> vector<4x8x1xf32>
    %518 = vector.broadcast %517 : vector<4x8x1xf32> to vector<4x8x8xf32>
    %519 = arith.mulf %514, %518 : vector<4x8x8xf32>
    "tpu.trace_start"() <{level = 10 : i32, message = "hts,hsd->htd"}> : () -> ()
    %cst_168 = arith.constant dense<0.000000e+00> : vector<4x8x8xf32>
    %520 = tpu.matmul %519, %503, %cst_168 {dimension_numbers = #tpu.dot_dimension_numbers<[2], [1], [1], [2], [0, 0, 0, 1, 1, 2], [0], [0]>} : vector<4x8x8xf32>, vector<4x8x8xf32>, vector<4x8x8xf32> -> vector<4x8x8xf32>
    "tpu.trace_stop"() : () -> ()
    %521 = vector.extract_strided_slice %520 {offsets = [0, 0, 0], sizes = [1, 8, 8], strides = [1, 1, 1]} : vector<4x8x8xf32> to vector<1x8x8xf32>
    %522 = vector.shape_cast %521 : vector<1x8x8xf32> to vector<8x8xf32>
    %523 = vector.extract_strided_slice %520 {offsets = [1, 0, 0], sizes = [1, 8, 8], strides = [1, 1, 1]} : vector<4x8x8xf32> to vector<1x8x8xf32>
    %524 = vector.shape_cast %523 : vector<1x8x8xf32> to vector<8x8xf32>
    %525 = vector.extract_strided_slice %520 {offsets = [2, 0, 0], sizes = [1, 8, 8], strides = [1, 1, 1]} : vector<4x8x8xf32> to vector<1x8x8xf32>
    %526 = vector.shape_cast %525 : vector<1x8x8xf32> to vector<8x8xf32>
    %527 = vector.extract_strided_slice %520 {offsets = [3, 0, 0], sizes = [1, 8, 8], strides = [1, 1, 1]} : vector<4x8x8xf32> to vector<1x8x8xf32>
    %528 = vector.shape_cast %527 : vector<1x8x8xf32> to vector<8x8xf32>
    %529 = tpu.concatenate %522, %524, %526, %528 in 1 : vector<8x8xf32>, vector<8x8xf32>, vector<8x8xf32>, vector<8x8xf32> -> vector<8x32xf32>
    %c3_169 = arith.constant 3 : index
    %c0_170 = arith.constant 0 : index
    %c0_171 = arith.constant 0 : index
    %530 = vector.load %arg7[%c3_169, %c0_170, %c0_171] : memref<4x32x32xf32, #tpu.memory_space<vmem>>, vector<1x32x32xf32>
    %531 = vector.shape_cast %530 : vector<1x32x32xf32> to vector<32x32xf32>
    %cst_172 = arith.constant dense<0.000000e+00> : vector<8x32xf32>
    %532 = tpu.matmul %529, %531, %cst_172 {dimension_numbers = #tpu.dot_dimension_numbers<[1], [0], [0], [1], [0, 0, 1, 1], [], []>} : vector<8x32xf32>, vector<32x32xf32>, vector<8x32xf32> -> vector<8x32xf32>
    %c3_173 = arith.constant 3 : index
    %c0_174 = arith.constant 0 : index
    %533 = vector.load %arg8[%c3_173, %c0_174] : memref<4x32xf32, #tpu.memory_space<vmem>>, vector<1x32xf32>
    %534 = vector.shape_cast %533 : vector<1x32xf32> to vector<32xf32>
    %535 = vector.shape_cast %534 : vector<32xf32> to vector<1x32xf32>
    %536 = vector.broadcast %535 : vector<1x32xf32> to vector<8x32xf32>
    %537 = arith.addf %532, %536 : vector<8x32xf32>
    %538 = arith.addf %445, %537 : vector<8x32xf32>
    %c3_175 = arith.constant 3 : index
    %c0_176 = arith.constant 0 : index
    %539 = vector.load %arg9[%c3_175, %c0_176] : memref<4x32xf32, #tpu.memory_space<vmem>>, vector<1x32xf32>
    %540 = vector.shape_cast %539 : vector<1x32xf32> to vector<32xf32>
    %c3_177 = arith.constant 3 : index
    %c0_178 = arith.constant 0 : index
    %541 = vector.load %arg10[%c3_177, %c0_178] : memref<4x32xf32, #tpu.memory_space<vmem>>, vector<1x32xf32>
    %542 = vector.shape_cast %541 : vector<1x32xf32> to vector<32xf32>
    %cst_179 = arith.constant dense<0.000000e+00> : vector<8xf32>
    %543 = vector.multi_reduction <add>, %538, %cst_179 [1] : vector<8x32xf32> to vector<8xf32>
    %544 = vector.shape_cast %543 : vector<8xf32> to vector<8x1xf32>
    %cst_180 = arith.constant 3.125000e-02 : f32
    %545 = vector.broadcast %cst_180 : f32 to vector<8x1xf32>
    %546 = arith.mulf %544, %545 : vector<8x1xf32>
    %547 = vector.broadcast %546 : vector<8x1xf32> to vector<8x32xf32>
    %548 = arith.subf %538, %547 : vector<8x32xf32>
    %549 = arith.mulf %548, %548 : vector<8x32xf32>
    %cst_181 = arith.constant dense<0.000000e+00> : vector<8xf32>
    %550 = vector.multi_reduction <add>, %549, %cst_181 [1] : vector<8x32xf32> to vector<8xf32>
    %551 = vector.shape_cast %550 : vector<8xf32> to vector<8x1xf32>
    %cst_182 = arith.constant 3.125000e-02 : f32
    %552 = vector.broadcast %cst_182 : f32 to vector<8x1xf32>
    %553 = arith.mulf %551, %552 : vector<8x1xf32>
    %cst_183 = arith.constant 9.99999974E-6 : f32
    %554 = vector.broadcast %cst_183 : f32 to vector<8x1xf32>
    %555 = arith.addf %553, %554 : vector<8x1xf32>
    %556 = math.rsqrt %555 : vector<8x1xf32>
    %557 = vector.broadcast %556 : vector<8x1xf32> to vector<8x32xf32>
    %558 = arith.mulf %548, %557 : vector<8x32xf32>
    %559 = vector.shape_cast %540 : vector<32xf32> to vector<1x32xf32>
    %560 = vector.broadcast %559 : vector<1x32xf32> to vector<8x32xf32>
    %561 = arith.mulf %558, %560 : vector<8x32xf32>
    %562 = vector.shape_cast %542 : vector<32xf32> to vector<1x32xf32>
    %563 = vector.broadcast %562 : vector<1x32xf32> to vector<8x32xf32>
    %564 = arith.addf %561, %563 : vector<8x32xf32>
    %c3_184 = arith.constant 3 : index
    %c0_185 = arith.constant 0 : index
    %c0_186 = arith.constant 0 : index
    %565 = vector.load %arg11[%c3_184, %c0_185, %c0_186] : memref<4x32x128xf32, #tpu.memory_space<vmem>>, vector<1x32x128xf32>
    %566 = vector.shape_cast %565 : vector<1x32x128xf32> to vector<32x128xf32>
    %cst_187 = arith.constant dense<0.000000e+00> : vector<8x128xf32>
    %567 = tpu.matmul %564, %566, %cst_187 {dimension_numbers = #tpu.dot_dimension_numbers<[1], [0], [0], [1], [0, 0, 1, 1], [], []>} : vector<8x32xf32>, vector<32x128xf32>, vector<8x128xf32> -> vector<8x128xf32>
    %c3_188 = arith.constant 3 : index
    %c0_189 = arith.constant 0 : index
    %568 = vector.load %arg12[%c3_188, %c0_189] : memref<4x128xf32, #tpu.memory_space<vmem>>, vector<1x128xf32>
    %569 = vector.shape_cast %568 : vector<1x128xf32> to vector<128xf32>
    %570 = vector.shape_cast %569 : vector<128xf32> to vector<1x128xf32>
    %571 = vector.broadcast %570 : vector<1x128xf32> to vector<8x128xf32>
    %572 = arith.addf %567, %571 : vector<8x128xf32>
    %cst_190 = arith.constant 5.000000e-01 : f32
    %573 = vector.broadcast %cst_190 : f32 to vector<8x128xf32>
    %574 = arith.mulf %573, %572 : vector<8x128xf32>
    %cst_191 = arith.constant 0.707106769 : f32
    %575 = vector.broadcast %cst_191 : f32 to vector<8x128xf32>
    %576 = arith.mulf %572, %575 : vector<8x128xf32>
    %577 = math.erf %576 : vector<8x128xf32>
    %cst_192 = arith.constant 1.000000e+00 : f32
    %578 = vector.broadcast %cst_192 : f32 to vector<8x128xf32>
    %579 = arith.addf %578, %577 : vector<8x128xf32>
    %580 = arith.mulf %574, %579 : vector<8x128xf32>
    %c3_193 = arith.constant 3 : index
    %c0_194 = arith.constant 0 : index
    %c0_195 = arith.constant 0 : index
    %581 = vector.load %arg13[%c3_193, %c0_194, %c0_195] : memref<4x128x32xf32, #tpu.memory_space<vmem>>, vector<1x128x32xf32>
    %582 = vector.shape_cast %581 : vector<1x128x32xf32> to vector<128x32xf32>
    %cst_196 = arith.constant dense<0.000000e+00> : vector<8x32xf32>
    %583 = tpu.matmul %580, %582, %cst_196 {dimension_numbers = #tpu.dot_dimension_numbers<[1], [0], [0], [1], [0, 0, 1, 1], [], []>} : vector<8x128xf32>, vector<128x32xf32>, vector<8x32xf32> -> vector<8x32xf32>
    %c3_197 = arith.constant 3 : index
    %c0_198 = arith.constant 0 : index
    %584 = vector.load %arg14[%c3_197, %c0_198] : memref<4x32xf32, #tpu.memory_space<vmem>>, vector<1x32xf32>
    %585 = vector.shape_cast %584 : vector<1x32xf32> to vector<32xf32>
    %586 = vector.shape_cast %585 : vector<32xf32> to vector<1x32xf32>
    %587 = vector.broadcast %586 : vector<1x32xf32> to vector<8x32xf32>
    %588 = arith.addf %583, %587 : vector<8x32xf32>
    %589 = arith.addf %538, %588 : vector<8x32xf32>
    %c0_199 = arith.constant 0 : index
    %c0_200 = arith.constant 0 : index
    %590 = vector.load %arg15[%c0_199, %c0_200] : memref<32x128xf32, #tpu.memory_space<vmem>>, vector<32x128xf32>
    %cst_201 = arith.constant dense<0.000000e+00> : vector<8x128xf32>
    %591 = tpu.matmul %589, %590, %cst_201 {dimension_numbers = #tpu.dot_dimension_numbers<[1], [0], [0], [1], [0, 0, 1, 1], [], []>} : vector<8x32xf32>, vector<32x128xf32>, vector<8x128xf32> -> vector<8x128xf32>
    %c0_202 = arith.constant 0 : index
    %c0_203 = arith.constant 0 : index
    %592 = vector.load %arg16[%c0_202, %c0_203] : memref<1x128xf32, #tpu.memory_space<vmem>>, vector<1x128xf32>
    %593 = vector.broadcast %592 : vector<1x128xf32> to vector<8x128xf32>
    %594 = arith.addf %591, %593 : vector<8x128xf32>
    %c0_204 = arith.constant 0 : index
    %c0_205 = arith.constant 0 : index
    %c0_206 = arith.constant 0 : index
    %595 = vector.load %arg17[%c0_204, %c0_205, %c0_206] : memref<1x8x128xf32, #tpu.memory_space<vmem>>, vector<1x8x128xf32>
    %596 = vector.shape_cast %595 : vector<1x8x128xf32> to vector<8x128xf32>
    %597 = vector.shape_cast %594 : vector<8x128xf32> to vector<1x8x128xf32>
    tpu.vector_store %arg17[%c0_204, %c0_205, %c0_206], %597 {strides = array<i32>} : memref<1x8x128xf32, #tpu.memory_space<vmem>>, vector<1x8x128xf32>,
    return
  }
  func.func @transform_0(%arg0: i32) -> (i32, i32, i32) {
    %c0_i32 = arith.constant 0 : i32
    %c0_i32_0 = arith.constant 0 : i32
    %c0_i32_1 = arith.constant 0 : i32
    return %arg0, %c0_i32, %c0_i32_0 : i32, i32, i32
  }
  func.func @transform_1(%arg0: i32) -> (i32, i32) {
    %c0_i32 = arith.constant 0 : i32
    %c0_i32_0 = arith.constant 0 : i32
    %c0_i32_1 = arith.constant 0 : i32
    return %c0_i32, %c0_i32_0 : i32, i32
  }
  func.func @transform_2(%arg0: i32) -> (i32, i32) {
    %c0_i32 = arith.constant 0 : i32
    %c0_i32_0 = arith.constant 0 : i32
    %c0_i32_1 = arith.constant 0 : i32
    return %c0_i32, %c0_i32_0 : i32, i32
  }
  func.func @transform_3(%arg0: i32) -> (i32, i32) {
    %c0_i32 = arith.constant 0 : i32
    %c0_i32_0 = arith.constant 0 : i32
    %c0_i32_1 = arith.constant 0 : i32
    return %c0_i32, %c0_i32_0 : i32, i32
  }
  func.func @transform_4(%arg0: i32) -> (i32, i32) {
    %c0_i32 = arith.constant 0 : i32
    %c0_i32_0 = arith.constant 0 : i32
    %c0_i32_1 = arith.constant 0 : i32
    return %c0_i32, %c0_i32_0 : i32, i32
  }
  func.func @transform_5(%arg0: i32) -> (i32, i32, i32) {
    %c0_i32 = arith.constant 0 : i32
    %c0_i32_0 = arith.constant 0 : i32
    %c0_i32_1 = arith.constant 0 : i32
    %c0_i32_2 = arith.constant 0 : i32
    return %c0_i32, %c0_i32_0, %c0_i32_1 : i32, i32, i32
  }
  func.func @transform_6(%arg0: i32) -> (i32, i32, i32) {
    %c0_i32 = arith.constant 0 : i32
    %c0_i32_0 = arith.constant 0 : i32
    %c0_i32_1 = arith.constant 0 : i32
    %c0_i32_2 = arith.constant 0 : i32
    return %c0_i32, %c0_i32_0, %c0_i32_1 : i32, i32, i32
  }
  func.func @transform_7(%arg0: i32) -> (i32, i32) {
    %c0_i32 = arith.constant 0 : i32
    %c0_i32_0 = arith.constant 0 : i32
    %c0_i32_1 = arith.constant 0 : i32
    return %c0_i32, %c0_i32_0 : i32, i32
  }
  func.func @transform_8(%arg0: i32) -> (i32, i32) {
    %c0_i32 = arith.constant 0 : i32
    %c0_i32_0 = arith.constant 0 : i32
    %c0_i32_1 = arith.constant 0 : i32
    return %c0_i32, %c0_i32_0 : i32, i32
  }
  func.func @transform_9(%arg0: i32) -> (i32, i32) {
    %c0_i32 = arith.constant 0 : i32
    %c0_i32_0 = arith.constant 0 : i32
    %c0_i32_1 = arith.constant 0 : i32
    return %c0_i32, %c0_i32_0 : i32, i32
  }
  func.func @transform_10(%arg0: i32) -> (i32, i32, i32) {
    %c0_i32 = arith.constant 0 : i32
    %c0_i32_0 = arith.constant 0 : i32
    %c0_i32_1 = arith.constant 0 : i32
    %c0_i32_2 = arith.constant 0 : i32
    return %c0_i32, %c0_i32_0, %c0_i32_1 : i32, i32, i32
  }
  func.func @transform_11(%arg0: i32) -> (i32, i32) {
    %c0_i32 = arith.constant 0 : i32
    %c0_i32_0 = arith.constant 0 : i32
    %c0_i32_1 = arith.constant 0 : i32
    return %c0_i32, %c0_i32_0 : i32, i32
  }
  func.func @transform_12(%arg0: i32) -> (i32, i32, i32) {
    %c0_i32 = arith.constant 0 : i32
    %c0_i32_0 = arith.constant 0 : i32
    %c0_i32_1 = arith.constant 0 : i32
    %c0_i32_2 = arith.constant 0 : i32
    return %c0_i32, %c0_i32_0, %c0_i32_1 : i32, i32, i32
  }
  func.func @transform_13(%arg0: i32) -> (i32, i32) {
    %c0_i32 = arith.constant 0 : i32
    %c0_i32_0 = arith.constant 0 : i32
    %c0_i32_1 = arith.constant 0 : i32
    return %c0_i32, %c0_i32_0 : i32, i32
  }
  func.func @transform_14(%arg0: i32) -> (i32, i32) {
    %c0_i32 = arith.constant 0 : i32
    %c0_i32_0 = arith.constant 0 : i32
    %c0_i32_1 = arith.constant 0 : i32
    return %c0_i32, %c0_i32_0 : i32, i32
  }
  func.func @transform_15(%arg0: i32) -> (i32, i32) {
    %c0_i32 = arith.constant 0 : i32
    %c0_i32_0 = arith.constant 0 : i32
    %c0_i32_1 = arith.constant 0 : i32
    return %c0_i32, %c0_i32_0 : i32, i32
  }
  func.func @transform_16(%arg0: i32) -> (i32, i32, i32) {
    %c0_i32 = arith.constant 0 : i32
    %c0_i32_0 = arith.constant 0 : i32
    %c0_i32_1 = arith.constant 0 : i32
    return %arg0, %c0_i32, %c0_i32_0 : i32, i32, i32
  }
}

</mosaic_0001>

<bundles_post_ra>
// kernel: bigram_lm_forward.1
= control target key start
LH: loop header
LB: loop body
LE: loop exit
PB: predicated region body
PF: predicated region fallthrough
CT: control target
= control target key end

     0   :  { %s7595_s0 = inlined_call_operand.vmem [shape: s32[2,8,1], index: 0, kind: input, shape index: {}]   ;;  %s7596_s1 = inlined_call_operand.vmem [shape: f32[128,32], index: 1, kind: input, shape index: {}]   ;;  %s7597_s2 = inlined_call_operand.vmem [shape: f32[8,32], index: 2, kind: input, shape index: {}]   ;;  %s7598_s3 = inlined_call_operand.vmem [shape: f32[4,32], index: 3, kind: input, shape index: {}]   ;;  %s7599_s4 = inlined_call_operand.vmem [shape: f32[4,32], index: 4, kind: input, shape index: {}]   ;;  %s7600_s5 = inlined_call_operand.vmem [shape: f32[4,32,96], index: 5, kind: input, shape index: {}]   ;;  %s7601_s6 = inlined_call_operand.vmem [shape: f32[4,32,32], index: 6, kind: input, shape index: {}]   ;;  %s7602_s7 = inlined_call_operand.vmem [shape: f32[4,32], index: 7, kind: input, shape index: {}]   ;;  %s7603_s8 = inlined_call_operand.vmem [shape: f32[4,32], index: 8, kind: input, shape index: {}]   ;;  %s7604_s9 = inlined_call_operand.vmem [shape: f32[4,32], index: 9, kind: input, shape index: {}]   ;;  %s7605_s10 = inlined_call_operand.vmem [shape: f32[4,32,128], index: 10, kind: input, shape index: {}]   ;;  %s7606_s11 = inlined_call_operand.vmem [shape: f32[4,128], index: 11, kind: input, shape index: {}]   ;;  %s7607_s12 = inlined_call_operand.vmem [shape: f32[4,128,32], index: 12, kind: input, shape index: {}]   ;;  %s7608_s13 = inlined_call_operand.vmem [shape: f32[4,32], index: 13, kind: input, shape index: {}]   ;;  %s7609_s14 = inlined_call_operand.vmem [shape: f32[32,128], index: 14, kind: input, shape index: {}]   ;;  %s7610_s15 = inlined_call_operand.vmem [shape: f32[1,128], index: 15, kind: input, shape index: {}]   ;;  %s7611_s16 = inlined_call_operand.hbm [shape: f32[2,8,128], index: 16, kind: output, shape index: {}]  }
   0x1   :  { %7637 = sst [smem:[#allocation12_spill]] %s7595_s0 }
   0x2   :  { %7638 = sst [smem:[#allocation13_spill]] %s7596_s1 }
   0x3   :  { %7639 = sst [smem:[#allocation14_spill]] %s7597_s2 }
   0x4   :  { %7640 = sst [smem:[#allocation15_spill]] %s7610_s15 }
   0x5   :  { %7641 = sst [smem:[#allocation16_spill]] %s7611_s16 }
   0x6   :  { %21 = vsyncpa [#allocation3], 0 }
   0x7   :  { %23 = vsyncpa [#allocation3 + $0x1], 0  ;;  %s6484_s21 = smov 0   ;;  %s6486_s22 = smov 0  }
   0x8   :  { %s6488_s23 = smov 0   ;;  %s6490_s24 = smov 0  }
   0x9 LB: > { %7642 = sst [smem:[#allocation5_spill]] %s6371_s21  ;;  %s6505_s25 = sadd.s32 4294967295, %s6383_s24   ;;  %s6383_s24 = sphi %s6490_s24, %s7670_s24   ;;  %s6379_s23 = sphi %s6488_s23, %s7672_s23   ;;  %s6375_s22 = sphi %s6486_s22, %s7674_s22   ;;  %s6371_s21 = sphi %s6484_s21, %s7673_s21  }
   0xa   : > { %7643 = sst [smem:[#allocation6_spill]] %s6379_s23  ;;  %s5104_s26 = sadd.s32 4294967294, %s6383_s24  }
   0xb   : > { %7644 = sst [smem:[#allocation7_spill]] %s6383_s24  ;;  %s6509_s27 = sadd.s32 1, %s6383_s24  }
   0xc   : > { %7645 = sst [smem:[#allocation8_spill]] %s6509_s27  ;;  %s377_s28 = sadd.s32 1, %s6379_s23 }
   0xd   : > { %s374_s29 = ssub.s32 %s6383_s24, %s6509_s27  ;;  %p387_p0 = scmp.ne.s32.totalorder %s6379_s23, %s6375_s22 }
   0xe   : > { %p375_p1 = scmp.eq.s32.totalorder %s374_s29, 0  ;;  %p388_p2 = scmp.eq.s32.totalorder %s6505_s25, 1 }
   0xf   : > { %p393_p3 = scmp.ne.s32.totalorder %s6375_s22, %s6371_s21  ;;  %p394_p4 = scmp.eq.s32.totalorder %s5104_s26, 1 }
  0x10   : > { %s6520_s30 = scalar_select %p375_p1, %s6379_s23, %s377_s28  }
  0x11   : > { %p6522_p5 = por %p388_p2, %p387_p0  ;;  %p6526_p6 = por %p394_p4, %p393_p3 }
  0x12   : > { %7646 = sst [smem:[#allocation9_spill]] %s6520_s30  ;;  %p5107_p7 = scmp.ge.s32.totalorder %s6383_s24, 1 }
  0x13   : > { %s7647_s0 = scalar_select %p6522_p5, 1, 0 }
  0x14   : > { %s7649_s17 = scalar_select %p6526_p6, 1, 0 }
  0x15   : > { %7648 = sst [smem:[#allocation10_spill]] %s7647_s0  ;;  %p464_p8 = scmp.lt.s32.totalorder %s6383_s24, 3 }
  0x16   : > { %7650 = sst [smem:[#allocation11_spill]] %s7649_s17 }
  0x17   : > { %p465_p9 = pnand %p5107_p7, %p464_p8 }
  0x18   : > { %p513_p10 = scmp.lt.s32.totalorder (!%p465_p9), %s6505_s25, 1  ;;  %s7651_s1 = sld [smem:[#allocation13_spill]] (!%p465_p9)  ;;  %v6385_v3 = vmov (!%p465_p9), 0   ;;  %v6386_v4 = vmov (!%p465_p9), 0.0|0.0   ;;  %vm6387_vm0 = vmmov (!%p465_p9), 0   ;;  %v6388_v14 = vmov (!%p465_p9), 0.0  }
  0x19   : > { %468 = sbr.rel (%p465_p9) target bundleno = 10996 (0x2af4), region = 84  ;;  %6232 = vset.pattern.permute.xlu0 (!%p465_p9), %v6385_v3  ;;  %5982 = vmatprep.subr.bf16.mxu0 (!%p465_p9), %v6386_v4  ;;  %s7652_s23 = sld [smem:[#allocation12_spill]] (!%p465_p9)  ;;  %v517_v28 = vlaneseq (!%p465_p9)  ;;  %v6389_v31 = vmov (!%p465_p9), 1.0   ;;  %vm618_vm2 = vcmask (!%p465_p9), 261120   ;;  %v642_v42 = vld [vmem:[%s7600_s5] sm:$0xff] (!%p465_p9)  ;;  %v643_v43 = vld [vmem:[%s7600_s5 + $0x8] sm:$0xff] (!%p465_p9) }
  0x1a   : > { %6006 = vmatprep.subr.bf16.mxu1 (!%p465_p9), %v6386_v4  ;;  %5536 = vmatprep.mubr.msk.f32.mxu0 (!%p465_p9), %vm6387_vm0, %v6388_v14  ;;  %s7653_s2 = sld [smem:[#allocation14_spill]] (!%p465_p9)  ;;  %v644_v44 = vld [vmem:[%s7600_s5 + $0x10] sm:$0xff] (!%p465_p9)  ;;  %v6007_v45 = vpack.c.bf16 (!%p465_p9), %v643_v43, %v642_v42  ;;  %v645_v46 = vld [vmem:[%s7600_s5 + $0x18] sm:$0xff] (!%p465_p9)  ;;  %v5112_v52 = vld [vmem:[%s7598_s3] ss:$0 sm:$0xff] (!%p465_p9)  ;;  %s7631_s20 = smov (!%p465_p9), 112  }
  0x1b   : > { %5547 = vmatprep.mubr.msk.f32.mxu1 (!%p465_p9), %vm6387_vm0, %v6388_v14  ;;  %v6600_v29 = vand.u32 (!%p465_p9), 127, %v517_v28  ;;  %v6010_v47 = vpack.c.bf16 (!%p465_p9), %v645_v46, %v644_v44  ;;  %v5113_v54 = vld [vmem:[%s7599_s4] ss:$0 sm:$0xff] (!%p465_p9)  ;;  %s7627_s26 = smov (!%p465_p9), 104   ;;  %s7619_s27 = smov (!%p465_p9), 96   ;;  %vm735_vm3 = vcmask (!%p465_p9), 64512  }
  0x1c   : > { %6008 = vmatpush3.bf16.msra.mxu1 (!%p465_p9), %v6007_v45  ;;  %s7617_s17 = smov (!%p465_p9), 64   ;;  %s7625_s21 = smov (!%p465_p9), 8   ;;  %vm1409_vm5 = vcmask (!%p465_p9), 130048   ;;  %vm1411_vm6 = vcmask (!%p465_p9), 195584  }
  0x1d   : > { %6009 = vmatprep.subr.bf16.mxu1 (!%p465_p9), %v6386_v4  ;;  %s7621_s28 = smov (!%p465_p9), 24   ;;  %s7658_s29 = smov (!%p465_p9), 64  }
  0x1e   : > { %v526_v0 = vld [vmem:[%s7651_s1] sm:$0xff] (!%p465_p9)  ;;  %v527_v1 = vld [vmem:[%s7651_s1 + $0x8] sm:$0xff] (!%p465_p9)  ;;  %v528_v2 = vld [vmem:[%s7651_s1 + $0x10] sm:$0xff] (!%p465_p9)  ;;  %s7663_s24 = smov (!%p465_p9), 120  }
  0x1f   : > { %v5983_v5 = vpack.c.bf16 (!%p465_p9), %v527_v1, %v526_v0  ;;  %v529_v6 = vld [vmem:[%s7651_s1 + $0x18] sm:$0xff] (!%p465_p9)  ;;  %v530_v8 = vld [vmem:[%s7651_s1 + $0x20] sm:$0xff] (!%p465_p9)  ;;  %v531_v9 = vld [vmem:[%s7651_s1 + $0x28] sm:$0xff] (!%p465_p9) }
  0x20   : > { %s514_s18 = scalar_select %p513_p10, %s6505_s25, 1  ;;  %v5986_v7 = vpack.c.bf16 %v529_v6, %v528_v2  ;;  %v5989_v11 = vpack.c.bf16 %v531_v9, %v530_v8  ;;  %v532_v12 = vld [vmem:[%s7651_s1 + $0x30] sm:$0xff]  ;;  %v533_v13 = vld [vmem:[%s7651_s1 + $0x38] sm:$0xff]  ;;  %v534_v16 = vld [vmem:[%s7651_s1 + $0x40] sm:$0xff]  ;;  %6011 = vmatpush3.bf16.msra.mxu1 %v6010_v47 }
  0x21   : > { %5984 = vmatpush3.bf16.msra.mxu0 %v5983_v5  ;;  %v5992_v15 = vpack.c.bf16 %v533_v13, %v532_v12  ;;  %v535_v17 = vld [vmem:[%s7651_s1 + $0x48] sm:$0xff]  ;;  %v536_v19 = vld [vmem:[%s7651_s1 + $0x50] sm:$0xff]  ;;  %v537_v20 = vld [vmem:[%s7651_s1 + $0x58] sm:$0xff]  ;;  %5550 = vmatprep.subr.mxu1 %v6388_v14 }
  0x22   : > { %s5109_s19 = sshll.u32 %s514_s18, 3  ;;  %5985 = vmatprep.subr.bf16.mxu0 %v6386_v4  ;;  %v5995_v18 = vpack.c.bf16 %v535_v17, %v534_v16  ;;  %v5998_v21 = vpack.c.bf16 %v537_v20, %v536_v19  ;;  %v538_v22 = vld [vmem:[%s7651_s1 + $0x60] sm:$0xff]  ;;  %v539_v23 = vld [vmem:[%s7651_s1 + $0x68] sm:$0xff]  ;;  %v540_v25 = vld [vmem:[%s7651_s1 + $0x70] sm:$0xff]  ;;  %s7629_s18 = smov 120  }
  0x23   : > { %s516_s30 = scalar_lea.vmem %s7652_s23, %s5109_s19  ;;  %v6001_v24 = vpack.c.bf16 %v539_v23, %v538_v22  ;;  %v541_v26 = vld [vmem:[%s7651_s1 + $0x78] sm:$0xff]  ;;  %v542_v32 = vld [vmem:[%s7653_s2] sm:$0xff]  ;;  %s7623_s19 = smov 16  }
  0x24   : > { %v519_v10 = vld [vmem:[%s516_s30] sm:$0xff]  ;;  %v6004_v27 = vpack.c.bf16 %v541_v26, %v540_v25  ;;  %s7659_s23 = smov 8   ;;  %s7660_s30 = smov 16  }
  0x25   : > { %521 = vperm.xlu0 %6232, %v519_v10   ;;  %5987 = vmatpush3.bf16.msra.mxu0 %v5986_v7  ;;  %v614_v7 = vshrl.u32 %v517_v28, 7  ;;  %s7662_s2 = smov 112  }
  0x26   : > { %5988 = vmatprep.subr.bf16.mxu0 %v6386_v4 }
  0x27   : > { %vm6685_vm4 = vcmp.le.s32.totalorder %v6600_v29, %v614_v7 }
  0x29   : > { %5990 = vmatpush3.bf16.msra.mxu0 %v5989_v11 }
  0x2a   : > { %5991 = vmatprep.subr.bf16.mxu0 %v6386_v4 }
  0x2d   : > { %5993 = vmatpush3.bf16.msra.mxu0 %v5992_v15 }
  0x2e   : > { %5994 = vmatprep.subr.bf16.mxu0 %v6386_v4 }
  0x31   : > { %5996 = vmatpush3.bf16.msra.mxu0 %v5995_v18 }
  0x32   : > { %5997 = vmatprep.subr.bf16.mxu0 %v6386_v4 }
  0x35   : > { %5999 = vmatpush3.bf16.msra.mxu0 %v5998_v21 }
  0x36   : > { %6000 = vmatprep.subr.bf16.mxu0 %v6386_v4 }
  0x39   : > { %6002 = vmatpush3.bf16.msra.mxu0 %v6001_v24 }
  0x3a   : > { %6003 = vmatprep.subr.bf16.mxu0 %v6386_v4 }
  0x3d   : > { %6005 = vmatpush3.bf16.msra.mxu0 %v6004_v27 }
  0x3e   : > { %6024 = vmatprep.subr.bf16.mxu0 %v6386_v4 }
  0xa4   : > { %v522_v30 = vpop.permute.xlu0 %521 }
  0xa5   : > { %vm523_vm1 = vcmp.eq.s32.totalorder %v6600_v29, %v522_v30 }
  0xa6   : > { %5537 = vmatmul.mubr.msk.f32.vlgmr.msra.gmra.mrb[0].mxu0 %vm523_vm1, %v6389_v31 }
  0xa7   : > { %5644 = vmatprep.mubr.msk.f32.mxu0 %vm6387_vm0, %v6388_v14 }
 0x179   : > { %v609_v33 = vpop.f32.mrb[0].mxu0 }
 0x17a   : > { %v6608_v34 = vadd.f32 %v609_v33, %v542_v32  ;;  %v5538_v35 = vpop.f32.mrb[1].mxu0 }
 0x17c   : > { %v619_v36 = vsel %vm618_vm2, %v6608_v34, 0.0 }
 0x17d   : > { %620 = vadd.xlane.f32.xlu0 %v619_v36 }
 0x20a   : > { %v621_v37 = vpop.xlane.xlu0 %620 }
 0x20b   : > { %v622_v38 = vmul.f32 0.03125, %v621_v37 }
 0x20d   : > { %v623_v39 = vsub.f32 %v6608_v34, %v622_v38 }
 0x20f   : > { %v624_v40 = vmul.f32 %v623_v39, %v623_v39 }
 0x211   : > { %v625_v41 = vsel %vm618_vm2, %v624_v40, 0.0 }
 0x212   : > { %626 = vadd.xlane.f32.xlu1 %v625_v41 }
 0x29f   : > { %v627_v48 = vpop.xlane.xlu1 %626 }
 0x2a0   : > { %v628_v49 = vmul.f32 0.03125, %v627_v48 }
 0x2a2   : > { %v629_v50 = vadd.f32 1e-05, %v628_v49 }
 0x2a4   : > { %6233 = vrsqrt.f32 %v629_v50 }
 0x2ae   : > { %v6234_v51 = vpop.eup %6233 }
 0x2af   : > { %v631_v53 = vmul.f32 %v6234_v51, %v623_v39 }
 0x2b1   : > { %v636_v55 = vmul.f32 %v5112_v52, %v631_v53 }
 0x2b3   : > { %v641_v56 = vadd.f32 %v5113_v54, %v636_v55 }
 0x2b5   : > { %5548 = vmatmul.mubr.msk.f32.vlgmr.msra.gmra.mrb[0].mxu1 %vm618_vm2, %v641_v56 }
 0x2b6   : > { %5552 = vmatprep.mubr.msk.f32.mxu1 %vm6387_vm0, %v6388_v14 }
 0x388   : > { %v6637_v57 = vpop.f32.mrb[0].mxu1 }
 0x389   : > { %720 = vrot.lane.b32.xlu1 %v6637_v57, %s7629_s18  ;;  %v5549_v58 = vpop.f32.mrb[1].mxu1  ;;  %v729_v63 = vmul.f32 0.17677669, %v6637_v57 }
 0x38d   : > { %723 = vrot.lane.b32.xlu1 %v6637_v57, %s7631_s20 }
 0x391   : > { %726 = vrot.lane.b32.xlu1 %v6637_v57, %s7627_s26 }
 0x395   : > { %733 = vrot.lane.b32.xlu1 %v6637_v57, %s7619_s27 }
 0x3fb   : > { %v6647_v59 = vpop.permute.xlu1 %720 }
 0x3fc   : > { %811 = vrot.lane.b32.xlu1 %v6647_v59, %s7619_s27  ;;  %v730_v1 = vmul.f32 0.17677669, %v6647_v59 }
 0x3ff   : > { %v6651_v60 = vpop.permute.xlu1 %723 }
 0x400   : > { %888 = vrot.lane.b32.xlu0 %v6651_v60, %s7619_s27  ;;  %v731_v3 = vmul.f32 0.17677669, %v6651_v60 }
 0x403   : > { %v6655_v61 = vpop.permute.xlu1 %726 }
 0x404   : > { %965 = vrot.lane.b32.xlu1 %v6655_v61, %s7619_s27  ;;  %v732_v6 = vmul.f32 0.17677669, %v6655_v61  ;;  %s7661_s27 = smov 24  }
 0x407   : > { %v734_v62 = vpop.permute.xlu1 %733 }
 0x408   : > { %5551 = vmatpush3.xpose.msk.msra.mxu1 %vm735_vm3, %v734_v62 }
 0x409   : > { %5555 = vmatprep.subr.mxu1 %v6388_v14 }
 0x40b   : > { %5553 = vmatmul.mubr.msk.f32.vlgmr.msra.gmra.mrb[2].mxu1 %vm735_vm3, %v729_v63 }
 0x40c   : > { %5557 = vmatprep.mubr.msk.f32.mxu1 %vm6387_vm0, %v6388_v14 }
 0x46e   : > { %v812_v0 = vpop.permute.xlu1 %811 }
 0x46f   : > { %5556 = vmatpush3.xpose.msk.msra.mxu1 %vm735_vm3, %v812_v0 }
 0x470   : > { %5560 = vmatprep.subr.mxu1 %v6388_v14 }
 0x472   : > { %v889_v2 = vpop.permute.xlu0 %888  ;;  %5558 = vmatmul.mubr.msk.f32.vlgmr.msra.gmra.mrb[4].mxu1 %vm735_vm3, %v730_v1  ;;  %v1413_v1 = vld [vmem:[%s7601_s6] sm:$0xff] }
 0x473   : > { %5561 = vmatpush3.xpose.msk.msra.mxu1 %vm735_vm3, %v889_v2  ;;  %5562 = vmatprep.mubr.msk.f32.mxu1 %vm6387_vm0, %v6388_v14  ;;  %v1414_v2 = vld [vmem:[%s7601_s6 + $0x8] sm:$0xff] }
 0x474   : > { %5565 = vmatprep.subr.mxu1 %v6388_v14 }
 0x476   : > { %v966_v5 = vpop.permute.xlu1 %965  ;;  %5563 = vmatmul.mubr.msk.f32.vlgmr.msra.gmra.mrb[6].mxu1 %vm735_vm3, %v731_v3  ;;  %v6013_v3 = vpack.c.bf16 %v1414_v2, %v1413_v1  ;;  %v1620_v2 = vld [vmem:[%s7607_s12 + $0x60] sm:$0xff] }
 0x477   : > { %5566 = vmatpush3.xpose.msk.msra.mxu1 %vm735_vm3, %v966_v5  ;;  %5567 = vmatprep.mubr.msk.f32.mxu1 %vm6387_vm0, %v6388_v14  ;;  %v1415_v5 = vld [vmem:[%s7601_s6 + $0x10] sm:$0xff] }
 0x478   : > { %5570 = vmatprep.subr.mxu1 %v6388_v14 }
 0x47a   : > { %5568 = vmatmul.mubr.msk.f32.vlgmr.msra.gmra.mrb[8].mxu1 %vm735_vm3, %v732_v6  ;;  %v1416_v6 = vld [vmem:[%s7601_s6 + $0x18] sm:$0xff] }
 0x47b   : > { %5572 = vmatprep.mubr.msk.f32.mxu1 %vm6387_vm0, %v6388_v14  ;;  %v6016_v7 = vpack.c.bf16 %v1416_v6, %v1415_v5  ;;  %v1622_v6 = vld [vmem:[%s7607_s12 + $0x70] sm:$0xff] }
 0x4de   : > { %v807_v9 = vpop.f32.mrb[2].mxu1 }
 0x4df   : > { %v1044_v10 = vsel %vm6685_vm4, %v807_v9, -1e+30  ;;  %v5554_v11 = vpop.f32.mrb[3].mxu1 }
 0x4e0   : > { %v1048_v12 = vsel %vm735_vm3, %v1044_v10, -inf }
 0x4e1   : > { %1049 = vmax.xlane.f32.xlu1 %v1048_v12 }
 0x545   : > { %v884_v13 = vpop.f32.mrb[4].mxu1 }
 0x546   : > { %v1045_v15 = vsel %vm6685_vm4, %v884_v13, -1e+30  ;;  %v5559_v16 = vpop.f32.mrb[5].mxu1 }
 0x547   : > { %v1051_v17 = vsel %vm735_vm3, %v1045_v15, -inf }
 0x548   : > { %1052 = vmax.xlane.f32.xlu0 %v1051_v17 }
 0x549   : > { %v961_v18 = vpop.f32.mrb[6].mxu1 }
 0x54a   : > { %v1046_v19 = vsel %vm6685_vm4, %v961_v18, -1e+30  ;;  %v5564_v20 = vpop.f32.mrb[7].mxu1 }
 0x54b   : > { %v1054_v21 = vsel %vm735_vm3, %v1046_v19, -inf }
 0x54c   : > { %1055 = vmax.xlane.f32.xlu1 %v1054_v21 }
 0x54d   : > { %v1038_v22 = vpop.f32.mrb[8].mxu1 }
 0x54e   : > { %v1047_v23 = vsel %vm6685_vm4, %v1038_v22, -1e+30  ;;  %v5569_v24 = vpop.f32.mrb[9].mxu1  ;;  %v5127_v22 = vld [vmem:[%s7602_s7] ss:$0 sm:$0xff] }
 0x54f   : > { %v1057_v25 = vsel %vm735_vm3, %v1047_v23, -inf }
 0x550   : > { %1058 = vmax.xlane.f32.xlu1 %v1057_v25 }
 0x561   : > { %1092 = vrot.lane.b32.xlu1 %v6637_v57, %s7617_s17 }
 0x56e   : > { %v1050_v26 = vpop.xlane.xlu1 %1049 }
 0x56f   : > { %v1060_v27 = vsub.f32 %v1044_v10, %v1050_v26 }
 0x571   : > { %v1064_v28 = vmul.f32 1.442695, %v1060_v27 }
 0x573   : > { %6235 = vpow2.f32 %v1064_v28 }
 0x57d   : > { %v6236_v29 = vpop.eup %6235 }
 0x57e   : > { %v1072_v30 = vsel %vm735_vm3, %v6236_v29, 0.0 }
 0x585   : > { %1073 = vadd.xlane.f32.xlu1 %v1072_v30 }
 0x5d5   : > { %v1053_v31 = vpop.xlane.xlu0 %1052 }
 0x5d6   : > { %v1061_v32 = vsub.f32 %v1045_v15, %v1053_v31 }
 0x5d8   : > { %v1066_v33 = vmul.f32 1.442695, %v1061_v32 }
 0x5d9   : > { %v1056_v35 = vpop.xlane.xlu1 %1055 }
 0x5da   : > { %6237 = vpow2.f32 %v1066_v33  ;;  %v1062_v36 = vsub.f32 %v1046_v19, %v1056_v35  ;;  %v1521_v33 = vld [vmem:[%s7605_s10] sm:$0xff] }
 0x5dc   : > { %v1068_v37 = vmul.f32 1.442695, %v1062_v36  ;;  %v1523_v36 = vld [vmem:[%s7605_s10 + $0x10] sm:$0xff] }
 0x5dd   : > { %v1059_v38 = vpop.xlane.xlu1 %1058 }
 0x5de   : > { %6239 = vpow2.f32 %v1068_v37  ;;  %v1063_v39 = vsub.f32 %v1047_v23, %v1059_v38  ;;  %v1524_v37 = vld [vmem:[%s7605_s10 + $0x18] sm:$0xff] }
 0x5df   : > { %v6022_v38 = vpack.c.bf16 %v1524_v37, %v1523_v36 }
 0x5e0   : > { %v1070_v40 = vmul.f32 1.442695, %v1063_v39  ;;  %v1608_v39 = vld [vmem:[%s7607_s12] sm:$0xff] }
 0x5e1   : > { %v1093_v41 = vpop.permute.xlu1 %1092 }
 0x5e2   : > { %6241 = vpow2.f32 %v1070_v40  ;;  %5571 = vmatpush3.msra.mxu1 %v1093_v41  ;;  %v1609_v40 = vld [vmem:[%s7607_s12 + $0x8] sm:$0xff]  ;;  %v1610_v41 = vld [vmem:[%s7607_s12 + $0x10] sm:$0xff] }
 0x5e3   : > { %5575 = vmatprep.subr.mxu1 %v6388_v14 }
 0x5e4   : > { %v6238_v42 = vpop.eup %6237 }
 0x5e5   : > { %v1075_v43 = vsel %vm735_vm3, %v6238_v42, 0.0 }
 0x5e6   : > { %1076 = vadd.xlane.f32.xlu0 %v1075_v43  ;;  %v1611_v43 = vld [vmem:[%s7607_s12 + $0x18] sm:$0xff] }
 0x5e8   : > { %v6240_v44 = vpop.eup %6239 }
 0x5e9   : > { %v1078_v45 = vsel %vm735_vm3, %v6240_v44, 0.0 }
 0x5ea   : > { %1079 = vadd.xlane.f32.xlu1 %v1078_v45  ;;  %v1612_v45 = vld [vmem:[%s7607_s12 + $0x20] sm:$0xff] }
 0x5ec   : > { %v6242_v46 = vpop.eup %6241 }
 0x5ed   : > { %v1081_v47 = vsel %vm735_vm3, %v6242_v46, 0.0 }
 0x5ee   : > { %1082 = vadd.xlane.f32.xlu0 %v1081_v47 }
 0x5fb   : > { %1244 = vrot.lane.b32.xlu1 %v6651_v60, %s7617_s17 }
 0x5ff   : > { %1320 = vrot.lane.b32.xlu1 %v6655_v61, %s7617_s17 }
 0x604   : > { %1168 = vrot.lane.b32.xlu0 %v6647_v59, %s7617_s17 }
 0x612   : > { %v1074_v48 = vpop.xlane.xlu1 %1073 }
 0x613   : > { %6243 = vrcp.f32 %v1074_v48 }
 0x61d   : > { %v6244_v49 = vpop.eup %6243 }
 0x61e   : > { %v1088_v50 = vmul.f32 %v6244_v49, %v6236_v29 }
 0x620   : > { %5573 = vmatmul.mubr.msk.f32.vlgmr.msra.gmra.mrb[10].mxu1 %vm735_vm3, %v1088_v50 }
 0x621   : > { %5577 = vmatprep.mubr.msk.f32.mxu1 %vm6387_vm0, %v6388_v14 }
 0x673   : > { %v1077_v51 = vpop.xlane.xlu0 %1076 }
 0x674   : > { %6245 = vrcp.f32 %v1077_v51 }
 0x677   : > { %v1080_v52 = vpop.xlane.xlu1 %1079 }
 0x678   : > { %6247 = vrcp.f32 %v1080_v52  ;;  %v5129_v52 = vld [vmem:[%s7603_s8] ss:$0 sm:$0xff] }
 0x67b   : > { %v1083_v53 = vpop.xlane.xlu0 %1082  ;;  %v1245_v56 = vpop.permute.xlu1 %1244 }
 0x67c   : > { %6249 = vrcp.f32 %v1083_v53 }
 0x67e   : > { %v6246_v54 = vpop.eup %6245 }
 0x67f   : > { %v1089_v55 = vmul.f32 %v6246_v54, %v6238_v42  ;;  %v1169_v57 = vpop.permute.xlu0 %1168  ;;  %v1321_v60 = vpop.permute.xlu1 %1320  ;;  %v6025_v42 = vpack.c.bf16 %v1609_v40, %v1608_v39  ;;  %v5130_v54 = vld [vmem:[%s7604_s9] ss:$0 sm:$0xff] }
 0x680   : > { %5576 = vmatpush3.msra.mxu1 %v1169_v57  ;;  %v1614_v57 = vld [vmem:[%s7607_s12 + $0x30] sm:$0xff] }
 0x681   : > { %5578 = vmatmul.mubr.msk.f32.vlgmr.msra.gmra.mrb[12].mxu1 %vm735_vm3, %v1089_v55  ;;  %5580 = vmatprep.subr.mxu1 %v6388_v14 }
 0x682   : > { %v6248_v58 = vpop.eup %6247  ;;  %5581 = vmatpush3.msra.mxu1 %v1245_v56  ;;  %5582 = vmatprep.mubr.msk.f32.mxu1 %vm6387_vm0, %v6388_v14 }
 0x683   : > { %v1090_v59 = vmul.f32 %v6248_v58, %v6240_v44  ;;  %5585 = vmatprep.subr.mxu1 %v6388_v14  ;;  %6026 = vmatpush3.bf16.msra.mxu0 %v6025_v42  ;;  %v6028_v44 = vpack.c.bf16 %v1611_v43, %v1610_v41  ;;  %v1615_v58 = vld [vmem:[%s7607_s12 + $0x38] sm:$0xff]  ;;  %v5134_v41 = vld [vmem:[%s7598_s3 + $0x1] ss:$0 sm:$0xff] }
 0x684   : > { %6027 = vmatprep.subr.bf16.mxu0 %v6386_v4  ;;  %v5135_v43 = vld [vmem:[%s7599_s4 + $0x1] ss:$0 sm:$0xff] }
 0x685   : > { %5583 = vmatmul.mubr.msk.f32.vlgmr.msra.gmra.mrb[14].mxu1 %vm735_vm3, %v1090_v59  ;;  %v6034_v59 = vpack.c.bf16 %v1615_v58, %v1614_v57 }
 0x686   : > { %v6250_v61 = vpop.eup %6249  ;;  %5586 = vmatpush3.msra.mxu1 %v1321_v60  ;;  %5587 = vmatprep.mubr.msk.f32.mxu1 %vm6387_vm0, %v6388_v14  ;;  %v1616_v60 = vld [vmem:[%s7607_s12 + $0x40] sm:$0xff] }
 0x687   : > { %v1091_v62 = vmul.f32 %v6250_v61, %v6242_v46  ;;  %6012 = vmatprep.subr.bf16.mxu1 %v6386_v4  ;;  %v1613_v46 = vld [vmem:[%s7607_s12 + $0x28] sm:$0xff]  ;;  %6029 = vmatpush3.bf16.msra.mxu0 %v6028_v44 }
 0x688   : > { %v6031_v47 = vpack.c.bf16 %v1613_v46, %v1612_v45  ;;  %6030 = vmatprep.subr.bf16.mxu0 %v6386_v4  ;;  %v1617_v61 = vld [vmem:[%s7607_s12 + $0x48] sm:$0xff] }
 0x689   : > { %5588 = vmatmul.mubr.msk.f32.vlgmr.msra.gmra.mrb[16].mxu1 %vm735_vm3, %v1091_v62  ;;  %v6037_v62 = vpack.c.bf16 %v1617_v61, %v1616_v60 }
 0x68a   : > { %5598 = vmatprep.mubr.msk.f32.mxu1 %vm6387_vm0, %v6388_v14  ;;  %6014 = vmatpush3.bf16.msra.mxu1 %v6013_v3  ;;  %v1621_v3 = vld [vmem:[%s7607_s12 + $0x68] sm:$0xff] }
 0x68b   : > { %6015 = vmatprep.subr.bf16.mxu1 %v6386_v4  ;;  %6032 = vmatpush3.bf16.msra.mxu0 %v6031_v47  ;;  %v6043_v5 = vpack.c.bf16 %v1621_v3, %v1620_v2 }
 0x68c   : > { %6033 = vmatprep.subr.bf16.mxu0 %v6386_v4 }
 0x68e   : > { %6017 = vmatpush3.bf16.msra.mxu1 %v6016_v7  ;;  %v1623_v7 = vld [vmem:[%s7607_s12 + $0x78] sm:$0xff] }
 0x68f   : > { %6018 = vmatprep.subr.bf16.mxu1 %v6386_v4  ;;  %6035 = vmatpush3.bf16.msra.mxu0 %v6034_v59 }
 0x690   : > { %6036 = vmatprep.subr.bf16.mxu0 %v6386_v4 }
 0x693   : > { %6038 = vmatpush3.bf16.msra.mxu0 %v6037_v62 }
 0x694   : > { %6039 = vmatprep.subr.bf16.mxu0 %v6386_v4 }
 0x6f3   : > { %v1164_v63 = vpop.f32.mrb[10].mxu1 }
 0x6f4   : > { %v5574_v0 = vpop.f32.mrb[11].mxu1 }
 0x6f5   : > { %v1619_v0 = vld [vmem:[%s7607_s12 + $0x58] sm:$0xff] }
 0x754   : > { %v1240_v9 = vpop.f32.mrb[12].mxu1 }
 0x755   : > { %1397 = vrot.lane.b32.xlu0 %v1240_v9, %s7625_s21  ;;  %v5579_v10 = vpop.f32.mrb[13].mxu1  ;;  %v6046_v9 = vpack.c.bf16 %v1623_v7, %v1622_v6  ;;  %s7656_s21 = smov 104  }
 0x756   : > { %v5131_v10 = vld [vmem:[%s7606_s11] ss:$0 sm:$0xff] }
 0x758   : > { %v1316_v11 = vpop.f32.mrb[14].mxu1 }
 0x759   : > { %1401 = vrot.lane.b32.xlu1 %v1316_v11, %s7623_s19  ;;  %v5584_v12 = vpop.f32.mrb[15].mxu1  ;;  %s7657_s19 = smov 96  }
 0x75c   : > { %v1392_v13 = vpop.f32.mrb[16].mxu1 }
 0x75d   : > { %1405 = vrot.lane.b32.xlu0 %v1392_v13, %s7621_s28  ;;  %v5589_v15 = vpop.f32.mrb[17].mxu1 }
 0x7c7   : > { %v1398_v16 = vpop.permute.xlu0 %1397 }
 0x7c8   : > { %v1408_v18 = vsel %vm735_vm3, %v1164_v63, %v1398_v16  ;;  %v1618_v63 = vld [vmem:[%s7607_s12 + $0x50] sm:$0xff] }
 0x7c9   : > { %v6040_v1 = vpack.c.bf16 %v1619_v0, %v1618_v63 }
 0x7cb   : > { %v1402_v17 = vpop.permute.xlu1 %1401  ;;  %6041 = vmatpush3.bf16.msra.mxu0 %v6040_v1 }
 0x7cc   : > { %v1410_v19 = vsel %vm1409_vm5, %v1408_v18, %v1402_v17  ;;  %6042 = vmatprep.subr.bf16.mxu0 %v6386_v4 }
 0x7cf   : > { %v1406_v20 = vpop.permute.xlu0 %1405  ;;  %6044 = vmatpush3.bf16.msra.mxu0 %v6043_v5 }
 0x7d0   : > { %v1412_v21 = vsel %vm1411_vm6, %v1410_v19, %v1406_v20  ;;  %6045 = vmatprep.subr.bf16.mxu0 %v6386_v4  ;;  %v5133_v20 = vld [vmem:[%s7608_s13] ss:$0 sm:$0xff] }
 0x7d1   : > { %5599 = vmatmul.mubr.msk.f32.vlgmr.msra.gmra.mrb[18].mxu1 %vm618_vm2, %v1412_v21 }
 0x7d2   : > { %5609 = vmatprep.mubr.msk.f32.mxu1 %vm6387_vm0, %v6388_v14 }
 0x7d3   : > { %6047 = vmatpush3.bf16.msra.mxu0 %v6046_v9 }
 0x7d4   : > { %5688 = vmatprep.subr.mxu0 %v6388_v14 }
 0x8a4   : > { %v1491_v23 = vpop.f32.mrb[18].mxu1 }
 0x8a5   : > { %v1492_v24 = vadd.f32 %v5127_v22, %v1491_v23  ;;  %v5600_v25 = vpop.f32.mrb[19].mxu1 }
 0x8a7   : > { %v6756_v26 = vadd.f32 %v1492_v24, %v6608_v34  ;;  %v1522_v34 = vld [vmem:[%s7605_s10 + $0x8] sm:$0xff] }
 0x8a8   : > { %v6019_v35 = vpack.c.bf16 %v1522_v34, %v1521_v33  ;;  %v5138_v34 = vld [vmem:[%s7600_s5 + $0x30] sm:$0xff] }
 0x8a9   : > { %v1498_v27 = vsel %vm618_vm2, %v6756_v26, 0.0 }
 0x8aa   : > { %1499 = vadd.xlane.f32.xlu1 %v1498_v27  ;;  %6020 = vmatpush3.bf16.msra.mxu1 %v6019_v35  ;;  %v5139_v35 = vld [vmem:[%s7600_s5 + $0x38] sm:$0xff] }
 0x8ab   : > { %6021 = vmatprep.subr.bf16.mxu1 %v6386_v4  ;;  %v6052_v36 = vpack.c.bf16 %v5139_v35, %v5138_v34 }
 0x8ae   : > { %6023 = vmatpush3.bf16.msra.mxu1 %v6022_v38 }
 0x8af   : > { %6048 = vmatprep.subr.bf16.mxu1 %v6386_v4 }
 0x937   : > { %v1500_v28 = vpop.xlane.xlu1 %1499 }
 0x938   : > { %v1501_v29 = vmul.f32 0.03125, %v1500_v28 }
 0x93a   : > { %v1502_v30 = vsub.f32 %v6756_v26, %v1501_v29 }
 0x93c   : > { %v1503_v31 = vmul.f32 %v1502_v30, %v1502_v30 }
 0x93e   : > { %v1504_v32 = vsel %vm618_vm2, %v1503_v31, 0.0 }
 0x93f   : > { %1505 = vadd.xlane.f32.xlu0 %v1504_v32  ;;  %v5136_v32 = vld [vmem:[%s7600_s5 + $0x20] sm:$0xff] }
 0x9cc   : > { %v1506_v48 = vpop.xlane.xlu0 %1505 }
 0x9cd   : > { %v1507_v49 = vmul.f32 0.03125, %v1506_v48 }
 0x9cf   : > { %v1508_v50 = vadd.f32 1e-05, %v1507_v49 }
 0x9d1   : > { %6251 = vrsqrt.f32 %v1508_v50 }
 0x9db   : > { %v6252_v51 = vpop.eup %6251 }
 0x9dc   : > { %v1510_v53 = vmul.f32 %v6252_v51, %v1502_v30 }
 0x9de   : > { %v1515_v55 = vmul.f32 %v5129_v52, %v1510_v53 }
 0x9e0   : > { %v1520_v56 = vadd.f32 %v5130_v54, %v1515_v55 }
 0x9e2   : > { %5610 = vmatmul.mubr.msk.f32.vlgmr.msra.gmra.mrb[20].mxu1 %vm618_vm2, %v1520_v56 }
 0x9e3   : > { %5655 = vmatprep.mubr.msk.f32.mxu1 %vm6387_vm0, %v6388_v14 }
 0xab5   : > { %v1599_v11 = vpop.f32.mrb[20].mxu1 }
 0xab6   : > { %v1600_v12 = vadd.f32 %v5131_v10, %v1599_v11  ;;  %v5611_v13 = vpop.f32.mrb[21].mxu1 }
 0xab8   : > { %v1604_v15 = vmul.f32 0.70710677, %v1600_v12  ;;  %v1603_v17 = vmul.f32 0.5, %v1600_v12 }
 0xaba   : > { %6253 = verf.f32 %v1604_v15 }
 0xac4   : > { %v6254_v16 = vpop.eup %6253 }
 0xac5   : > { %v1606_v18 = vadd.f32 1.0, %v6254_v16 }
 0xac7   : > { %v1607_v19 = vmul.f32 %v1606_v18, %v1603_v17 }
 0xac9   : > { %5645 = vmatmul.mubr.f32.vlgmr.msra.gmra.mrb[2].mxu0 %v1607_v19 }
 0xaca   : > { %5690 = vmatprep.mubr.msk.f32.mxu0 %vm6387_vm0, %v6388_v14 }
 0xb9c   : > { %v1695_v21 = vpop.f32.mrb[2].mxu0 }
 0xb9d   : > { %v1696_v22 = vadd.f32 %v5133_v20, %v1695_v21  ;;  %v5646_v23 = vpop.f32.mrb[3].mxu0 }
 0xb9f   : > { %v6850_v24 = vadd.f32 %v1696_v22, %v6756_v26  ;;  %v5137_v26 = vld [vmem:[%s7600_s5 + $0x28] sm:$0xff] }
 0xba0   : > { %v6049_v33 = vpack.c.bf16 %v5137_v26, %v5136_v32 }
 0xba1   : > { %v1702_v25 = vsel %vm618_vm2, %v6850_v24, 0.0 }
 0xba2   : > { %1703 = vadd.xlane.f32.xlu0 %v1702_v25  ;;  %6050 = vmatpush3.bf16.msra.mxu1 %v6049_v33 }
 0xba3   : > { %6051 = vmatprep.subr.bf16.mxu1 %v6386_v4 }
 0xba6   : > { %6053 = vmatpush3.bf16.msra.mxu1 %v6052_v36 }
 0xba7   : > { %5658 = vmatprep.subr.mxu1 %v6388_v14 }
 0xc2f   : > { %v1704_v27 = vpop.xlane.xlu0 %1703 }
 0xc30   : > { %v1705_v28 = vmul.f32 0.03125, %v1704_v27 }
 0xc32   : > { %v1706_v29 = vsub.f32 %v6850_v24, %v1705_v28 }
 0xc34   : > { %v1707_v30 = vmul.f32 %v1706_v29, %v1706_v29 }
 0xc36   : > { %v1708_v31 = vsel %vm618_vm2, %v1707_v30, 0.0 }
 0xc37   : > { %1709 = vadd.xlane.f32.xlu1 %v1708_v31 }
 0xcc4   : > { %v1710_v37 = vpop.xlane.xlu1 %1709 }
 0xcc5   : > { %v1711_v38 = vmul.f32 0.03125, %v1710_v37 }
 0xcc7   : > { %v1712_v39 = vadd.f32 1e-05, %v1711_v38 }
 0xcc9   : > { %6255 = vrsqrt.f32 %v1712_v39 }
 0xcd3   : > { %v6256_v40 = vpop.eup %6255 }
 0xcd4   : > { %v1714_v42 = vmul.f32 %v6256_v40, %v1706_v29 }
 0xcd6   : > { %v1719_v44 = vmul.f32 %v5134_v41, %v1714_v42 }
 0xcd8   : > { %v1724_v45 = vadd.f32 %v5135_v43, %v1719_v44 }
 0xcda   : > { %5656 = vmatmul.mubr.msk.f32.vlgmr.msra.gmra.mrb[22].mxu1 %vm618_vm2, %v1724_v45 }
 0xcdb   : > { %5660 = vmatprep.mubr.msk.f32.mxu1 %vm6387_vm0, %v6388_v14 }
 0xdad   : > { %v1799_v46 = vpop.f32.mrb[22].mxu1 }
 0xdae   : > { %1807 = vrot.lane.b32.xlu1 %v1799_v46, %s7631_s20  ;;  %1804 = vrot.lane.b32.xlu0 %v1799_v46, %s7629_s18  ;;  %v5657_v47 = vpop.f32.mrb[23].mxu1  ;;  %v1813_v52 = vmul.f32 0.17677669, %v1799_v46  ;;  %s510_s20 = sand.u32 1, %s6375_s22  }
 0xdaf   : > { %s5032_s17 = scalar_lea.sflag [#allocation3], %s510_s20 }
 0xdb2   : > { %1810 = vrot.lane.b32.xlu1 %v1799_v46, %s7656_s21  ;;  %1817 = vrot.lane.b32.xlu0 %v1799_v46, %s7657_s19 }
 0xe20   : > { %v6883_v48 = vpop.permute.xlu1 %1807  ;;  %v6885_v49 = vpop.permute.xlu0 %1804 }
 0xe21   : > { %1971 = vrot.lane.b32.xlu0 %v6883_v48, %s7657_s19  ;;  %1894 = vrot.lane.b32.xlu1 %v6885_v49, %s7657_s19  ;;  %v1814_v54 = vmul.f32 0.17677669, %v6885_v49  ;;  %v1815_v56 = vmul.f32 0.17677669, %v6883_v48 }
 0xe24   : > { %v6891_v50 = vpop.permute.xlu1 %1810  ;;  %v1818_v51 = vpop.permute.xlu0 %1817 }
 0xe25   : > { %2048 = vrot.lane.b32.xlu1 %v6891_v50, %s7657_s19  ;;  %5659 = vmatpush3.xpose.msk.msra.mxu1 %vm735_vm3, %v1818_v51  ;;  %v1816_v58 = vmul.f32 0.17677669, %v6891_v50 }
 0xe26   : > { %5663 = vmatprep.subr.mxu1 %v6388_v14 }
 0xe28   : > { %5661 = vmatmul.mubr.msk.f32.vlgmr.msra.gmra.mrb[24].mxu1 %vm735_vm3, %v1813_v52 }
 0xe29   : > { %5665 = vmatprep.mubr.msk.f32.mxu1 %vm6387_vm0, %v6388_v14 }
 0xe93   : > { %v1895_v53 = vpop.permute.xlu1 %1894  ;;  %v1972_v55 = vpop.permute.xlu0 %1971 }
 0xe94   : > { %5664 = vmatpush3.xpose.msk.msra.mxu1 %vm735_vm3, %v1895_v53  ;;  %v5153_v53 = vld [vmem:[%s7601_s6 + $0x20] sm:$0xff] }
 0xe95   : > { %5668 = vmatprep.subr.mxu1 %v6388_v14 }
 0xe97   : > { %5666 = vmatmul.mubr.msk.f32.vlgmr.msra.gmra.mrb[26].mxu1 %vm735_vm3, %v1814_v54  ;;  %v2049_v57 = vpop.permute.xlu1 %2048  ;;  %v5154_v54 = vld [vmem:[%s7601_s6 + $0x28] sm:$0xff] }
 0xe98   : > { %5669 = vmatpush3.xpose.msk.msra.mxu1 %vm735_vm3, %v1972_v55  ;;  %5670 = vmatprep.mubr.msk.f32.mxu1 %vm6387_vm0, %v6388_v14  ;;  %v6055_v55 = vpack.c.bf16 %v5154_v54, %v5153_v53  ;;  %v5179_v54 = vld [vmem:[%s7607_s12 + $0xe0] sm:$0xff] }
 0xe99   : > { %5673 = vmatprep.subr.mxu1 %v6388_v14 }
 0xe9b   : > { %5671 = vmatmul.mubr.msk.f32.vlgmr.msra.gmra.mrb[28].mxu1 %vm735_vm3, %v1815_v56  ;;  %v5155_v56 = vld [vmem:[%s7601_s6 + $0x30] sm:$0xff] }
 0xe9c   : > { %5674 = vmatpush3.xpose.msk.msra.mxu1 %vm735_vm3, %v2049_v57  ;;  %5675 = vmatprep.mubr.msk.f32.mxu1 %vm6387_vm0, %v6388_v14  ;;  %v5156_v57 = vld [vmem:[%s7601_s6 + $0x38] sm:$0xff] }
 0xe9d   : > { %5678 = vmatprep.subr.mxu1 %v6388_v14 }
 0xe9f   : > { %5676 = vmatmul.mubr.msk.f32.vlgmr.msra.gmra.mrb[30].mxu1 %vm735_vm3, %v1816_v58  ;;  %v6058_v58 = vpack.c.bf16 %v5156_v57, %v5155_v56  ;;  %v5181_v57 = vld [vmem:[%s7607_s12 + $0xf0] sm:$0xff] }
 0xea0   : > { %5680 = vmatprep.mubr.msk.f32.mxu1 %vm6387_vm0, %v6388_v14 }
 0xefb   : > { %v1890_v59 = vpop.f32.mrb[24].mxu1 }
 0xefc   : > { %v2125_v60 = vsel %vm6685_vm4, %v1890_v59, -1e+30  ;;  %v5662_v61 = vpop.f32.mrb[25].mxu1 }
 0xefd   : > { %v2129_v62 = vsel %vm735_vm3, %v2125_v60, -inf }
 0xefe   : > { %2130 = vmax.xlane.f32.xlu0 %v2129_v62 }
 0xf6a   : > { %v1967_v63 = vpop.f32.mrb[26].mxu1 }
 0xf6b   : > { %v2126_v0 = vsel %vm6685_vm4, %v1967_v63, -1e+30  ;;  %v5667_v1 = vpop.f32.mrb[27].mxu1 }
 0xf6c   : > { %v2132_v2 = vsel %vm735_vm3, %v2126_v0, -inf }
 0xf6d   : > { %2133 = vmax.xlane.f32.xlu1 %v2132_v2 }
 0xf6e   : > { %v2044_v3 = vpop.f32.mrb[28].mxu1 }
 0xf6f   : > { %v2127_v5 = vsel %vm6685_vm4, %v2044_v3, -1e+30  ;;  %v5672_v6 = vpop.f32.mrb[29].mxu1 }
 0xf70   : > { %v2135_v7 = vsel %vm735_vm3, %v2127_v5, -inf }
 0xf71   : > { %2136 = vmax.xlane.f32.xlu0 %v2135_v7 }
 0xf72   : > { %v2121_v9 = vpop.f32.mrb[30].mxu1 }
 0xf73   : > { %v2128_v10 = vsel %vm6685_vm4, %v2121_v9, -1e+30  ;;  %v5677_v11 = vpop.f32.mrb[31].mxu1  ;;  %v5157_v9 = vld [vmem:[%s7602_s7 + $0x1] ss:$0 sm:$0xff] }
 0xf74   : > { %v2138_v12 = vsel %vm735_vm3, %v2128_v10, -inf }
 0xf75   : > { %2139 = vmax.xlane.f32.xlu0 %v2138_v12 }
 0xf7e   : > { %2173 = vrot.lane.b32.xlu1 %v1799_v46, %s7658_s29 }
 0xf8b   : > { %v2131_v13 = vpop.xlane.xlu0 %2130 }
 0xf8c   : > { %v2141_v15 = vsub.f32 %v2125_v60, %v2131_v13 }
 0xf8e   : > { %v2145_v16 = vmul.f32 1.442695, %v2141_v15 }
 0xf90   : > { %6257 = vpow2.f32 %v2145_v16 }
 0xf9a   : > { %v6258_v17 = vpop.eup %6257 }
 0xf9b   : > { %v2153_v18 = vsel %vm735_vm3, %v6258_v17, 0.0 }
 0xfa2   : > { %2154 = vadd.xlane.f32.xlu1 %v2153_v18 }
 0xffa   : > { %v2134_v19 = vpop.xlane.xlu1 %2133 }
 0xffb   : > { %v2142_v20 = vsub.f32 %v2126_v0, %v2134_v19 }
 0xffd   : > { %v2147_v21 = vmul.f32 1.442695, %v2142_v20 }
 0xffe   : > { %v2174_v22 = vpop.permute.xlu1 %2173  ;;  %v2137_v23 = vpop.xlane.xlu0 %2136 }
 0xfff   : > { %6259 = vpow2.f32 %v2147_v21  ;;  %v2143_v25 = vsub.f32 %v2127_v5, %v2137_v23  ;;  %5679 = vmatpush3.msra.mxu1 %v2174_v22  ;;  %v5161_v21 = vld [vmem:[%s7605_s10 + $0x20] sm:$0xff]  ;;  %v5163_v23 = vld [vmem:[%s7605_s10 + $0x30] sm:$0xff] }
0x1000   : > { %5683 = vmatprep.subr.mxu1 %v6388_v14 }
0x1001   : > { %v2149_v27 = vmul.f32 1.442695, %v2143_v25  ;;  %v5164_v25 = vld [vmem:[%s7605_s10 + $0x38] sm:$0xff] }
0x1002   : > { %v2140_v28 = vpop.xlane.xlu0 %2139 }
0x1003   : > { %6261 = vpow2.f32 %v2149_v27  ;;  %v2144_v29 = vsub.f32 %v2128_v10, %v2140_v28  ;;  %v6064_v27 = vpack.c.bf16 %v5164_v25, %v5163_v23  ;;  %v5167_v28 = vld [vmem:[%s7607_s12 + $0x80] sm:$0xff] }
0x1005   : > { %v2151_v30 = vmul.f32 1.442695, %v2144_v29  ;;  %v5168_v29 = vld [vmem:[%s7607_s12 + $0x88] sm:$0xff] }
0x1007   : > { %6263 = vpow2.f32 %v2151_v30  ;;  %v5169_v30 = vld [vmem:[%s7607_s12 + $0x90] sm:$0xff] }
0x1009   : > { %v6260_v31 = vpop.eup %6259 }
0x100a   : > { %v2156_v32 = vsel %vm735_vm3, %v6260_v31, 0.0 }
0x100b   : > { %2157 = vadd.xlane.f32.xlu0 %v2156_v32  ;;  %v5170_v32 = vld [vmem:[%s7607_s12 + $0x98] sm:$0xff] }
0x100d   : > { %v6262_v26 = vpop.eup %6261 }
0x100e   : > { %v2159_v33 = vsel %vm735_vm3, %v6262_v26, 0.0 }
0x100f   : > { %2160 = vadd.xlane.f32.xlu1 %v2159_v33  ;;  %v5171_v33 = vld [vmem:[%s7607_s12 + $0xa0] sm:$0xff] }
0x1011   : > { %v6264_v34 = vpop.eup %6263 }
0x1012   : > { %v2162_v35 = vsel %vm735_vm3, %v6264_v34, 0.0 }
0x1013   : > { %2163 = vadd.xlane.f32.xlu0 %v2162_v35 }
0x1020   : > { %2325 = vrot.lane.b32.xlu1 %v6883_v48, %s7658_s29 }
0x1024   : > { %2401 = vrot.lane.b32.xlu1 %v6891_v50, %s7658_s29 }
0x1029   : > { %2249 = vrot.lane.b32.xlu0 %v6885_v49, %s7658_s29 }
0x102f   : > { %v2155_v36 = vpop.xlane.xlu1 %2154 }
0x1030   : > { %6265 = vrcp.f32 %v2155_v36 }
0x103a   : > { %v6266_v37 = vpop.eup %6265 }
0x103b   : > { %v2169_v38 = vmul.f32 %v6266_v37, %v6258_v17 }
0x103d   : > { %5681 = vmatmul.mubr.msk.f32.vlgmr.msra.gmra.mrb[32].mxu1 %vm735_vm3, %v2169_v38 }
0x103e   : > { %5685 = vmatprep.mubr.msk.f32.mxu1 %vm6387_vm0, %v6388_v14 }
0x1098   : > { %v2158_v39 = vpop.xlane.xlu0 %2157 }
0x1099   : > { %6267 = vrcp.f32 %v2158_v39 }
0x109c   : > { %v2161_v40 = vpop.xlane.xlu1 %2160 }
0x109d   : > { %6269 = vrcp.f32 %v2161_v40  ;;  %v5159_v40 = vld [vmem:[%s7603_s8 + $0x1] ss:$0 sm:$0xff] }
0x10a0   : > { %v2326_v41 = vpop.permute.xlu1 %2325  ;;  %v2164_v42 = vpop.xlane.xlu0 %2163 }
0x10a1   : > { %6271 = vrcp.f32 %v2164_v42  ;;  %5689 = vmatpush3.msra.mxu0 %v2326_v41  ;;  %v5160_v42 = vld [vmem:[%s7604_s9 + $0x1] ss:$0 sm:$0xff] }
0x10a2   : > { %6054 = vmatprep.subr.bf16.mxu0 %v6386_v4 }
0x10a3   : > { %v6268_v43 = vpop.eup %6267 }
0x10a4   : > { %v2170_v44 = vmul.f32 %v6268_v43, %v6260_v31  ;;  %v2250_v45 = vpop.permute.xlu0 %2249  ;;  %v2402_v46 = vpop.permute.xlu1 %2401  ;;  %v6067_v31 = vpack.c.bf16 %v5168_v29, %v5167_v28 }
0x10a5   : > { %5684 = vmatpush3.msra.mxu1 %v2250_v45  ;;  %v5173_v45 = vld [vmem:[%s7607_s12 + $0xb0] sm:$0xff] }
0x10a6   : > { %5686 = vmatmul.mubr.msk.f32.vlgmr.msra.gmra.mrb[34].mxu1 %vm735_vm3, %v2170_v44  ;;  %5693 = vmatprep.subr.mxu1 %v6388_v14 }
0x10a7   : > { %v6270_v47 = vpop.eup %6269  ;;  %5694 = vmatpush3.msra.mxu1 %v2402_v46  ;;  %5695 = vmatprep.mubr.msk.f32.mxu1 %vm6387_vm0, %v6388_v14  ;;  %v5174_v46 = vld [vmem:[%s7607_s12 + $0xb8] sm:$0xff] }
0x10a8   : > { %v2171_v48 = vmul.f32 %v6270_v47, %v6262_v26  ;;  %6060 = vmatprep.subr.bf16.mxu1 %v6386_v4  ;;  %v6070_v26 = vpack.c.bf16 %v5170_v32, %v5169_v30  ;;  %v6076_v47 = vpack.c.bf16 %v5174_v46, %v5173_v45  ;;  %v5184_v30 = vld [vmem:[%s7598_s3 + $0x2] ss:$0 sm:$0xff] }
0x10a9   : > { %v5185_v32 = vld [vmem:[%s7599_s4 + $0x2] ss:$0 sm:$0xff] }
0x10aa   : > { %5691 = vmatmul.mubr.msk.f32.vlgmr.msra.gmra.mrb[4].mxu0 %vm735_vm3, %v2171_v48  ;;  %v5175_v48 = vld [vmem:[%s7607_s12 + $0xc0] sm:$0xff] }
0x10ab   : > { %v6272_v49 = vpop.eup %6271  ;;  %5706 = vmatprep.mubr.msk.f32.mxu0 %vm6387_vm0, %v6388_v14  ;;  %6056 = vmatpush3.bf16.msra.mxu0 %v6055_v55  ;;  %v5180_v55 = vld [vmem:[%s7607_s12 + $0xe8] sm:$0xff] }
0x10ac   : > { %v2172_v50 = vmul.f32 %v6272_v49, %v6264_v34  ;;  %6057 = vmatprep.subr.bf16.mxu0 %v6386_v4  ;;  %v5172_v34 = vld [vmem:[%s7607_s12 + $0xa8] sm:$0xff]  ;;  %v6085_v56 = vpack.c.bf16 %v5180_v55, %v5179_v54 }
0x10ad   : > { %v6073_v35 = vpack.c.bf16 %v5172_v34, %v5171_v33  ;;  %v5176_v49 = vld [vmem:[%s7607_s12 + $0xc8] sm:$0xff] }
0x10ae   : > { %5696 = vmatmul.mubr.msk.f32.vlgmr.msra.gmra.mrb[36].mxu1 %vm735_vm3, %v2172_v50  ;;  %v6079_v50 = vpack.c.bf16 %v5176_v49, %v5175_v48 }
0x10af   : > { %5717 = vmatprep.mubr.msk.f32.mxu1 %vm6387_vm0, %v6388_v14  ;;  %6059 = vmatpush3.bf16.msra.mxu0 %v6058_v58  ;;  %v5182_v58 = vld [vmem:[%s7607_s12 + $0xf8] sm:$0xff] }
0x10b0   : > { %6066 = vmatprep.subr.bf16.mxu0 %v6386_v4 }
0x1110   : > { %v2245_v51 = vpop.f32.mrb[32].mxu1 }
0x1111   : > { %v5682_v52 = vpop.f32.mrb[33].mxu1 }
0x1112   : > { %v5178_v52 = vld [vmem:[%s7607_s12 + $0xd8] sm:$0xff] }
0x1179   : > { %v2321_v59 = vpop.f32.mrb[34].mxu1 }
0x117a   : > { %2478 = vrot.lane.b32.xlu0 %v2321_v59, %s7659_s23  ;;  %v5687_v60 = vpop.f32.mrb[35].mxu1  ;;  %v6088_v59 = vpack.c.bf16 %v5182_v58, %v5181_v57 }
0x117b   : > { %v5165_v60 = vld [vmem:[%s7606_s11 + $0x1] ss:$0 sm:$0xff] }
0x117d   : > { %v2397_v61 = vpop.f32.mrb[4].mxu0 }
0x117e   : > { %2482 = vrot.lane.b32.xlu1 %v2397_v61, %s7660_s30  ;;  %v5692_v62 = vpop.f32.mrb[5].mxu0 }
0x1181   : > { %v2473_v63 = vpop.f32.mrb[36].mxu1 }
0x1182   : > { %2486 = vrot.lane.b32.xlu0 %v2473_v63, %s7661_s27  ;;  %v5697_v0 = vpop.f32.mrb[37].mxu1 }
0x11ec   : > { %v2479_v1 = vpop.permute.xlu0 %2478 }
0x11ed   : > { %v2489_v3 = vsel %vm735_vm3, %v2245_v51, %v2479_v1  ;;  %v5177_v51 = vld [vmem:[%s7607_s12 + $0xd0] sm:$0xff] }
0x11ee   : > { %v6082_v53 = vpack.c.bf16 %v5178_v52, %v5177_v51 }
0x11f0   : > { %v2483_v2 = vpop.permute.xlu1 %2482 }
0x11f1   : > { %v2490_v5 = vsel %vm1409_vm5, %v2489_v3, %v2483_v2 }
0x11f4   : > { %v2487_v6 = vpop.permute.xlu0 %2486 }
0x11f5   : > { %v2491_v7 = vsel %vm1411_vm6, %v2490_v5, %v2487_v6  ;;  %v5183_v6 = vld [vmem:[%s7608_s13 + $0x1] ss:$0 sm:$0xff] }
0x11f6   : > { %5707 = vmatmul.mubr.msk.f32.vlgmr.msra.gmra.mrb[6].mxu0 %vm618_vm2, %v2491_v7 }
0x11f7   : > { %5752 = vmatprep.mubr.msk.f32.mxu0 %vm6387_vm0, %v6388_v14  ;;  %6068 = vmatpush3.bf16.msra.mxu0 %v6067_v31 }
0x11f8   : > { %6069 = vmatprep.subr.bf16.mxu0 %v6386_v4 }
0x11fb   : > { %6071 = vmatpush3.bf16.msra.mxu0 %v6070_v26 }
0x11fc   : > { %6072 = vmatprep.subr.bf16.mxu0 %v6386_v4 }
0x11ff   : > { %6074 = vmatpush3.bf16.msra.mxu0 %v6073_v35 }
0x1200   : > { %6075 = vmatprep.subr.bf16.mxu0 %v6386_v4 }
0x1203   : > { %6077 = vmatpush3.bf16.msra.mxu0 %v6076_v47 }
0x1204   : > { %6078 = vmatprep.subr.bf16.mxu0 %v6386_v4 }
0x1207   : > { %6080 = vmatpush3.bf16.msra.mxu0 %v6079_v50 }
0x1208   : > { %6081 = vmatprep.subr.bf16.mxu0 %v6386_v4 }
0x120b   : > { %6083 = vmatpush3.bf16.msra.mxu0 %v6082_v53 }
0x120c   : > { %6084 = vmatprep.subr.bf16.mxu0 %v6386_v4 }
0x120f   : > { %6086 = vmatpush3.bf16.msra.mxu0 %v6085_v56 }
0x1210   : > { %6087 = vmatprep.subr.bf16.mxu0 %v6386_v4 }
0x1213   : > { %6089 = vmatpush3.bf16.msra.mxu0 %v6088_v59 }
0x1214   : > { %5796 = vmatprep.subr.mxu0 %v6388_v14 }
0x12c9   : > { %v2571_v10 = vpop.f32.mrb[6].mxu0 }
0x12ca   : > { %v2572_v11 = vadd.f32 %v5157_v9, %v2571_v10  ;;  %v5708_v12 = vpop.f32.mrb[7].mxu0 }
0x12cc   : > { %v6984_v13 = vadd.f32 %v2572_v11, %v6850_v24  ;;  %v5162_v24 = vld [vmem:[%s7605_s10 + $0x28] sm:$0xff] }
0x12cd   : > { %v6061_v22 = vpack.c.bf16 %v5162_v24, %v5161_v21  ;;  %v5188_v24 = vld [vmem:[%s7600_s5 + $0x50] sm:$0xff] }
0x12ce   : > { %v2578_v15 = vsel %vm618_vm2, %v6984_v13, 0.0 }
0x12cf   : > { %2579 = vadd.xlane.f32.xlu1 %v2578_v15  ;;  %6062 = vmatpush3.bf16.msra.mxu1 %v6061_v22  ;;  %v5189_v22 = vld [vmem:[%s7600_s5 + $0x58] sm:$0xff] }
0x12d0   : > { %6063 = vmatprep.subr.bf16.mxu1 %v6386_v4  ;;  %v6094_v23 = vpack.c.bf16 %v5189_v22, %v5188_v24 }
0x12d3   : > { %6065 = vmatpush3.bf16.msra.mxu1 %v6064_v27 }
0x12d4   : > { %6090 = vmatprep.subr.bf16.mxu1 %v6386_v4 }
0x135c   : > { %v2580_v16 = vpop.xlane.xlu1 %2579 }
0x135d   : > { %v2581_v17 = vmul.f32 0.03125, %v2580_v16 }
0x135f   : > { %v2582_v18 = vsub.f32 %v6984_v13, %v2581_v17 }
0x1361   : > { %v2583_v19 = vmul.f32 %v2582_v18, %v2582_v18 }
0x1363   : > { %v2584_v20 = vsel %vm618_vm2, %v2583_v19, 0.0 }
0x1364   : > { %2585 = vadd.xlane.f32.xlu0 %v2584_v20  ;;  %v5186_v20 = vld [vmem:[%s7600_s5 + $0x40] sm:$0xff] }
0x13f1   : > { %v2586_v36 = vpop.xlane.xlu0 %2585 }
0x13f2   : > { %v2587_v37 = vmul.f32 0.03125, %v2586_v36 }
0x13f4   : > { %v2588_v38 = vadd.f32 1e-05, %v2587_v37 }
0x13f6   : > { %6273 = vrsqrt.f32 %v2588_v38 }
0x1400   : > { %v6274_v39 = vpop.eup %6273 }
0x1401   : > { %v2590_v41 = vmul.f32 %v6274_v39, %v2582_v18 }
0x1403   : > { %v2595_v43 = vmul.f32 %v5159_v40, %v2590_v41 }
0x1405   : > { %v2600_v44 = vadd.f32 %v5160_v42, %v2595_v43 }
0x1407   : > { %5718 = vmatmul.mubr.msk.f32.vlgmr.msra.gmra.mrb[38].mxu1 %vm618_vm2, %v2600_v44 }
0x1408   : > { %5763 = vmatprep.mubr.msk.f32.mxu1 %vm6387_vm0, %v6388_v14 }
0x14da   : > { %v2680_v61 = vpop.f32.mrb[38].mxu1 }
0x14db   : > { %v2681_v62 = vadd.f32 %v5165_v60, %v2680_v61  ;;  %v5719_v63 = vpop.f32.mrb[39].mxu1 }
0x14dd   : > { %v2685_v0 = vmul.f32 0.70710677, %v2681_v62  ;;  %v2684_v2 = vmul.f32 0.5, %v2681_v62 }
0x14df   : > { %6275 = verf.f32 %v2685_v0 }
0x14e9   : > { %v6276_v1 = vpop.eup %6275 }
0x14ea   : > { %v2687_v3 = vadd.f32 1.0, %v6276_v1 }
0x14ec   : > { %v2688_v5 = vmul.f32 %v2687_v3, %v2684_v2 }
0x14ee   : > { %5753 = vmatmul.mubr.f32.vlgmr.msra.gmra.mrb[8].mxu0 %v2688_v5 }
0x14ef   : > { %5798 = vmatprep.mubr.msk.f32.mxu0 %vm6387_vm0, %v6388_v14 }
0x15c1   : > { %v2777_v7 = vpop.f32.mrb[8].mxu0 }
0x15c2   : > { %v2778_v9 = vadd.f32 %v5183_v6, %v2777_v7  ;;  %v5754_v10 = vpop.f32.mrb[9].mxu0 }
0x15c4   : > { %v7078_v11 = vadd.f32 %v2778_v9, %v6984_v13  ;;  %v5187_v13 = vld [vmem:[%s7600_s5 + $0x48] sm:$0xff] }
0x15c5   : > { %v6091_v21 = vpack.c.bf16 %v5187_v13, %v5186_v20 }
0x15c6   : > { %v2784_v12 = vsel %vm618_vm2, %v7078_v11, 0.0 }
0x15c7   : > { %2785 = vadd.xlane.f32.xlu0 %v2784_v12  ;;  %6092 = vmatpush3.bf16.msra.mxu1 %v6091_v21 }
0x15c8   : > { %6093 = vmatprep.subr.bf16.mxu1 %v6386_v4 }
0x15cb   : > { %6095 = vmatpush3.bf16.msra.mxu1 %v6094_v23 }
0x15cc   : > { %5766 = vmatprep.subr.mxu1 %v6388_v14 }
0x1654   : > { %v2786_v15 = vpop.xlane.xlu0 %2785 }
0x1655   : > { %v2787_v16 = vmul.f32 0.03125, %v2786_v15 }
0x1657   : > { %v2788_v17 = vsub.f32 %v7078_v11, %v2787_v16 }
0x1659   : > { %v2789_v18 = vmul.f32 %v2788_v17, %v2788_v17 }
0x165b   : > { %v2790_v19 = vsel %vm618_vm2, %v2789_v18, 0.0 }
0x165c   : > { %2791 = vadd.xlane.f32.xlu1 %v2790_v19 }
0x16e9   : > { %v2792_v25 = vpop.xlane.xlu1 %2791 }
0x16ea   : > { %v2793_v27 = vmul.f32 0.03125, %v2792_v25 }
0x16ec   : > { %v2794_v28 = vadd.f32 1e-05, %v2793_v27 }
0x16ee   : > { %6277 = vrsqrt.f32 %v2794_v28 }
0x16f8   : > { %v6278_v29 = vpop.eup %6277 }
0x16f9   : > { %v2796_v31 = vmul.f32 %v6278_v29, %v2788_v17 }
0x16fb   : > { %v2801_v26 = vmul.f32 %v5184_v30, %v2796_v31 }
0x16fd   : > { %v2806_v33 = vadd.f32 %v5185_v32, %v2801_v26 }
0x16ff   : > { %5764 = vmatmul.mubr.msk.f32.vlgmr.msra.gmra.mrb[40].mxu1 %vm618_vm2, %v2806_v33 }
0x1700   : > { %5768 = vmatprep.mubr.msk.f32.mxu1 %vm6387_vm0, %v6388_v14 }
0x17d2   : > { %v2881_v34 = vpop.f32.mrb[40].mxu1 }
0x17d3   : > { %2889 = vrot.lane.b32.xlu1 %v2881_v34, %s7662_s2  ;;  %2886 = vrot.lane.b32.xlu0 %v2881_v34, %s7663_s24  ;;  %v5765_v35 = vpop.f32.mrb[41].mxu1  ;;  %v2895_v40 = vmul.f32 0.17677669, %v2881_v34 }
0x17d7   : > { %2892 = vrot.lane.b32.xlu1 %v2881_v34, %s7656_s21  ;;  %2899 = vrot.lane.b32.xlu0 %v2881_v34, %s7657_s19 }
0x1845   : > { %v7111_v36 = vpop.permute.xlu1 %2889  ;;  %v7113_v37 = vpop.permute.xlu0 %2886 }
0x1846   : > { %3053 = vrot.lane.b32.xlu0 %v7111_v36, %s7657_s19  ;;  %2976 = vrot.lane.b32.xlu1 %v7113_v37, %s7657_s19  ;;  %v2896_v42 = vmul.f32 0.17677669, %v7113_v37  ;;  %v2897_v44 = vmul.f32 0.17677669, %v7111_v36 }
0x1849   : > { %v7119_v38 = vpop.permute.xlu1 %2892  ;;  %v2900_v39 = vpop.permute.xlu0 %2899 }
0x184a   : > { %3130 = vrot.lane.b32.xlu1 %v7119_v38, %s7657_s19  ;;  %5767 = vmatpush3.xpose.msk.msra.mxu1 %vm735_vm3, %v2900_v39  ;;  %v2898_v46 = vmul.f32 0.17677669, %v7119_v38 }
0x184b   : > { %5771 = vmatprep.subr.mxu1 %v6388_v14 }
0x184d   : > { %5769 = vmatmul.mubr.msk.f32.vlgmr.msra.gmra.mrb[42].mxu1 %vm735_vm3, %v2895_v40 }
0x184e   : > { %5773 = vmatprep.mubr.msk.f32.mxu1 %vm6387_vm0, %v6388_v14 }
0x18b8   : > { %v2977_v41 = vpop.permute.xlu1 %2976  ;;  %v3054_v43 = vpop.permute.xlu0 %3053 }
0x18b9   : > { %5772 = vmatpush3.xpose.msk.msra.mxu1 %vm735_vm3, %v2977_v41  ;;  %v5203_v41 = vld [vmem:[%s7601_s6 + $0x40] sm:$0xff] }
0x18ba   : > { %5776 = vmatprep.subr.mxu1 %v6388_v14 }
0x18bc   : > { %5774 = vmatmul.mubr.msk.f32.vlgmr.msra.gmra.mrb[44].mxu1 %vm735_vm3, %v2896_v42  ;;  %v3131_v45 = vpop.permute.xlu1 %3130  ;;  %v5204_v42 = vld [vmem:[%s7601_s6 + $0x48] sm:$0xff] }
0x18bd   : > { %5777 = vmatpush3.xpose.msk.msra.mxu1 %vm735_vm3, %v3054_v43  ;;  %5778 = vmatprep.mubr.msk.f32.mxu1 %vm6387_vm0, %v6388_v14  ;;  %v6097_v43 = vpack.c.bf16 %v5204_v42, %v5203_v41  ;;  %v5229_v42 = vld [vmem:[%s7607_s12 + $0x160] sm:$0xff] }
0x18be   : > { %5781 = vmatprep.subr.mxu1 %v6388_v14 }
0x18c0   : > { %5779 = vmatmul.mubr.msk.f32.vlgmr.msra.gmra.mrb[46].mxu1 %vm735_vm3, %v2897_v44  ;;  %v5205_v44 = vld [vmem:[%s7601_s6 + $0x50] sm:$0xff] }
0x18c1   : > { %5782 = vmatpush3.xpose.msk.msra.mxu1 %vm735_vm3, %v3131_v45  ;;  %5783 = vmatprep.mubr.msk.f32.mxu1 %vm6387_vm0, %v6388_v14  ;;  %v5206_v45 = vld [vmem:[%s7601_s6 + $0x58] sm:$0xff] }
0x18c2   : > { %5786 = vmatprep.subr.mxu1 %v6388_v14 }
0x18c4   : > { %5784 = vmatmul.mubr.msk.f32.vlgmr.msra.gmra.mrb[48].mxu1 %vm735_vm3, %v2898_v46  ;;  %v6100_v46 = vpack.c.bf16 %v5206_v45, %v5205_v44  ;;  %v5231_v45 = vld [vmem:[%s7607_s12 + $0x170] sm:$0xff] }
0x18c5   : > { %5788 = vmatprep.mubr.msk.f32.mxu1 %vm6387_vm0, %v6388_v14 }
0x1920   : > { %v2972_v47 = vpop.f32.mrb[42].mxu1 }
0x1921   : > { %v3207_v48 = vsel %vm6685_vm4, %v2972_v47, -1e+30  ;;  %v5770_v49 = vpop.f32.mrb[43].mxu1 }
0x1922   : > { %v3211_v50 = vsel %vm735_vm3, %v3207_v48, -inf }
0x1923   : > { %3212 = vmax.xlane.f32.xlu0 %v3211_v50 }
0x198f   : > { %v3049_v51 = vpop.f32.mrb[44].mxu1 }
0x1990   : > { %v3208_v52 = vsel %vm6685_vm4, %v3049_v51, -1e+30  ;;  %v5775_v53 = vpop.f32.mrb[45].mxu1 }
0x1991   : > { %v3214_v54 = vsel %vm735_vm3, %v3208_v52, -inf }
0x1992   : > { %3215 = vmax.xlane.f32.xlu1 %v3214_v54 }
0x1993   : > { %v3126_v55 = vpop.f32.mrb[46].mxu1 }
0x1994   : > { %v3209_v56 = vsel %vm6685_vm4, %v3126_v55, -1e+30  ;;  %v5780_v57 = vpop.f32.mrb[47].mxu1 }
0x1995   : > { %v3217_v58 = vsel %vm735_vm3, %v3209_v56, -inf }
0x1996   : > { %3218 = vmax.xlane.f32.xlu0 %v3217_v58 }
0x1997   : > { %v3203_v59 = vpop.f32.mrb[48].mxu1 }
0x1998   : > { %v3210_v60 = vsel %vm6685_vm4, %v3203_v59, -1e+30  ;;  %v5785_v61 = vpop.f32.mrb[49].mxu1  ;;  %v5207_v59 = vld [vmem:[%s7602_s7 + $0x2] ss:$0 sm:$0xff] }
0x1999   : > { %v3220_v62 = vsel %vm735_vm3, %v3210_v60, -inf }
0x199a   : > { %3221 = vmax.xlane.f32.xlu0 %v3220_v62 }
0x19a3   : > { %3255 = vrot.lane.b32.xlu1 %v2881_v34, %s7658_s29 }
0x19b0   : > { %v3213_v63 = vpop.xlane.xlu0 %3212 }
0x19b1   : > { %v3223_v0 = vsub.f32 %v3207_v48, %v3213_v63 }
0x19b3   : > { %v3227_v1 = vmul.f32 1.442695, %v3223_v0 }
0x19b5   : > { %6279 = vpow2.f32 %v3227_v1 }
0x19bf   : > { %v6280_v2 = vpop.eup %6279 }
0x19c0   : > { %v3235_v3 = vsel %vm735_vm3, %v6280_v2, 0.0 }
0x19c7   : > { %3236 = vadd.xlane.f32.xlu1 %v3235_v3 }
0x1a1f   : > { %v3216_v5 = vpop.xlane.xlu1 %3215 }
0x1a20   : > { %v3224_v6 = vsub.f32 %v3208_v52, %v3216_v5 }
0x1a22   : > { %v3229_v7 = vmul.f32 1.442695, %v3224_v6 }
0x1a23   : > { %v3256_v9 = vpop.permute.xlu1 %3255  ;;  %v3219_v10 = vpop.xlane.xlu0 %3218 }
0x1a24   : > { %6281 = vpow2.f32 %v3229_v7  ;;  %v3225_v12 = vsub.f32 %v3209_v56, %v3219_v10  ;;  %5787 = vmatpush3.msra.mxu1 %v3256_v9  ;;  %v5211_v7 = vld [vmem:[%s7605_s10 + $0x40] sm:$0xff]  ;;  %v5213_v10 = vld [vmem:[%s7605_s10 + $0x50] sm:$0xff] }
0x1a25   : > { %5791 = vmatprep.subr.mxu1 %v6388_v14 }
0x1a26   : > { %v3231_v15 = vmul.f32 1.442695, %v3225_v12  ;;  %v5214_v12 = vld [vmem:[%s7605_s10 + $0x58] sm:$0xff] }
0x1a27   : > { %v3222_v16 = vpop.xlane.xlu0 %3221 }
0x1a28   : > { %6283 = vpow2.f32 %v3231_v15  ;;  %v3226_v17 = vsub.f32 %v3210_v60, %v3222_v16  ;;  %v6106_v15 = vpack.c.bf16 %v5214_v12, %v5213_v10  ;;  %v5217_v16 = vld [vmem:[%s7607_s12 + $0x100] sm:$0xff] }
0x1a2a   : > { %v3233_v18 = vmul.f32 1.442695, %v3226_v17  ;;  %v5218_v17 = vld [vmem:[%s7607_s12 + $0x108] sm:$0xff] }
0x1a2c   : > { %6285 = vpow2.f32 %v3233_v18  ;;  %v5219_v18 = vld [vmem:[%s7607_s12 + $0x110] sm:$0xff] }
0x1a2e   : > { %v6282_v19 = vpop.eup %6281 }
0x1a2f   : > { %v3238_v20 = vsel %vm735_vm3, %v6282_v19, 0.0 }
0x1a30   : > { %3239 = vadd.xlane.f32.xlu0 %v3238_v20  ;;  %v5220_v20 = vld [vmem:[%s7607_s12 + $0x118] sm:$0xff] }
0x1a32   : > { %v6284_v13 = vpop.eup %6283 }
0x1a33   : > { %v3241_v21 = vsel %vm735_vm3, %v6284_v13, 0.0 }
0x1a34   : > { %3242 = vadd.xlane.f32.xlu1 %v3241_v21  ;;  %v5221_v21 = vld [vmem:[%s7607_s12 + $0x120] sm:$0xff] }
0x1a36   : > { %v6286_v24 = vpop.eup %6285 }
0x1a37   : > { %v3244_v22 = vsel %vm735_vm3, %v6286_v24, 0.0 }
0x1a38   : > { %3245 = vadd.xlane.f32.xlu0 %v3244_v22 }
0x1a45   : > { %3407 = vrot.lane.b32.xlu1 %v7111_v36, %s7658_s29 }
0x1a49   : > { %3483 = vrot.lane.b32.xlu1 %v7119_v38, %s7658_s29 }
0x1a4e   : > { %3331 = vrot.lane.b32.xlu0 %v7113_v37, %s7658_s29 }
0x1a54   : > { %v3237_v23 = vpop.xlane.xlu1 %3236 }
0x1a55   : > { %6287 = vrcp.f32 %v3237_v23 }
0x1a5f   : > { %v6288_v25 = vpop.eup %6287 }
0x1a60   : > { %v3251_v27 = vmul.f32 %v6288_v25, %v6280_v2 }
0x1a62   : > { %5789 = vmatmul.mubr.msk.f32.vlgmr.msra.gmra.mrb[50].mxu1 %vm735_vm3, %v3251_v27 }
0x1a63   : > { %5793 = vmatprep.mubr.msk.f32.mxu1 %vm6387_vm0, %v6388_v14 }
0x1abd   : > { %v3240_v28 = vpop.xlane.xlu0 %3239 }
0x1abe   : > { %6289 = vrcp.f32 %v3240_v28 }
0x1ac1   : > { %v3243_v29 = vpop.xlane.xlu1 %3242 }
0x1ac2   : > { %6291 = vrcp.f32 %v3243_v29  ;;  %v5209_v29 = vld [vmem:[%s7603_s8 + $0x2] ss:$0 sm:$0xff] }
0x1ac5   : > { %v3408_v30 = vpop.permute.xlu1 %3407  ;;  %v3246_v31 = vpop.xlane.xlu0 %3245 }
0x1ac6   : > { %6293 = vrcp.f32 %v3246_v31  ;;  %5797 = vmatpush3.msra.mxu0 %v3408_v30  ;;  %v5210_v31 = vld [vmem:[%s7604_s9 + $0x2] ss:$0 sm:$0xff] }
0x1ac7   : > { %6096 = vmatprep.subr.bf16.mxu0 %v6386_v4 }
0x1ac8   : > { %v6290_v32 = vpop.eup %6289 }
0x1ac9   : > { %v3252_v26 = vmul.f32 %v6290_v32, %v6282_v19  ;;  %v3332_v33 = vpop.permute.xlu0 %3331  ;;  %v3484_v34 = vpop.permute.xlu1 %3483  ;;  %v6109_v19 = vpack.c.bf16 %v5218_v17, %v5217_v16 }
0x1aca   : > { %5792 = vmatpush3.msra.mxu1 %v3332_v33  ;;  %v5223_v33 = vld [vmem:[%s7607_s12 + $0x130] sm:$0xff] }
0x1acb   : > { %5794 = vmatmul.mubr.msk.f32.vlgmr.msra.gmra.mrb[52].mxu1 %vm735_vm3, %v3252_v26  ;;  %5801 = vmatprep.subr.mxu1 %v6388_v14 }
0x1acc   : > { %v6292_v35 = vpop.eup %6291  ;;  %5802 = vmatpush3.msra.mxu1 %v3484_v34  ;;  %5803 = vmatprep.mubr.msk.f32.mxu1 %vm6387_vm0, %v6388_v14  ;;  %v5224_v34 = vld [vmem:[%s7607_s12 + $0x138] sm:$0xff] }
0x1acd   : > { %v3253_v36 = vmul.f32 %v6292_v35, %v6284_v13  ;;  %6102 = vmatprep.subr.bf16.mxu1 %v6386_v4  ;;  %v6112_v13 = vpack.c.bf16 %v5220_v20, %v5219_v18  ;;  %v6118_v35 = vpack.c.bf16 %v5224_v34, %v5223_v33  ;;  %v5234_v18 = vld [vmem:[%s7598_s3 + $0x3] ss:$0 sm:$0xff] }
0x1ace   : > { %v5235_v20 = vld [vmem:[%s7599_s4 + $0x3] ss:$0 sm:$0xff] }
0x1acf   : > { %5799 = vmatmul.mubr.msk.f32.vlgmr.msra.gmra.mrb[10].mxu0 %vm735_vm3, %v3253_v36  ;;  %v5225_v36 = vld [vmem:[%s7607_s12 + $0x140] sm:$0xff] }
0x1ad0   : > { %v6294_v37 = vpop.eup %6293  ;;  %5814 = vmatprep.mubr.msk.f32.mxu0 %vm6387_vm0, %v6388_v14  ;;  %6098 = vmatpush3.bf16.msra.mxu0 %v6097_v43  ;;  %v5230_v43 = vld [vmem:[%s7607_s12 + $0x168] sm:$0xff] }
0x1ad1   : > { %v3254_v38 = vmul.f32 %v6294_v37, %v6286_v24  ;;  %6099 = vmatprep.subr.bf16.mxu0 %v6386_v4  ;;  %v5222_v24 = vld [vmem:[%s7607_s12 + $0x128] sm:$0xff]  ;;  %v6127_v44 = vpack.c.bf16 %v5230_v43, %v5229_v42 }
0x1ad2   : > { %v6115_v22 = vpack.c.bf16 %v5222_v24, %v5221_v21  ;;  %v5226_v37 = vld [vmem:[%s7607_s12 + $0x148] sm:$0xff] }
0x1ad3   : > { %5804 = vmatmul.mubr.msk.f32.vlgmr.msra.gmra.mrb[54].mxu1 %vm735_vm3, %v3254_v38  ;;  %v6121_v38 = vpack.c.bf16 %v5226_v37, %v5225_v36 }
0x1ad4   : > { %5825 = vmatprep.mubr.msk.f32.mxu1 %vm6387_vm0, %v6388_v14  ;;  %6101 = vmatpush3.bf16.msra.mxu0 %v6100_v46  ;;  %v5232_v46 = vld [vmem:[%s7607_s12 + $0x178] sm:$0xff] }
0x1ad5   : > { %6108 = vmatprep.subr.bf16.mxu0 %v6386_v4 }
0x1b35   : > { %v3327_v39 = vpop.f32.mrb[50].mxu1 }
0x1b36   : > { %v5790_v40 = vpop.f32.mrb[51].mxu1 }
0x1b37   : > { %v5228_v40 = vld [vmem:[%s7607_s12 + $0x158] sm:$0xff] }
0x1b9e   : > { %v3403_v47 = vpop.f32.mrb[52].mxu1 }
0x1b9f   : > { %3560 = vrot.lane.b32.xlu0 %v3403_v47, %s7659_s23  ;;  %v5795_v48 = vpop.f32.mrb[53].mxu1  ;;  %v6130_v47 = vpack.c.bf16 %v5232_v46, %v5231_v45 }
0x1ba0   : > { %v5215_v48 = vld [vmem:[%s7606_s11 + $0x2] ss:$0 sm:$0xff] }
0x1ba2   : > { %v3479_v49 = vpop.f32.mrb[10].mxu0 }
0x1ba3   : > { %3564 = vrot.lane.b32.xlu1 %v3479_v49, %s7660_s30  ;;  %v5800_v50 = vpop.f32.mrb[11].mxu0 }
0x1ba6   : > { %v3555_v51 = vpop.f32.mrb[54].mxu1 }
0x1ba7   : > { %3568 = vrot.lane.b32.xlu0 %v3555_v51, %s7661_s27  ;;  %v5805_v52 = vpop.f32.mrb[55].mxu1 }
0x1c11   : > { %v3561_v53 = vpop.permute.xlu0 %3560 }
0x1c12   : > { %v3571_v55 = vsel %vm735_vm3, %v3327_v39, %v3561_v53  ;;  %v5227_v39 = vld [vmem:[%s7607_s12 + $0x150] sm:$0xff] }
0x1c13   : > { %v6124_v41 = vpack.c.bf16 %v5228_v40, %v5227_v39 }
0x1c15   : > { %v3565_v54 = vpop.permute.xlu1 %3564 }
0x1c16   : > { %v3572_v56 = vsel %vm1409_vm5, %v3571_v55, %v3565_v54 }
0x1c19   : > { %v3569_v57 = vpop.permute.xlu0 %3568 }
0x1c1a   : > { %v3573_v58 = vsel %vm1411_vm6, %v3572_v56, %v3569_v57  ;;  %v5233_v57 = vld [vmem:[%s7608_s13 + $0x2] ss:$0 sm:$0xff] }
0x1c1b   : > { %5815 = vmatmul.mubr.msk.f32.vlgmr.msra.gmra.mrb[12].mxu0 %vm618_vm2, %v3573_v58 }
0x1c1c   : > { %5860 = vmatprep.mubr.msk.f32.mxu0 %vm6387_vm0, %v6388_v14  ;;  %6110 = vmatpush3.bf16.msra.mxu0 %v6109_v19 }
0x1c1d   : > { %6111 = vmatprep.subr.bf16.mxu0 %v6386_v4 }
0x1c20   : > { %6113 = vmatpush3.bf16.msra.mxu0 %v6112_v13 }
0x1c21   : > { %6114 = vmatprep.subr.bf16.mxu0 %v6386_v4 }
0x1c24   : > { %6116 = vmatpush3.bf16.msra.mxu0 %v6115_v22 }
0x1c25   : > { %6117 = vmatprep.subr.bf16.mxu0 %v6386_v4 }
0x1c28   : > { %6119 = vmatpush3.bf16.msra.mxu0 %v6118_v35 }
0x1c29   : > { %6120 = vmatprep.subr.bf16.mxu0 %v6386_v4 }
0x1c2c   : > { %6122 = vmatpush3.bf16.msra.mxu0 %v6121_v38 }
0x1c2d   : > { %6123 = vmatprep.subr.bf16.mxu0 %v6386_v4 }
0x1c30   : > { %6125 = vmatpush3.bf16.msra.mxu0 %v6124_v41 }
0x1c31   : > { %6126 = vmatprep.subr.bf16.mxu0 %v6386_v4 }
0x1c34   : > { %6128 = vmatpush3.bf16.msra.mxu0 %v6127_v44 }
0x1c35   : > { %6129 = vmatprep.subr.bf16.mxu0 %v6386_v4 }
0x1c38   : > { %6131 = vmatpush3.bf16.msra.mxu0 %v6130_v47 }
0x1c39   : > { %5904 = vmatprep.subr.mxu0 %v6388_v14 }
0x1cee   : > { %v3653_v60 = vpop.f32.mrb[12].mxu0 }
0x1cef   : > { %v3654_v61 = vadd.f32 %v5207_v59, %v3653_v60  ;;  %v5816_v62 = vpop.f32.mrb[13].mxu0 }
0x1cf1   : > { %v7212_v63 = vadd.f32 %v3654_v61, %v7078_v11  ;;  %v5212_v11 = vld [vmem:[%s7605_s10 + $0x48] sm:$0xff] }
0x1cf2   : > { %v6103_v9 = vpack.c.bf16 %v5212_v11, %v5211_v7  ;;  %v5238_v11 = vld [vmem:[%s7600_s5 + $0x70] sm:$0xff] }
0x1cf3   : > { %v3660_v0 = vsel %vm618_vm2, %v7212_v63, 0.0 }
0x1cf4   : > { %3661 = vadd.xlane.f32.xlu1 %v3660_v0  ;;  %6104 = vmatpush3.bf16.msra.mxu1 %v6103_v9  ;;  %v5239_v9 = vld [vmem:[%s7600_s5 + $0x78] sm:$0xff] }
0x1cf5   : > { %6105 = vmatprep.subr.bf16.mxu1 %v6386_v4  ;;  %v6136_v10 = vpack.c.bf16 %v5239_v9, %v5238_v11 }
0x1cf8   : > { %6107 = vmatpush3.bf16.msra.mxu1 %v6106_v15 }
0x1cf9   : > { %6132 = vmatprep.subr.bf16.mxu1 %v6386_v4 }
0x1d81   : > { %v3662_v1 = vpop.xlane.xlu1 %3661 }
0x1d82   : > { %v3663_v2 = vmul.f32 0.03125, %v3662_v1 }
0x1d84   : > { %v3664_v3 = vsub.f32 %v7212_v63, %v3663_v2 }
0x1d86   : > { %v3665_v5 = vmul.f32 %v3664_v3, %v3664_v3 }
0x1d88   : > { %v3666_v6 = vsel %vm618_vm2, %v3665_v5, 0.0 }
0x1d89   : > { %3667 = vadd.xlane.f32.xlu0 %v3666_v6  ;;  %v5236_v6 = vld [vmem:[%s7600_s5 + $0x60] sm:$0xff] }
0x1e16   : > { %v3668_v23 = vpop.xlane.xlu0 %3667 }
0x1e17   : > { %v3669_v25 = vmul.f32 0.03125, %v3668_v23 }
0x1e19   : > { %v3670_v27 = vadd.f32 1e-05, %v3669_v25 }
0x1e1b   : > { %6295 = vrsqrt.f32 %v3670_v27 }
0x1e25   : > { %v6296_v28 = vpop.eup %6295 }
0x1e26   : > { %v3672_v30 = vmul.f32 %v6296_v28, %v3664_v3 }
0x1e28   : > { %v3677_v32 = vmul.f32 %v5209_v29, %v3672_v30 }
0x1e2a   : > { %v3682_v26 = vadd.f32 %v5210_v31, %v3677_v32 }
0x1e2c   : > { %5826 = vmatmul.mubr.msk.f32.vlgmr.msra.gmra.mrb[56].mxu1 %vm618_vm2, %v3682_v26 }
0x1e2d   : > { %5871 = vmatprep.mubr.msk.f32.mxu1 %vm6387_vm0, %v6388_v14 }
0x1eff   : > { %v3762_v49 = vpop.f32.mrb[56].mxu1 }
0x1f00   : > { %v3763_v50 = vadd.f32 %v5215_v48, %v3762_v49  ;;  %v5827_v51 = vpop.f32.mrb[57].mxu1 }
0x1f02   : > { %v3767_v52 = vmul.f32 0.70710677, %v3763_v50  ;;  %v3766_v54 = vmul.f32 0.5, %v3763_v50 }
0x1f04   : > { %6297 = verf.f32 %v3767_v52 }
0x1f0e   : > { %v6298_v53 = vpop.eup %6297 }
0x1f0f   : > { %v3769_v55 = vadd.f32 1.0, %v6298_v53 }
0x1f11   : > { %v3770_v56 = vmul.f32 %v3769_v55, %v3766_v54 }
0x1f13   : > { %5861 = vmatmul.mubr.f32.vlgmr.msra.gmra.mrb[14].mxu0 %v3770_v56 }
0x1f14   : > { %5906 = vmatprep.mubr.msk.f32.mxu0 %vm6387_vm0, %v6388_v14 }
0x1fe6   : > { %v3859_v58 = vpop.f32.mrb[14].mxu0 }
0x1fe7   : > { %v3860_v59 = vadd.f32 %v5233_v57, %v3859_v58  ;;  %v5862_v60 = vpop.f32.mrb[15].mxu0 }
0x1fe9   : > { %v7306_v61 = vadd.f32 %v3860_v59, %v7212_v63  ;;  %v5237_v63 = vld [vmem:[%s7600_s5 + $0x68] sm:$0xff] }
0x1fea   : > { %v6133_v7 = vpack.c.bf16 %v5237_v63, %v5236_v6 }
0x1feb   : > { %v3866_v62 = vsel %vm618_vm2, %v7306_v61, 0.0 }
0x1fec   : > { %3867 = vadd.xlane.f32.xlu0 %v3866_v62  ;;  %6134 = vmatpush3.bf16.msra.mxu1 %v6133_v7 }
0x1fed   : > { %6135 = vmatprep.subr.bf16.mxu1 %v6386_v4 }
0x1ff0   : > { %6137 = vmatpush3.bf16.msra.mxu1 %v6136_v10 }
0x1ff1   : > { %5874 = vmatprep.subr.mxu1 %v6388_v14 }
0x2079   : > { %v3868_v0 = vpop.xlane.xlu0 %3867 }
0x207a   : > { %v3869_v1 = vmul.f32 0.03125, %v3868_v0 }
0x207c   : > { %v3870_v2 = vsub.f32 %v7306_v61, %v3869_v1 }
0x207e   : > { %v3871_v3 = vmul.f32 %v3870_v2, %v3870_v2 }
0x2080   : > { %v3872_v5 = vsel %vm618_vm2, %v3871_v3, 0.0 }
0x2081   : > { %3873 = vadd.xlane.f32.xlu1 %v3872_v5 }
0x210e   : > { %v3874_v12 = vpop.xlane.xlu1 %3873 }
0x210f   : > { %v3875_v15 = vmul.f32 0.03125, %v3874_v12 }
0x2111   : > { %v3876_v16 = vadd.f32 1e-05, %v3875_v15 }
0x2113   : > { %6299 = vrsqrt.f32 %v3876_v16 }
0x211d   : > { %v6300_v17 = vpop.eup %6299 }
0x211e   : > { %v3878_v19 = vmul.f32 %v6300_v17, %v3870_v2 }
0x2120   : > { %v3883_v13 = vmul.f32 %v5234_v18, %v3878_v19 }
0x2122   : > { %v3888_v21 = vadd.f32 %v5235_v20, %v3883_v13 }
0x2124   : > { %5872 = vmatmul.mubr.msk.f32.vlgmr.msra.gmra.mrb[58].mxu1 %vm618_vm2, %v3888_v21 }
0x2125   : > { %5876 = vmatprep.mubr.msk.f32.mxu1 %vm6387_vm0, %v6388_v14 }
0x21f7   : > { %v3963_v24 = vpop.f32.mrb[58].mxu1 }
0x21f8   : > { %3971 = vrot.lane.b32.xlu1 %v3963_v24, %s7662_s2  ;;  %3968 = vrot.lane.b32.xlu0 %v3963_v24, %s7663_s24  ;;  %v5873_v22 = vpop.f32.mrb[59].mxu1  ;;  %v3977_v29 = vmul.f32 0.17677669, %v3963_v24  ;;  %s7665_s2 = sld [smem:[#allocation15_spill]]  ;;  %s5287_s24 = sshll.u32 %s6505_s25, 7 }
0x21f9   : > { %s6398_s25 = smov [#allocation2]  }
0x21fa   : > { %s6325_s1 = sshll.u32 %s6398_s25, 4  ;;  %s6326_s1 = int_to_ptr.vmem [resolvable:$false] %s6325_s1 }
0x21fb   : > { %s6327_s16 = scalar_lea.vmem %s6326_s1, 256 }
0x21fc   : > { %3974 = vrot.lane.b32.xlu1 %v3963_v24, %s7656_s21  ;;  %3981 = vrot.lane.b32.xlu0 %v3963_v24, %s7657_s19  ;;  %s5108_s21 = sshll.u32 %s510_s20, 3 }
0x21fd   : > { %s512_s15 = scalar_lea.vmem [#allocation2], %s5108_s21 }
0x21fe   : > { %s5045_s28 = sshll.u32 %s512_s15, 4  ;;  %s7555_s28 = int_to_ptr.vmem [resolvable:$true] %s5045_s28 }
0x21ff   : > { %s6321_s18 = scalar_lea.vmem %s7555_s28, 128  ;;  %p6328_p0 = scmp.lt.s32.totalorder %s7555_s28, %s6326_s1 }
0x2200   : > { %p6322_p11 = scmp.ne.s32.totalorder %s7555_s28, %s6321_s18  ;;  %p6329_p1 = scmp.lt.s32.totalorder %s6327_s16, %s6321_s18 }
0x2202   : > { %p6323_p12 = pnand %p6322_p11, %p6522_p5  ;;  %p6330_p2 = por %p6329_p1, %p6328_p0 }
0x2204   : > { %p6324_p13 = pneg %p6323_p12 }
0x2206   : > { %p6331_p3 = pnand %p6330_p2, %p6324_p13 }
0x226a   : > { %v7339_v23 = vpop.permute.xlu1 %3971  ;;  %v7341_v25 = vpop.permute.xlu0 %3968 }
0x226b   : > { %4135 = vrot.lane.b32.xlu0 %v7339_v23, %s7657_s19  ;;  %4058 = vrot.lane.b32.xlu1 %v7341_v25, %s7657_s19  ;;  %v3978_v31 = vmul.f32 0.17677669, %v7341_v25  ;;  %v3979_v26 = vmul.f32 0.17677669, %v7339_v23 }
0x226e   : > { %v7347_v27 = vpop.permute.xlu1 %3974  ;;  %v3982_v28 = vpop.permute.xlu0 %3981 }
0x226f   : > { %4212 = vrot.lane.b32.xlu1 %v7347_v27, %s7657_s19  ;;  %5875 = vmatpush3.xpose.msk.msra.mxu1 %vm735_vm3, %v3982_v28  ;;  %v3980_v34 = vmul.f32 0.17677669, %v7347_v27 }
0x2270   : > { %5879 = vmatprep.subr.mxu1 %v6388_v14 }
0x2272   : > { %5877 = vmatmul.mubr.msk.f32.vlgmr.msra.gmra.mrb[60].mxu1 %vm735_vm3, %v3977_v29  ;;  %v5253_v29 = vld [vmem:[%s7601_s6 + $0x60] sm:$0xff] }
0x2273   : > { %5881 = vmatprep.mubr.msk.f32.mxu1 %vm6387_vm0, %v6388_v14 }
0x22dd   : > { %v4059_v30 = vpop.permute.xlu1 %4058  ;;  %v4136_v32 = vpop.permute.xlu0 %4135 }
0x22de   : > { %5880 = vmatpush3.xpose.msk.msra.mxu1 %vm735_vm3, %v4059_v30  ;;  %v5254_v30 = vld [vmem:[%s7601_s6 + $0x68] sm:$0xff] }
0x22df   : > { %5884 = vmatprep.subr.mxu1 %v6388_v14 }
0x22e1   : > { %5882 = vmatmul.mubr.msk.f32.vlgmr.msra.gmra.mrb[62].mxu1 %vm735_vm3, %v3978_v31  ;;  %v4213_v33 = vpop.permute.xlu1 %4212  ;;  %v6139_v31 = vpack.c.bf16 %v5254_v30, %v5253_v29  ;;  %v5280_v29 = vld [vmem:[%s7607_s12 + $0x1e8] sm:$0xff] }
0x22e2   : > { %5885 = vmatpush3.xpose.msk.msra.mxu1 %vm735_vm3, %v4136_v32  ;;  %5886 = vmatprep.mubr.msk.f32.mxu1 %vm6387_vm0, %v6388_v14  ;;  %v5255_v32 = vld [vmem:[%s7601_s6 + $0x70] sm:$0xff] }
0x22e3   : > { %5889 = vmatprep.subr.mxu1 %v6388_v14 }
0x22e5   : > { %5887 = vmatmul.mubr.msk.f32.vlgmr.msra.gmra.mrb[64].mxu1 %vm735_vm3, %v3979_v26  ;;  %v5256_v26 = vld [vmem:[%s7601_s6 + $0x78] sm:$0xff] }
0x22e6   : > { %5890 = vmatpush3.xpose.msk.msra.mxu1 %vm735_vm3, %v4213_v33  ;;  %5891 = vmatprep.mubr.msk.f32.mxu1 %vm6387_vm0, %v6388_v14  ;;  %v6142_v33 = vpack.c.bf16 %v5256_v26, %v5255_v32  ;;  %v5282_v32 = vld [vmem:[%s7607_s12 + $0x1f8] sm:$0xff] }
0x22e7   : > { %5894 = vmatprep.subr.mxu1 %v6388_v14 }
0x22e9   : > { %5892 = vmatmul.mubr.msk.f32.vlgmr.msra.gmra.mrb[66].mxu1 %vm735_vm3, %v3980_v34 }
0x22ea   : > { %5896 = vmatprep.mubr.msk.f32.mxu1 %vm6387_vm0, %v6388_v14 }
0x2345   : > { %v4054_v35 = vpop.f32.mrb[60].mxu1 }
0x2346   : > { %v4289_v36 = vsel %vm6685_vm4, %v4054_v35, -1e+30  ;;  %v5878_v37 = vpop.f32.mrb[61].mxu1 }
0x2347   : > { %v4293_v38 = vsel %vm735_vm3, %v4289_v36, -inf }
0x2348   : > { %4294 = vmax.xlane.f32.xlu0 %v4293_v38 }
0x23b4   : > { %v4131_v39 = vpop.f32.mrb[62].mxu1 }
0x23b5   : > { %v4290_v40 = vsel %vm6685_vm4, %v4131_v39, -1e+30  ;;  %v5883_v41 = vpop.f32.mrb[63].mxu1 }
0x23b6   : > { %v4296_v42 = vsel %vm735_vm3, %v4290_v40, -inf }
0x23b7   : > { %4297 = vmax.xlane.f32.xlu1 %v4296_v42 }
0x23b8   : > { %v4208_v43 = vpop.f32.mrb[64].mxu1 }
0x23b9   : > { %v4291_v44 = vsel %vm6685_vm4, %v4208_v43, -1e+30  ;;  %v5888_v45 = vpop.f32.mrb[65].mxu1 }
0x23ba   : > { %v4299_v46 = vsel %vm735_vm3, %v4291_v44, -inf }
0x23bb   : > { %4300 = vmax.xlane.f32.xlu0 %v4299_v46  ;;  %v5257_v46 = vld [vmem:[%s7602_s7 + $0x3] ss:$0 sm:$0xff] }
0x23bc   : > { %v4285_v47 = vpop.f32.mrb[66].mxu1 }
0x23bd   : > { %v4292_v48 = vsel %vm6685_vm4, %v4285_v47, -1e+30  ;;  %v5893_v49 = vpop.f32.mrb[67].mxu1 }
0x23be   : > { %v4302_v50 = vsel %vm735_vm3, %v4292_v48, -inf }
0x23bf   : > { %4303 = vmax.xlane.f32.xlu0 %v4302_v50 }
0x23c8   : > { %4337 = vrot.lane.b32.xlu1 %v3963_v24, %s7658_s29 }
0x23d5   : > { %v4295_v51 = vpop.xlane.xlu0 %4294 }
0x23d6   : > { %v4305_v52 = vsub.f32 %v4289_v36, %v4295_v51 }
0x23d8   : > { %v4309_v53 = vmul.f32 1.442695, %v4305_v52 }
0x23da   : > { %6301 = vpow2.f32 %v4309_v53 }
0x23e4   : > { %v6302_v54 = vpop.eup %6301 }
0x23e5   : > { %v4317_v55 = vsel %vm735_vm3, %v6302_v54, 0.0 }
0x23ec   : > { %4318 = vadd.xlane.f32.xlu1 %v4317_v55 }
0x2444   : > { %v4298_v56 = vpop.xlane.xlu1 %4297 }
0x2445   : > { %v4306_v57 = vsub.f32 %v4290_v40, %v4298_v56 }
0x2447   : > { %v4311_v58 = vmul.f32 1.442695, %v4306_v57  ;;  %v5261_v57 = vld [vmem:[%s7605_s10 + $0x60] sm:$0xff] }
0x2448   : > { %v4338_v59 = vpop.permute.xlu1 %4337  ;;  %v4301_v8 = vpop.xlane.xlu0 %4300 }
0x2449   : > { %6303 = vpow2.f32 %v4311_v58  ;;  %v4307_v60 = vsub.f32 %v4291_v44, %v4301_v8  ;;  %5895 = vmatpush3.msra.mxu1 %v4338_v59  ;;  %v5263_v59 = vld [vmem:[%s7605_s10 + $0x70] sm:$0xff]  ;;  %v5264_v8 = vld [vmem:[%s7605_s10 + $0x78] sm:$0xff] }
0x244a   : > { %5899 = vmatprep.subr.mxu1 %v6388_v14 }
0x244b   : > { %v4313_v62 = vmul.f32 1.442695, %v4307_v60  ;;  %v6148_v60 = vpack.c.bf16 %v5264_v8, %v5263_v59 }
0x244c   : > { %v4304_v0 = vpop.xlane.xlu0 %4303 }
0x244d   : > { %6305 = vpow2.f32 %v4313_v62  ;;  %v4308_v1 = vsub.f32 %v4292_v48, %v4304_v0  ;;  %v5267_v62 = vld [vmem:[%s7607_s12 + $0x180] sm:$0xff]  ;;  %v5268_v0 = vld [vmem:[%s7607_s12 + $0x188] sm:$0xff] }
0x244f   : > { %v4315_v2 = vmul.f32 1.442695, %v4308_v1  ;;  %v5269_v1 = vld [vmem:[%s7607_s12 + $0x190] sm:$0xff] }
0x2451   : > { %6307 = vpow2.f32 %v4315_v2  ;;  %v6151_v2 = vpack.c.bf16 %v5268_v0, %v5267_v62 }
0x2453   : > { %v6304_v3 = vpop.eup %6303 }
0x2454   : > { %v4320_v5 = vsel %vm735_vm3, %v6304_v3, 0.0 }
0x2455   : > { %4321 = vadd.xlane.f32.xlu0 %v4320_v5 }
0x2457   : > { %v6306_v6 = vpop.eup %6305 }
0x2458   : > { %v4323_v63 = vsel %vm735_vm3, %v6306_v6, 0.0 }
0x2459   : > { %4324 = vadd.xlane.f32.xlu1 %v4323_v63  ;;  %v5272_v63 = vld [vmem:[%s7607_s12 + $0x1a8] sm:$0xff] }
0x245b   : > { %v6308_v7 = vpop.eup %6307 }
0x245c   : > { %v4326_v11 = vsel %vm735_vm3, %v6308_v7, 0.0 }
0x245d   : > { %4327 = vadd.xlane.f32.xlu0 %v4326_v11 }
0x246a   : > { %4489 = vrot.lane.b32.xlu1 %v7339_v23, %s7658_s29 }
0x246e   : > { %4565 = vrot.lane.b32.xlu1 %v7347_v27, %s7658_s29 }
0x2473   : > { %4413 = vrot.lane.b32.xlu0 %v7341_v25, %s7658_s29 }
0x2479   : > { %v4319_v9 = vpop.xlane.xlu1 %4318 }
0x247a   : > { %6309 = vrcp.f32 %v4319_v9 }
0x2484   : > { %v6310_v10 = vpop.eup %6309 }
0x2485   : > { %v4333_v12 = vmul.f32 %v6310_v10, %v6302_v54 }
0x2487   : > { %5897 = vmatmul.mubr.msk.f32.vlgmr.msra.gmra.mrb[68].mxu1 %vm735_vm3, %v4333_v12 }
0x2488   : > { %5901 = vmatprep.mubr.msk.f32.mxu1 %vm6387_vm0, %v6388_v14 }
0x24e2   : > { %v4322_v15 = vpop.xlane.xlu0 %4321 }
0x24e3   : > { %6311 = vrcp.f32 %v4322_v15  ;;  %v5259_v15 = vld [vmem:[%s7603_s8 + $0x3] ss:$0 sm:$0xff] }
0x24e6   : > { %v4325_v16 = vpop.xlane.xlu1 %4324 }
0x24e7   : > { %6313 = vrcp.f32 %v4325_v16 }
0x24ea   : > { %v4490_v17 = vpop.permute.xlu1 %4489  ;;  %v4328_v18 = vpop.xlane.xlu0 %4327 }
0x24eb   : > { %6315 = vrcp.f32 %v4328_v18  ;;  %5905 = vmatpush3.msra.mxu0 %v4490_v17  ;;  %v5260_v17 = vld [vmem:[%s7604_s9 + $0x3] ss:$0 sm:$0xff] }
0x24ec   : > { %6138 = vmatprep.subr.bf16.mxu0 %v6386_v4 }
0x24ed   : > { %v6312_v19 = vpop.eup %6311 }
0x24ee   : > { %v4334_v20 = vmul.f32 %v6312_v19, %v6304_v3  ;;  %v4414_v13 = vpop.permute.xlu0 %4413  ;;  %v4566_v21 = vpop.permute.xlu1 %4565  ;;  %v5270_v3 = vld [vmem:[%s7607_s12 + $0x198] sm:$0xff] }
0x24ef   : > { %5900 = vmatpush3.msra.mxu1 %v4414_v13  ;;  %v6154_v5 = vpack.c.bf16 %v5270_v3, %v5269_v1  ;;  %v5274_v13 = vld [vmem:[%s7607_s12 + $0x1b8] sm:$0xff] }
0x24f0   : > { %5902 = vmatmul.mubr.msk.f32.vlgmr.msra.gmra.mrb[70].mxu1 %vm735_vm3, %v4334_v20  ;;  %5909 = vmatprep.subr.mxu1 %v6388_v14  ;;  %v5273_v20 = vld [vmem:[%s7607_s12 + $0x1b0] sm:$0xff] }
0x24f1   : > { %v6314_v24 = vpop.eup %6313  ;;  %5910 = vmatpush3.msra.mxu1 %v4566_v21  ;;  %5911 = vmatprep.mubr.msk.f32.mxu1 %vm6387_vm0, %v6388_v14  ;;  %v6160_v21 = vpack.c.bf16 %v5274_v13, %v5273_v20 }
0x24f2   : > { %v4335_v22 = vmul.f32 %v6314_v24, %v6306_v6  ;;  %6144 = vmatprep.subr.bf16.mxu1 %v6386_v4  ;;  %v5271_v6 = vld [vmem:[%s7607_s12 + $0x1a0] sm:$0xff] }
0x24f3   : > { %v5275_v24 = vld [vmem:[%s7607_s12 + $0x1c0] sm:$0xff] }
0x24f4   : > { %5907 = vmatmul.mubr.msk.f32.vlgmr.msra.gmra.mrb[16].mxu0 %vm735_vm3, %v4335_v22 }
0x24f5   : > { %v6316_v23 = vpop.eup %6315  ;;  %5922 = vmatprep.mubr.msk.f32.mxu0 %vm6387_vm0, %v6388_v14  ;;  %6140 = vmatpush3.bf16.msra.mxu0 %v6139_v31  ;;  %v5281_v31 = vld [vmem:[%s7607_s12 + $0x1f0] sm:$0xff] }
0x24f6   : > { %v4336_v25 = vmul.f32 %v6316_v23, %v6308_v7  ;;  %6141 = vmatprep.subr.bf16.mxu0 %v6386_v4  ;;  %v6157_v7 = vpack.c.bf16 %v5272_v63, %v5271_v6  ;;  %v5277_v23 = vld [vmem:[%s7607_s12 + $0x1d0] sm:$0xff]  ;;  %v6172_v26 = vpack.c.bf16 %v5282_v32, %v5281_v31 }
0x24f8   : > { %5912 = vmatmul.mubr.msk.f32.vlgmr.msra.gmra.mrb[72].mxu1 %vm735_vm3, %v4336_v25  ;;  %v5278_v25 = vld [vmem:[%s7607_s12 + $0x1d8] sm:$0xff] }
0x24f9   : > { %5933 = vmatprep.mubr.msk.f32.mxu1 %vm6387_vm0, %v6388_v14  ;;  %6143 = vmatpush3.bf16.msra.mxu0 %v6142_v33  ;;  %v4946_v33 = vld [vmem:[%s7609_s14] sm:$0xff] }
0x24fa   : > { %6150 = vmatprep.subr.bf16.mxu0 %v6386_v4 }
0x255a   : > { %v4409_v27 = vpop.f32.mrb[68].mxu1 }
0x255b   : > { %v5898_v28 = vpop.f32.mrb[69].mxu1 }
0x255c   : > { %v5279_v28 = vld [vmem:[%s7607_s12 + $0x1e0] sm:$0xff] }
0x255d   : > { %v6169_v30 = vpack.c.bf16 %v5280_v29, %v5279_v28 }
0x25c3   : > { %v4485_v34 = vpop.f32.mrb[70].mxu1 }
0x25c4   : > { %4642 = vrot.lane.b32.xlu0 %v4485_v34, %s7659_s23  ;;  %v5903_v35 = vpop.f32.mrb[71].mxu1  ;;  %v4947_v34 = vld [vmem:[%s7609_s14 + $0x8] sm:$0xff] }
0x25c5   : > { %v6175_v35 = vpack.c.bf16 %v4947_v34, %v4946_v33 }
0x25c7   : > { %v4561_v36 = vpop.f32.mrb[16].mxu0 }
0x25c8   : > { %4646 = vrot.lane.b32.xlu1 %v4561_v36, %s7660_s30  ;;  %v5908_v37 = vpop.f32.mrb[17].mxu0  ;;  %v5265_v36 = vld [vmem:[%s7606_s11 + $0x3] ss:$0 sm:$0xff]  ;;  %s7666_s30 = sld [smem:[#allocation16_spill]] }
0x25cb   : > { %v4637_v38 = vpop.f32.mrb[72].mxu1 }
0x25cc   : > { %4650 = vrot.lane.b32.xlu0 %v4637_v38, %s7661_s27  ;;  %v5913_v39 = vpop.f32.mrb[73].mxu1 }
0x25ce   : > { %s7553_s27 = scalar_lea.hbm %s7666_s30, %s5287_s24 }
0x2636   : > { %v4643_v40 = vpop.permute.xlu0 %4642 }
0x2637   : > { %v4653_v42 = vsel %vm735_vm3, %v4409_v27, %v4643_v40  ;;  %v6166_v27 = vpack.c.bf16 %v5278_v25, %v5277_v23 }
0x263a   : > { %v4647_v41 = vpop.permute.xlu1 %4646 }
0x263b   : > { %v4654_v43 = vsel %vm1409_vm5, %v4653_v42, %v4647_v41 }
0x263e   : > { %v4651_v44 = vpop.permute.xlu0 %4650 }
0x263f   : > { %v4655_v45 = vsel %vm1411_vm6, %v4654_v43, %v4651_v44 }
0x2640   : > { %5923 = vmatmul.mubr.msk.f32.vlgmr.msra.gmra.mrb[18].mxu0 %vm618_vm2, %v4655_v45  ;;  %v4949_v45 = vld [vmem:[%s7609_s14 + $0x18] sm:$0xff] }
0x2641   : > { %5968 = vmatprep.mubr.msk.f32.mxu0 %vm6387_vm0, %v6388_v14  ;;  %6152 = vmatpush3.bf16.msra.mxu0 %v6151_v2 }
0x2642   : > { %6153 = vmatprep.subr.bf16.mxu0 %v6386_v4 }
0x2645   : > { %6155 = vmatpush3.bf16.msra.mxu0 %v6154_v5 }
0x2646   : > { %6156 = vmatprep.subr.bf16.mxu0 %v6386_v4 }
0x2649   : > { %6158 = vmatpush3.bf16.msra.mxu0 %v6157_v7 }
0x264a   : > { %6159 = vmatprep.subr.bf16.mxu0 %v6386_v4 }
0x264d   : > { %6161 = vmatpush3.bf16.msra.mxu0 %v6160_v21 }
0x264e   : > { %6162 = vmatprep.subr.bf16.mxu0 %v6386_v4 }
0x2713   : > { %v4735_v47 = vpop.f32.mrb[18].mxu0 }
0x2714   : > { %v4736_v48 = vadd.f32 %v5257_v46, %v4735_v47  ;;  %v5924_v49 = vpop.f32.mrb[19].mxu0  ;;  %v5283_v47 = vld [vmem:[%s7608_s13 + $0x3] ss:$0 sm:$0xff] }
0x2716   : > { %v7440_v50 = vadd.f32 %v4736_v48, %v7306_v61  ;;  %v5262_v61 = vld [vmem:[%s7605_s10 + $0x68] sm:$0xff] }
0x2717   : > { %v6145_v58 = vpack.c.bf16 %v5262_v61, %v5261_v57 }
0x2718   : > { %v4742_v51 = vsel %vm618_vm2, %v7440_v50, 0.0 }
0x2719   : > { %4743 = vadd.xlane.f32.xlu1 %v4742_v51  ;;  %6146 = vmatpush3.bf16.msra.mxu1 %v6145_v58 }
0x271a   : > { %6147 = vmatprep.subr.bf16.mxu1 %v6386_v4 }
0x271d   : > { %6149 = vmatpush3.bf16.msra.mxu1 %v6148_v60 }
0x271e   : > { %6174 = vmatprep.subr.bf16.mxu1 %v6386_v4 }
0x27a6   : > { %v4744_v52 = vpop.xlane.xlu1 %4743 }
0x27a7   : > { %v4745_v53 = vmul.f32 0.03125, %v4744_v52 }
0x27a9   : > { %v4746_v54 = vsub.f32 %v7440_v50, %v4745_v53  ;;  %v5284_v53 = vld [vmem:[%s7665_s2] ss:$0 sm:$0xff] }
0x27ab   : > { %v4747_v55 = vmul.f32 %v4746_v54, %v4746_v54 }
0x27ad   : > { %v4748_v56 = vsel %vm618_vm2, %v4747_v55, 0.0 }
0x27ae   : > { %4749 = vadd.xlane.f32.xlu0 %v4748_v56 }
0x283b   : > { %v4750_v11 = vpop.xlane.xlu0 %4749 }
0x283c   : > { %v4751_v9 = vmul.f32 0.03125, %v4750_v11 }
0x283e   : > { %v4752_v10 = vadd.f32 1e-05, %v4751_v9 }
0x2840   : > { %6317 = vrsqrt.f32 %v4752_v10 }
0x284a   : > { %v6318_v12 = vpop.eup %6317 }
0x284b   : > { %v4754_v16 = vmul.f32 %v6318_v12, %v4746_v54 }
0x284d   : > { %v4759_v18 = vmul.f32 %v5259_v15, %v4754_v16 }
0x284f   : > { %v4764_v19 = vadd.f32 %v5260_v17, %v4759_v18 }
0x2851   : > { %5934 = vmatmul.mubr.msk.f32.vlgmr.msra.gmra.mrb[74].mxu1 %vm618_vm2, %v4764_v19 }
0x2852   : > { %5979 = vmatprep.mubr.msk.f32.mxu1 %vm6387_vm0, %v6388_v14  ;;  %v5276_v14 = vld [vmem:[%s7607_s12 + $0x1c8] sm:$0xff]  ;;  %6176 = vmatpush3.bf16.msra.mxu1 %v6175_v35 }
0x2853   : > { %v6163_v22 = vpack.c.bf16 %v5276_v14, %v5275_v24  ;;  %6177 = vmatprep.subr.bf16.mxu1 %v6386_v4 }
0x2855   : > { %6164 = vmatpush3.bf16.msra.mxu0 %v6163_v22 }
0x2856   : > { %6165 = vmatprep.subr.bf16.mxu0 %v6386_v4 }
0x2859   : > { %6167 = vmatpush3.bf16.msra.mxu0 %v6166_v27 }
0x285a   : > { %6168 = vmatprep.subr.bf16.mxu0 %v6386_v4 }
0x285d   : > { %6170 = vmatpush3.bf16.msra.mxu0 %v6169_v30 }
0x285e   : > { %6171 = vmatprep.subr.bf16.mxu0 %v6386_v4  ;;  %v4948_v4 = vld [vmem:[%s7609_s14 + $0x10] sm:$0xff] }
0x285f   : > { %v6178_v46 = vpack.c.bf16 %v4949_v45, %v4948_v4 }
0x2861   : > { %6173 = vmatpush3.bf16.msra.mxu0 %v6172_v26  ;;  %6179 = vmatpush3.bf16.msra.mxu1 %v6178_v46 }
0x2924   : > { %v4844_v37 = vpop.f32.mrb[74].mxu1 }
0x2925   : > { %v4845_v38 = vadd.f32 %v5265_v36, %v4844_v37  ;;  %v5935_v39 = vpop.f32.mrb[75].mxu1 }
0x2927   : > { %v4849_v40 = vmul.f32 0.70710677, %v4845_v38  ;;  %v4848_v42 = vmul.f32 0.5, %v4845_v38 }
0x2929   : > { %6319 = verf.f32 %v4849_v40 }
0x2933   : > { %v6320_v41 = vpop.eup %6319 }
0x2934   : > { %v4851_v43 = vadd.f32 1.0, %v6320_v41 }
0x2936   : > { %v4852_v44 = vmul.f32 %v4851_v43, %v4848_v42 }
0x2938   : > { %5969 = vmatmul.mubr.f32.vlgmr.msra.gmra.mrb[20].mxu0 %v4852_v44 }
0x2a0b   : > { %v4941_v48 = vpop.f32.mrb[20].mxu0 }
0x2a0c   : > { %v4942_v49 = vadd.f32 %v5283_v47, %v4941_v48  ;;  %v5970_v51 = vpop.f32.mrb[21].mxu0 }
0x2a0e   : > { %v4945_v52 = vadd.f32 %v4942_v49, %v7440_v50 }
0x2a10   : > { %5980 = vmatmul.mubr.msk.f32.vlgmr.msra.gmra.mrb[76].mxu1 %vm618_vm2, %v4945_v52 }
0x2ae3   : > { %v5026_v54 = vpop.f32.mrb[76].mxu1 }
0x2ae4   : > { %v5027_v55 = vadd.f32 %v5284_v53, %v5026_v54  ;;  %v5981_v56 = vpop.f32.mrb[77].mxu1 }
0x2ae6   : > { %5030 = vst [vmem:[%s512_s15] sm:$0xff] %v5027_v55 }
0x2ae7   : > { %6334 = shalt.err (!%p6331_p3)
}
0x2ae8   : > { %s6335_s20 = scalar_lea.hbm %s7553_s27, 128  ;;  %s6339_s29 = scalar_lea.hbm %s7666_s30, 256 }
0x2ae9   : > { %p6336_p4 = scmp.ne.s32.totalorder %s7553_s27, %s6335_s20  ;;  %p6340_p9 = scmp.lt.u32.totalorder %s7553_s27, %s7666_s30 }
0x2aea   : > { %p6341_p10 = scmp.lt.u32.totalorder %s6339_s29, %s6335_s20  ;;  %p6343_p12 = scmp.lt.u32.totalorder %s6335_s20, %s7553_s27 }
0x2aeb   : > { %p6337_p7 = pnand %p6336_p4, %p6522_p5 }
0x2aec   : > { %p6342_p11 = por %p6341_p10, %p6340_p9 }
0x2aed   : > { %p6338_p8 = pneg %p6337_p7 }
0x2aee   : > { %p6344_p13 = por %p6343_p12, %p6342_p11 }
0x2af0   : > { %p6345_p0 = pnand %p6344_p13, %p6338_p8 }
0x2af2   : > { %6348 = shalt.err (!%p6345_p0)
}
0x2af3   : > { %6180 = dma.vmem_to_hbm [thread:$0]  (%p6522_p5), %s7555_s28, 128, %s7553_s27, %s5032_s17  }
0x2af4 PF: > { %s7667_s15 = sld [smem:[#allocation7_spill]]  ;;  %s7668_s26 = sld [smem:[#allocation5_spill]] }
0x2afa   : > { %p6186_p1 = scmp.ge.s32.totalorder %s7667_s15, 2  ;;  %s5057_s18 = sand.u32 1, %s7668_s26  }
0x2afb   : > { %s5058_s25 = scalar_lea.sflag [#allocation3], %s5057_s18 }
0x2afc   : > { %p6183_p2 = pnand %p6186_p1, %p6526_p6 }
0x2afe   : > { %6366 = dma.done.wait (!%p6183_p2), %s5058_s25, 128  }
0x2aff   : > { %6368 = vsyncadd (!%p6183_p2), %s5058_s25, 4294967168  ;;  %s7670_s24 = sld [smem:[#allocation8_spill]]  ;;  %s7671_s1 = sld [smem:[#allocation6_spill]] }
0x2b00   : > { %s7672_s23 = sld [smem:[#allocation9_spill]]  ;;  %s7673_s21 = smov %s6375_s22 }
0x2b05   : > { %p26_p3 = scmp.ge.s32.totalorder %s7670_s24, 4   ;;  %s7674_s22 = smov %s7671_s1 }
0x2b07   :  { %28 = sbr.rel (!%p26_p3) target bundleno = 9 (0x9), region = 131 }
0x2b0e   :  { %5063 = vsyncpa [#allocation3], 1 }
0x2b0f   :  { %5065 = vsyncpa [#allocation3 + $0x1], 1 }

</bundles_post_ra>
